<compile_context>
chip_gen: v5e
topology: v5e:2x2
jax: 0.10.0
libtpu: 0.0.40
codegen_flags: <defaults>
</compile_context>

<pallas_src>
import numpy as np

import jax
import jax.numpy as jnp
from jax import lax
from jax.experimental import pallas as pl
from jax.experimental.pallas import tpu as pltpu


# ---------------------------------------------------------------------------
# Fused Pallas kernel: (emb+input-proj) lookup + BiLSTM + GCN + head + classifier
# ---------------------------------------------------------------------------

def gtfid_fused_kernel(tok_ref, lens_ref, table_ref, whh_ref,
                       a_ref, nx_ref, gw1_ref, gb1_ref, gw2_hbm, gb2_ref, pool_ref,
                       wt_hbm, bt_ref, wg_hbm, bg_ref, wc_ref, bc_ref,
                       out_ref,
                       gw2_buf, wt_buf, wg_buf, dma_sem):
    """One-shot GTFID forward.

    tok_ref  : (T*2B, 1) int32  time-major interleaved tokens; per timestep the 2B rows
                                are [fwd batch 0..B-1, reversed-bwd batch 0..B-1].
                                Backward rows are pre-shifted by +V on the host so they
                                index the backward half of the folded table.
    lens_ref : (2B, 1)  int32   sequence lengths (duplicated for both directions)
    table_ref: (VP, 4H) bf16    vstack(emb@W_ih_f + b_f, emb@W_ih_b + b_b), zero-padded
                                to VP = round_up(2V, 128) rows (gate order i,f,g,o)
    whh_ref  : (H, 8H)  bf16    hstack(W_hh_fwd, W_hh_bwd)
    a_ref    : (N, N)   f32     D^{-1/2}(A+I)D^{-1/2}
    nx_ref   : (N, 1)   f32     node features
    gw1/gb1  : (1, G), (1, G)   GCNConv(1, G)
    gw2_hbm  : (G, G)   bf16    GCNConv(G, G) weight  (HBM, manually streamed)
    gb2_ref  : (1, G)   f32
    pool_ref : (B, N)   f32     global_mean_pool as a matmul
    wt_hbm   : (2H, F)  bf16    temp_proj  (eval-BN folded, HBM, manually streamed)
    bt_ref   : (1, F)   f32
    wg_hbm   : (G, F)   bf16    graph_proj (eval-BN folded, HBM, manually streamed)
    bg_ref   : (1, F)   f32
    wc/bc    : (F, C), (1, C)   classifier
    out_ref  : (B, C)           logits
    """
    f32 = jnp.float32
    bf16 = jnp.bfloat16

    T2B = tok_ref.shape[0]
    B2 = lens_ref.shape[0]          # 2B (both directions stacked)
    B = B2 // 2
    T = T2B // B2
    VP = table_ref.shape[0]
    H4 = table_ref.shape[1]
    H = H4 // 4                     # per-direction hidden size

    # ---- start tail-weight DMAs; they stream in behind the LSTM recurrence --------
    cp_gw2 = pltpu.make_async_copy(gw2_hbm, gw2_buf, dma_sem.at[0]); cp_gw2.start()
    cp_wt = pltpu.make_async_copy(wt_hbm, wt_buf, dma_sem.at[1]); cp_wt.start()
    cp_wg = pltpu.make_async_copy(wg_hbm, wg_buf, dma_sem.at[2]); cp_wg.start()

    # ---- embedding + input projection + bias: ONE one-hot MXU matmul --------------
    tok = tok_ref[...]                                                     # (T*2B, 1)
    onehot = jnp.where(tok == lax.broadcasted_iota(jnp.int32, (T2B, VP), 1),
                       1.0, 0.0).astype(bf16)
    g_x = jnp.dot(onehot, table_ref[...], preferred_element_type=f32)      # (T*2B, 4H)

    # ---- masked recurrence, fully unrolled (T is small & static) ------------------
    lens = lens_ref[...]                                                   # (2B, 1)
    # hoisted broadcasts (not CSE'd by JAX if left inside the loop)
    sel_f = jnp.broadcast_to(
        (lax.broadcasted_iota(jnp.int32, (B2, 1), 0) < B).astype(f32), (B2, H4))
    sel_b = 1.0 - sel_f
    whh = whh_ref[...]      # (H, 8H) bf16; identical RHS feeds all unrolled dots

    h = jnp.zeros((B2, H), f32)
    c = jnp.zeros((B2, H), f32)
    for t in range(T):
        # fwd rows take the W_hh_fwd half of the lanes, bwd rows the W_hh_bwd half
        g_both = jnp.dot(h.astype(bf16), whh, preferred_element_type=f32)  # (2B, 8H)
        g = (g_x[t * B2:(t + 1) * B2, :]
             + sel_f * g_both[:, 0:H4] + sel_b * g_both[:, H4:2 * H4])
        i_g = jax.nn.sigmoid(g[:, 0:H])
        f_g = jax.nn.sigmoid(g[:, H:2 * H])
        g_g = jnp.tanh(g[:, 2 * H:3 * H])
        o_g = jax.nn.sigmoid(g[:, 3 * H:4 * H])
        c_new = f_g * c + i_g * g_g
        h_new = o_g * jnp.tanh(c_new)
        m = (lens > t).astype(f32)        # packed-sequence semantics: freeze past len
        h = m * h_new + (1.0 - m) * h
        c = m * c_new + (1.0 - m) * c

    # cat(h_n[-2], h_n[-1]) : fwd final hiddens || bwd final hiddens -> (B, 2H)
    h_cat = jnp.concatenate([h[0:B, :], h[B:B2, :]], axis=1)

    # ---- GCN (dense normalized adjacency) + global mean pool ----------------------
    # layer 1 exploits in_dim == 1:  A @ (x ⊗ w1) == (A @ x) ⊗ w1
    ax = jnp.dot(a_ref[...], nx_ref[...], preferred_element_type=f32)      # (N, 1)
    h1 = jnp.maximum(ax * gw1_ref[...] + gb1_ref[...], 0.0)                # (N, G)
    cp_gw2.wait()
    h1w = jnp.dot(h1.astype(bf16), gw2_buf[...], preferred_element_type=f32)
    h2 = jnp.maximum(jnp.dot(a_ref[...], h1w, preferred_element_type=f32)
                     + gb2_ref[...], 0.0)
    g_pool = jnp.dot(pool_ref[...], h2, preferred_element_type=f32)        # (B, G)

    # ---- fusion head (eval-BN folded into the Linears) + classifier ---------------
    cp_wt.wait()
    cp_wg.wait()
    tx = jnp.dot(h_cat.astype(bf16), wt_buf[...], preferred_element_type=f32) + bt_ref[...]
    gx = jnp.dot(g_pool.astype(bf16), wg_buf[...], preferred_element_type=f32) + bg_ref[...]
    fused = jnp.maximum(gx + tx, 0.0)
    # TODO(synk): dropout layers are identity in eval mode (stochastic op not reproduced).
    out_ref[...] = jnp.dot(fused, wc_ref[...], preferred_element_type=f32) + bc_ref[...]


# ---------------------------------------------------------------------------
# Pallas wrapper (single gridless call; tail weights streamed manually)
# ---------------------------------------------------------------------------

def run_gtfid(tok_stacked, lens2, params, node_x, a_norm, pool):
    B = pool.shape[0]
    C = params["wc"].shape[1]
    G = params["gcn_w2"].shape[0]
    H2, F = params["wt_f"].shape

    vmem = pl.BlockSpec(memory_space=pltpu.MemorySpace.VMEM)
    hbm = pl.BlockSpec(memory_space=pl.ANY)     # raw HBM ref; DMA'd manually in-kernel

    return pl.pallas_call(
        gtfid_fused_kernel,
        out_shape=jax.ShapeDtypeStruct((B, C), jnp.float32),
        in_specs=[vmem, vmem, vmem, vmem,                    # tok, lens, table, whh
                  vmem, vmem, vmem, vmem, hbm, vmem, vmem,   # a, nx, gw1, gb1, gw2, gb2, pool
                  hbm, vmem, hbm, vmem, vmem, vmem],         # wt, bt, wg, bg, wc, bc
        out_specs=vmem,
        scratch_shapes=[
            pltpu.VMEM((G, G), jnp.bfloat16),        # gcn_w2 staging
            pltpu.VMEM((H2, F), jnp.bfloat16),       # wt_f staging
            pltpu.VMEM((G, F), jnp.bfloat16),        # wg_f staging
            pltpu.SemaphoreType.DMA((3,)),
        ],
        cost_estimate=pl.CostEstimate(flops=30_000_000, transcendentals=41_000,
                                      bytes_accessed=900_000),
    )(tok_stacked, lens2, params["table"], params["whh_wide"],
      a_norm, node_x,
      params["gcn_w1"], params["gcn_b1"], params["gcn_w2"], params["gcn_b2"], pool,
      params["wt_f"], params["bt_f"], params["wg_f"], params["bg_f"],
      params["wc"], params["bc"])


def gtfid_forward(params, seq_pad, lens, node_x, a_norm, pool, vocab_size):
    """Glue: only tiny int32 index ops stay outside the kernel."""
    B, T = seq_pad.shape
    t_idx = jnp.arange(T)
    valid = t_idx[None, :] < lens[:, None]                             # (B, T)

    # Backward direction: reverse only the valid prefix of each sequence
    # (equivalent to the reverse pass of a packed bidirectional LSTM).
    rev_idx = jnp.where(valid, lens[:, None] - 1 - t_idx[None, :], 0)
    seq_rev = jnp.take_along_axis(seq_pad, rev_idx, axis=1)            # (B, T) int32

    # Time-major interleaved stack: per timestep rows = [fwd 0..B-1, bwd 0..B-1].
    # Backward rows are shifted by +V so they select the bwd half of the folded table.
    tok_stacked = jnp.concatenate([seq_pad.T, seq_rev.T + vocab_size], axis=1)  # (T, 2B)
    tok_stacked = tok_stacked.reshape(T * 2 * B, 1).astype(jnp.int32)

    lens2 = jnp.concatenate([lens, lens], axis=0).reshape(2 * B, 1).astype(jnp.int32)

    return run_gtfid(tok_stacked, lens2, params, node_x, a_norm, pool)


# ---------------------------------------------------------------------------
# Deterministic parameter / input construction
# ---------------------------------------------------------------------------

def build_params(key, vocab_size, emb_dim, lstm_hidden, g_hidden, fusion_dim, num_classes):
    H = lstm_hidden // 2
    ks = jax.random.split(key, 24)
    n = lambda k, s, sc=0.1: sc * jax.random.normal(k, s, dtype=jnp.float32)

    emb_w = n(ks[0], (vocab_size, emb_dim)).at[0].set(0.0)             # padding_idx = 0

    # BiLSTM (PyTorch gate order i,f,g,o); per-direction bias is b_ih + b_hh combined.
    wih_f = n(ks[1], (emb_dim, 4 * H)); whh_f = n(ks[2], (H, 4 * H)); b_f = n(ks[3], (1, 4 * H))
    wih_b = n(ks[4], (emb_dim, 4 * H)); whh_b = n(ks[5], (H, 4 * H)); b_b = n(ks[6], (1, 4 * H))

    # Fold embedding + input projection + bias into one lookup table (fwd rows then bwd
    # rows), zero-padded to a 128-multiple of rows for an aligned one-hot MXU matmul.
    table_f = jnp.dot(emb_w, wih_f) + b_f                              # (V, 4H)
    table_b = jnp.dot(emb_w, wih_b) + b_b                              # (V, 4H)
    table = jnp.concatenate([table_f, table_b], axis=0)                # (2V, 4H)
    vp = ((2 * vocab_size + 127) // 128) * 128
    table = jnp.zeros((vp, 4 * H), jnp.float32).at[:2 * vocab_size].set(table)

    # Projections / classifier, stored as (in, out).
    wt = n(ks[7], (lstm_hidden, fusion_dim)); bt = n(ks[8], (1, fusion_dim))
    wg = n(ks[9], (g_hidden, fusion_dim));    bg = n(ks[10], (1, fusion_dim))
    wc = n(ks[11], (fusion_dim, num_classes)); bc = n(ks[12], (1, num_classes))

    # Eval-mode BatchNorm1d (running_mean=0, running_var=1) folded into the Linears.
    eps = 1e-5
    inv = 1.0 / jnp.sqrt(1.0 + eps)
    st = (1.0 + n(ks[13], (1, fusion_dim))) * inv; sht = n(ks[14], (1, fusion_dim))
    sg = (1.0 + n(ks[15], (1, fusion_dim))) * inv; shg = n(ks[16], (1, fusion_dim))

    bf16 = jnp.bfloat16
    return dict(
        table=table.astype(bf16),                                        # (VP, 4H)
        whh_wide=jnp.concatenate([whh_f, whh_b], axis=1).astype(bf16),   # (H, 8H)
        gcn_w1=n(ks[17], (1, g_hidden)), gcn_b1=n(ks[18], (1, g_hidden)),
        gcn_w2=n(ks[19], (g_hidden, g_hidden)).astype(bf16),
        gcn_b2=n(ks[20], (1, g_hidden)),
        wt_f=(wt * st).astype(bf16), bt_f=bt * st + sht,
        wg_f=(wg * sg).astype(bf16), bg_f=bg * sg + shg,
        wc=wc, bc=bc,
    )


def build_graph(num_graphs, nodes_per_graph):
    """Chain graph inside each sub-graph; returns (A_norm, pool, batch_vec, edge_index)."""
    N = num_graphs * nodes_per_graph
    src, dst = [], []
    for g in range(num_graphs):
        off = g * nodes_per_graph
        for a in range(nodes_per_graph - 1):
            src += [off + a, off + a + 1]
            dst += [off + a + 1, off + a]
    edge_index = jnp.array([src, dst], dtype=jnp.int32)                # (2, E)

    A = jnp.zeros((N, N), jnp.float32).at[edge_index[1], edge_index[0]].set(1.0)
    A_hat = A + jnp.eye(N, dtype=jnp.float32)                          # add_self_loops=True
    deg = A_hat.sum(axis=1)
    dinv = 1.0 / jnp.sqrt(deg)
    a_norm = dinv[:, None] * A_hat * dinv[None, :]                     # D^{-1/2}(A+I)D^{-1/2}

    batch_vec = jnp.repeat(jnp.arange(num_graphs), nodes_per_graph)
    pool = (batch_vec[None, :] == jnp.arange(num_graphs)[:, None]).astype(jnp.float32)
    pool = pool / float(nodes_per_graph)                               # global_mean_pool
    return a_norm, pool, batch_vec, edge_index


if __name__ == "__main__":
    # Small shapes consistent with GTFID: emb_dim=128, lstm_hidden=256, fusion/g_hidden=256.
    VOCAB, EMB, LSTM_H, G_H, FUSION, NUM_CLASSES = 50, 128, 256, 256, 256, 8
    B, T = 4, 8
    NODES_PER_GRAPH = 4

    key = jax.random.PRNGKey(0)
    k_par, k_tok, k_node = jax.random.split(key, 3)

    params = build_params(k_par, VOCAB, EMB, LSTM_H, G_H, FUSION, NUM_CLASSES)

    lens = jnp.array([8, 6, 5, 3], dtype=jnp.int32)
    tokens = jax.random.randint(k_tok, (B, T), 1, VOCAB, dtype=jnp.int32)
    t_idx = jnp.arange(T)
    seq_pad = jnp.where(t_idx[None, :] < lens[:, None], tokens, 0)     # PAD_IDX = 0

    a_norm, pool, batch_vec, edge_index = build_graph(B, NODES_PER_GRAPH)
    node_x = jax.random.normal(k_node, (B * NODES_PER_GRAPH, 1), dtype=jnp.float32)

    logits = gtfid_forward(params, seq_pad, lens, node_x, a_norm, pool, VOCAB)
    logits = jax.block_until_ready(logits)
    assert logits.shape == (B, NUM_CLASSES)
    print("KERNEL_OK")
</pallas_src>

<mosaic_0001>
module attributes {stable_mosaic.version = 11 : i64} {
  func.func @gtfid_fused_kernel(%arg0: memref<64x1xi32, #tpu.memory_space<vmem>>, %arg1: memref<8x1xi32, #tpu.memory_space<vmem>>, %arg2: memref<128x512xbf16, #tpu.memory_space<vmem>>, %arg3: memref<128x1024xbf16, #tpu.memory_space<vmem>>, %arg4: memref<16x16xf32, #tpu.memory_space<vmem>>, %arg5: memref<16x1xf32, #tpu.memory_space<vmem>>, %arg6: memref<1x256xf32, #tpu.memory_space<vmem>>, %arg7: memref<1x256xf32, #tpu.memory_space<vmem>>, %arg8: memref<256x256xbf16, #tpu.memory_space<any>>, %arg9: memref<1x256xf32, #tpu.memory_space<vmem>>, %arg10: memref<4x16xf32, #tpu.memory_space<vmem>>, %arg11: memref<256x256xbf16, #tpu.memory_space<any>>, %arg12: memref<1x256xf32, #tpu.memory_space<vmem>>, %arg13: memref<256x256xbf16, #tpu.memory_space<any>>, %arg14: memref<1x256xf32, #tpu.memory_space<vmem>>, %arg15: memref<256x8xf32, #tpu.memory_space<vmem>>, %arg16: memref<1x8xf32, #tpu.memory_space<vmem>>, %arg17: memref<4x8xf32, #tpu.memory_space<vmem>>, %arg18: memref<256x256xbf16, #tpu.memory_space<vmem>>, %arg19: memref<256x256xbf16, #tpu.memory_space<vmem>>, %arg20: memref<256x256xbf16, #tpu.memory_space<vmem>>, %arg21: memref<3x!tpu.dma_semaphore, #tpu.memory_space<semaphore_mem>>) attributes {dimension_semantics = [], scalar_prefetch = 0 : i64, scratch_operands = 4 : i64, tpu.core_type = #tpu.core_type<tc>} {
    %c0_i32 = arith.constant 0 : i32
    %0 = tpu.memref_slice %arg21[%c0_i32] : memref<3x!tpu.dma_semaphore, #tpu.memory_space<semaphore_mem>> -> memref<1x!tpu.dma_semaphore, #tpu.memory_space<semaphore_mem>>
    %1 = tpu.memref_squeeze %0 : memref<1x!tpu.dma_semaphore, #tpu.memory_space<semaphore_mem>> -> memref<!tpu.dma_semaphore, #tpu.memory_space<semaphore_mem>>
    tpu.enqueue_dma source(%arg8 : memref<256x256xbf16, #tpu.memory_space<any>>) target(%arg18 : memref<256x256xbf16, #tpu.memory_space<vmem>>) target_semaphore(%1 : memref<!tpu.dma_semaphore, #tpu.memory_space<semaphore_mem>>)
    %c1_i32 = arith.constant 1 : i32
    %2 = tpu.memref_slice %arg21[%c1_i32] : memref<3x!tpu.dma_semaphore, #tpu.memory_space<semaphore_mem>> -> memref<1x!tpu.dma_semaphore, #tpu.memory_space<semaphore_mem>>
    %3 = tpu.memref_squeeze %2 : memref<1x!tpu.dma_semaphore, #tpu.memory_space<semaphore_mem>> -> memref<!tpu.dma_semaphore, #tpu.memory_space<semaphore_mem>>
    tpu.enqueue_dma source(%arg11 : memref<256x256xbf16, #tpu.memory_space<any>>) target(%arg19 : memref<256x256xbf16, #tpu.memory_space<vmem>>) target_semaphore(%3 : memref<!tpu.dma_semaphore, #tpu.memory_space<semaphore_mem>>)
    %c2_i32 = arith.constant 2 : i32
    %4 = tpu.memref_slice %arg21[%c2_i32] : memref<3x!tpu.dma_semaphore, #tpu.memory_space<semaphore_mem>> -> memref<1x!tpu.dma_semaphore, #tpu.memory_space<semaphore_mem>>
    %5 = tpu.memref_squeeze %4 : memref<1x!tpu.dma_semaphore, #tpu.memory_space<semaphore_mem>> -> memref<!tpu.dma_semaphore, #tpu.memory_space<semaphore_mem>>
    tpu.enqueue_dma source(%arg13 : memref<256x256xbf16, #tpu.memory_space<any>>) target(%arg20 : memref<256x256xbf16, #tpu.memory_space<vmem>>) target_semaphore(%5 : memref<!tpu.dma_semaphore, #tpu.memory_space<semaphore_mem>>)
    %c0 = arith.constant 0 : index
    %c0_0 = arith.constant 0 : index
    %6 = vector.load %arg0[%c0, %c0_0] : memref<64x1xi32, #tpu.memory_space<vmem>>, vector<64x1xi32>
    %7 = tpu.iota {dimensions = array<i32: 1>} : vector<64x128xi32>
    %8 = vector.broadcast %6 : vector<64x1xi32> to vector<64x128xi32>
    %9 = arith.cmpi eq, %8, %7 : vector<64x128xi32>
    %cst = arith.constant 1.000000e+00 : f32
    %cst_1 = arith.constant 0.000000e+00 : f32
    %10 = vector.broadcast %cst : f32 to vector<64x128xf32>
    %11 = vector.broadcast %cst_1 : f32 to vector<64x128xf32>
    %12 = arith.select %9, %10, %11 : vector<64x128xi1>, vector<64x128xf32>
    %13 = arith.truncf %12 : vector<64x128xf32> to vector<64x128xbf16>
    %c0_2 = arith.constant 0 : index
    %c0_3 = arith.constant 0 : index
    %14 = vector.load %arg2[%c0_2, %c0_3] : memref<128x512xbf16, #tpu.memory_space<vmem>>, vector<128x512xbf16>
    %cst_4 = arith.constant dense<0.000000e+00> : vector<64x512xf32>
    %15 = tpu.matmul %13, %14, %cst_4 {dimension_numbers = #tpu.dot_dimension_numbers<[1], [0], [0], [1], [0, 0, 1, 1], [], []>} : vector<64x128xbf16>, vector<128x512xbf16>, vector<64x512xf32> -> vector<64x512xf32>
    %c0_5 = arith.constant 0 : index
    %c0_6 = arith.constant 0 : index
    %16 = vector.load %arg1[%c0_5, %c0_6] : memref<8x1xi32, #tpu.memory_space<vmem>>, vector<8x1xi32>
    %17 = tpu.iota {dimensions = array<i32: 0>} : vector<8x1xi32>
    %c4_i32 = arith.constant 4 : i32
    %18 = vector.broadcast %c4_i32 : i32 to vector<8x1xi32>
    %19 = arith.cmpi slt, %17, %18 : vector<8x1xi32>
    %20 = arith.extui %19 : vector<8x1xi1> to vector<8x1xi32>
    %21 = arith.sitofp %20 : vector<8x1xi32> to vector<8x1xf32>
    %22 = vector.shape_cast %21 : vector<8x1xf32> to vector<8x1xf32>
    %23 = vector.broadcast %22 : vector<8x1xf32> to vector<8x512xf32>
    %cst_7 = arith.constant 1.000000e+00 : f32
    %24 = vector.broadcast %cst_7 : f32 to vector<8x512xf32>
    %25 = arith.subf %24, %23 : vector<8x512xf32>
    %c0_8 = arith.constant 0 : index
    %c0_9 = arith.constant 0 : index
    %26 = vector.load %arg3[%c0_8, %c0_9] : memref<128x1024xbf16, #tpu.memory_space<vmem>>, vector<128x1024xbf16>
    %cst_10 = arith.constant 0.000000e+00 : f32
    %27 = vector.broadcast %cst_10 : f32 to vector<8x128xf32>
    %cst_11 = arith.constant 0.000000e+00 : f32
    %28 = vector.broadcast %cst_11 : f32 to vector<8x128xf32>
    %29 = arith.truncf %27 : vector<8x128xf32> to vector<8x128xbf16>
    %cst_12 = arith.constant dense<0.000000e+00> : vector<8x1024xf32>
    %30 = tpu.matmul %29, %26, %cst_12 {dimension_numbers = #tpu.dot_dimension_numbers<[1], [0], [0], [1], [0, 0, 1, 1], [], []>} : vector<8x128xbf16>, vector<128x1024xbf16>, vector<8x1024xf32> -> vector<8x1024xf32>
    %31 = vector.extract_strided_slice %15 {offsets = [0, 0], sizes = [8, 512], strides = [1, 1]} : vector<64x512xf32> to vector<8x512xf32>
    %32 = vector.extract_strided_slice %30 {offsets = [0, 0], sizes = [8, 512], strides = [1, 1]} : vector<8x1024xf32> to vector<8x512xf32>
    %33 = arith.mulf %23, %32 : vector<8x512xf32>
    %34 = arith.addf %31, %33 : vector<8x512xf32>
    %35 = vector.extract_strided_slice %30 {offsets = [0, 512], sizes = [8, 512], strides = [1, 1]} : vector<8x1024xf32> to vector<8x512xf32>
    %36 = arith.mulf %25, %35 : vector<8x512xf32>
    %37 = arith.addf %34, %36 : vector<8x512xf32>
    %38 = vector.extract_strided_slice %37 {offsets = [0, 0], sizes = [8, 128], strides = [1, 1]} : vector<8x512xf32> to vector<8x128xf32>
    %39 = arith.negf %38 : vector<8x128xf32>
    %40 = math.exp %39 : vector<8x128xf32>
    %cst_13 = arith.constant 1.000000e+00 : f32
    %41 = vector.broadcast %cst_13 : f32 to vector<8x128xf32>
    %42 = arith.addf %41, %40 : vector<8x128xf32>
    %43 = arith.divf %41, %42 : vector<8x128xf32>
    %44 = vector.extract_strided_slice %37 {offsets = [0, 128], sizes = [8, 128], strides = [1, 1]} : vector<8x512xf32> to vector<8x128xf32>
    %45 = arith.negf %44 : vector<8x128xf32>
    %46 = math.exp %45 : vector<8x128xf32>
    %cst_14 = arith.constant 1.000000e+00 : f32
    %47 = vector.broadcast %cst_14 : f32 to vector<8x128xf32>
    %48 = arith.addf %47, %46 : vector<8x128xf32>
    %49 = arith.divf %47, %48 : vector<8x128xf32>
    %50 = vector.extract_strided_slice %37 {offsets = [0, 256], sizes = [8, 128], strides = [1, 1]} : vector<8x512xf32> to vector<8x128xf32>
    %51 = math.tanh %50 : vector<8x128xf32>
    %52 = vector.extract_strided_slice %37 {offsets = [0, 384], sizes = [8, 128], strides = [1, 1]} : vector<8x512xf32> to vector<8x128xf32>
    %53 = arith.negf %52 : vector<8x128xf32>
    %54 = math.exp %53 : vector<8x128xf32>
    %cst_15 = arith.constant 1.000000e+00 : f32
    %55 = vector.broadcast %cst_15 : f32 to vector<8x128xf32>
    %56 = arith.addf %55, %54 : vector<8x128xf32>
    %57 = arith.divf %55, %56 : vector<8x128xf32>
    %58 = arith.mulf %49, %28 : vector<8x128xf32>
    %59 = arith.mulf %43, %51 : vector<8x128xf32>
    %60 = arith.addf %58, %59 : vector<8x128xf32>
    %61 = math.tanh %60 : vector<8x128xf32>
    %62 = arith.mulf %57, %61 : vector<8x128xf32>
    %c0_i32_16 = arith.constant 0 : i32
    %63 = vector.broadcast %c0_i32_16 : i32 to vector<8x1xi32>
    %64 = arith.cmpi sgt, %16, %63 : vector<8x1xi32>
    %65 = arith.extui %64 : vector<8x1xi1> to vector<8x1xi32>
    %66 = arith.sitofp %65 : vector<8x1xi32> to vector<8x1xf32>
    %67 = vector.broadcast %66 : vector<8x1xf32> to vector<8x128xf32>
    %68 = arith.mulf %67, %62 : vector<8x128xf32>
    %cst_17 = arith.constant 1.000000e+00 : f32
    %69 = vector.broadcast %cst_17 : f32 to vector<8x1xf32>
    %70 = arith.subf %69, %66 : vector<8x1xf32>
    %71 = vector.broadcast %70 : vector<8x1xf32> to vector<8x128xf32>
    %72 = arith.mulf %71, %27 : vector<8x128xf32>
    %73 = arith.addf %68, %72 : vector<8x128xf32>
    %74 = vector.broadcast %66 : vector<8x1xf32> to vector<8x128xf32>
    %75 = arith.mulf %74, %60 : vector<8x128xf32>
    %cst_18 = arith.constant 1.000000e+00 : f32
    %76 = vector.broadcast %cst_18 : f32 to vector<8x1xf32>
    %77 = arith.subf %76, %66 : vector<8x1xf32>
    %78 = vector.broadcast %77 : vector<8x1xf32> to vector<8x128xf32>
    %79 = arith.mulf %78, %28 : vector<8x128xf32>
    %80 = arith.addf %75, %79 : vector<8x128xf32>
    %81 = arith.truncf %73 : vector<8x128xf32> to vector<8x128xbf16>
    %cst_19 = arith.constant dense<0.000000e+00> : vector<8x1024xf32>
    %82 = tpu.matmul %81, %26, %cst_19 {dimension_numbers = #tpu.dot_dimension_numbers<[1], [0], [0], [1], [0, 0, 1, 1], [], []>} : vector<8x128xbf16>, vector<128x1024xbf16>, vector<8x1024xf32> -> vector<8x1024xf32>
    %83 = vector.extract_strided_slice %15 {offsets = [8, 0], sizes = [8, 512], strides = [1, 1]} : vector<64x512xf32> to vector<8x512xf32>
    %84 = vector.extract_strided_slice %82 {offsets = [0, 0], sizes = [8, 512], strides = [1, 1]} : vector<8x1024xf32> to vector<8x512xf32>
    %85 = arith.mulf %23, %84 : vector<8x512xf32>
    %86 = arith.addf %83, %85 : vector<8x512xf32>
    %87 = vector.extract_strided_slice %82 {offsets = [0, 512], sizes = [8, 512], strides = [1, 1]} : vector<8x1024xf32> to vector<8x512xf32>
    %88 = arith.mulf %25, %87 : vector<8x512xf32>
    %89 = arith.addf %86, %88 : vector<8x512xf32>
    %90 = vector.extract_strided_slice %89 {offsets = [0, 0], sizes = [8, 128], strides = [1, 1]} : vector<8x512xf32> to vector<8x128xf32>
    %91 = arith.negf %90 : vector<8x128xf32>
    %92 = math.exp %91 : vector<8x128xf32>
    %cst_20 = arith.constant 1.000000e+00 : f32
    %93 = vector.broadcast %cst_20 : f32 to vector<8x128xf32>
    %94 = arith.addf %93, %92 : vector<8x128xf32>
    %95 = arith.divf %93, %94 : vector<8x128xf32>
    %96 = vector.extract_strided_slice %89 {offsets = [0, 128], sizes = [8, 128], strides = [1, 1]} : vector<8x512xf32> to vector<8x128xf32>
    %97 = arith.negf %96 : vector<8x128xf32>
    %98 = math.exp %97 : vector<8x128xf32>
    %cst_21 = arith.constant 1.000000e+00 : f32
    %99 = vector.broadcast %cst_21 : f32 to vector<8x128xf32>
    %100 = arith.addf %99, %98 : vector<8x128xf32>
    %101 = arith.divf %99, %100 : vector<8x128xf32>
    %102 = vector.extract_strided_slice %89 {offsets = [0, 256], sizes = [8, 128], strides = [1, 1]} : vector<8x512xf32> to vector<8x128xf32>
    %103 = math.tanh %102 : vector<8x128xf32>
    %104 = vector.extract_strided_slice %89 {offsets = [0, 384], sizes = [8, 128], strides = [1, 1]} : vector<8x512xf32> to vector<8x128xf32>
    %105 = arith.negf %104 : vector<8x128xf32>
    %106 = math.exp %105 : vector<8x128xf32>
    %cst_22 = arith.constant 1.000000e+00 : f32
    %107 = vector.broadcast %cst_22 : f32 to vector<8x128xf32>
    %108 = arith.addf %107, %106 : vector<8x128xf32>
    %109 = arith.divf %107, %108 : vector<8x128xf32>
    %110 = arith.mulf %101, %80 : vector<8x128xf32>
    %111 = arith.mulf %95, %103 : vector<8x128xf32>
    %112 = arith.addf %110, %111 : vector<8x128xf32>
    %113 = math.tanh %112 : vector<8x128xf32>
    %114 = arith.mulf %109, %113 : vector<8x128xf32>
    %c1_i32_23 = arith.constant 1 : i32
    %115 = vector.broadcast %c1_i32_23 : i32 to vector<8x1xi32>
    %116 = arith.cmpi sgt, %16, %115 : vector<8x1xi32>
    %117 = arith.extui %116 : vector<8x1xi1> to vector<8x1xi32>
    %118 = arith.sitofp %117 : vector<8x1xi32> to vector<8x1xf32>
    %119 = vector.broadcast %118 : vector<8x1xf32> to vector<8x128xf32>
    %120 = arith.mulf %119, %114 : vector<8x128xf32>
    %cst_24 = arith.constant 1.000000e+00 : f32
    %121 = vector.broadcast %cst_24 : f32 to vector<8x1xf32>
    %122 = arith.subf %121, %118 : vector<8x1xf32>
    %123 = vector.broadcast %122 : vector<8x1xf32> to vector<8x128xf32>
    %124 = arith.mulf %123, %73 : vector<8x128xf32>
    %125 = arith.addf %120, %124 : vector<8x128xf32>
    %126 = vector.broadcast %118 : vector<8x1xf32> to vector<8x128xf32>
    %127 = arith.mulf %126, %112 : vector<8x128xf32>
    %cst_25 = arith.constant 1.000000e+00 : f32
    %128 = vector.broadcast %cst_25 : f32 to vector<8x1xf32>
    %129 = arith.subf %128, %118 : vector<8x1xf32>
    %130 = vector.broadcast %129 : vector<8x1xf32> to vector<8x128xf32>
    %131 = arith.mulf %130, %80 : vector<8x128xf32>
    %132 = arith.addf %127, %131 : vector<8x128xf32>
    %133 = arith.truncf %125 : vector<8x128xf32> to vector<8x128xbf16>
    %cst_26 = arith.constant dense<0.000000e+00> : vector<8x1024xf32>
    %134 = tpu.matmul %133, %26, %cst_26 {dimension_numbers = #tpu.dot_dimension_numbers<[1], [0], [0], [1], [0, 0, 1, 1], [], []>} : vector<8x128xbf16>, vector<128x1024xbf16>, vector<8x1024xf32> -> vector<8x1024xf32>
    %135 = vector.extract_strided_slice %15 {offsets = [16, 0], sizes = [8, 512], strides = [1, 1]} : vector<64x512xf32> to vector<8x512xf32>
    %136 = vector.extract_strided_slice %134 {offsets = [0, 0], sizes = [8, 512], strides = [1, 1]} : vector<8x1024xf32> to vector<8x512xf32>
    %137 = arith.mulf %23, %136 : vector<8x512xf32>
    %138 = arith.addf %135, %137 : vector<8x512xf32>
    %139 = vector.extract_strided_slice %134 {offsets = [0, 512], sizes = [8, 512], strides = [1, 1]} : vector<8x1024xf32> to vector<8x512xf32>
    %140 = arith.mulf %25, %139 : vector<8x512xf32>
    %141 = arith.addf %138, %140 : vector<8x512xf32>
    %142 = vector.extract_strided_slice %141 {offsets = [0, 0], sizes = [8, 128], strides = [1, 1]} : vector<8x512xf32> to vector<8x128xf32>
    %143 = arith.negf %142 : vector<8x128xf32>
    %144 = math.exp %143 : vector<8x128xf32>
    %cst_27 = arith.constant 1.000000e+00 : f32
    %145 = vector.broadcast %cst_27 : f32 to vector<8x128xf32>
    %146 = arith.addf %145, %144 : vector<8x128xf32>
    %147 = arith.divf %145, %146 : vector<8x128xf32>
    %148 = vector.extract_strided_slice %141 {offsets = [0, 128], sizes = [8, 128], strides = [1, 1]} : vector<8x512xf32> to vector<8x128xf32>
    %149 = arith.negf %148 : vector<8x128xf32>
    %150 = math.exp %149 : vector<8x128xf32>
    %cst_28 = arith.constant 1.000000e+00 : f32
    %151 = vector.broadcast %cst_28 : f32 to vector<8x128xf32>
    %152 = arith.addf %151, %150 : vector<8x128xf32>
    %153 = arith.divf %151, %152 : vector<8x128xf32>
    %154 = vector.extract_strided_slice %141 {offsets = [0, 256], sizes = [8, 128], strides = [1, 1]} : vector<8x512xf32> to vector<8x128xf32>
    %155 = math.tanh %154 : vector<8x128xf32>
    %156 = vector.extract_strided_slice %141 {offsets = [0, 384], sizes = [8, 128], strides = [1, 1]} : vector<8x512xf32> to vector<8x128xf32>
    %157 = arith.negf %156 : vector<8x128xf32>
    %158 = math.exp %157 : vector<8x128xf32>
    %cst_29 = arith.constant 1.000000e+00 : f32
    %159 = vector.broadcast %cst_29 : f32 to vector<8x128xf32>
    %160 = arith.addf %159, %158 : vector<8x128xf32>
    %161 = arith.divf %159, %160 : vector<8x128xf32>
    %162 = arith.mulf %153, %132 : vector<8x128xf32>
    %163 = arith.mulf %147, %155 : vector<8x128xf32>
    %164 = arith.addf %162, %163 : vector<8x128xf32>
    %165 = math.tanh %164 : vector<8x128xf32>
    %166 = arith.mulf %161, %165 : vector<8x128xf32>
    %c2_i32_30 = arith.constant 2 : i32
    %167 = vector.broadcast %c2_i32_30 : i32 to vector<8x1xi32>
    %168 = arith.cmpi sgt, %16, %167 : vector<8x1xi32>
    %169 = arith.extui %168 : vector<8x1xi1> to vector<8x1xi32>
    %170 = arith.sitofp %169 : vector<8x1xi32> to vector<8x1xf32>
    %171 = vector.broadcast %170 : vector<8x1xf32> to vector<8x128xf32>
    %172 = arith.mulf %171, %166 : vector<8x128xf32>
    %cst_31 = arith.constant 1.000000e+00 : f32
    %173 = vector.broadcast %cst_31 : f32 to vector<8x1xf32>
    %174 = arith.subf %173, %170 : vector<8x1xf32>
    %175 = vector.broadcast %174 : vector<8x1xf32> to vector<8x128xf32>
    %176 = arith.mulf %175, %125 : vector<8x128xf32>
    %177 = arith.addf %172, %176 : vector<8x128xf32>
    %178 = vector.broadcast %170 : vector<8x1xf32> to vector<8x128xf32>
    %179 = arith.mulf %178, %164 : vector<8x128xf32>
    %cst_32 = arith.constant 1.000000e+00 : f32
    %180 = vector.broadcast %cst_32 : f32 to vector<8x1xf32>
    %181 = arith.subf %180, %170 : vector<8x1xf32>
    %182 = vector.broadcast %181 : vector<8x1xf32> to vector<8x128xf32>
    %183 = arith.mulf %182, %132 : vector<8x128xf32>
    %184 = arith.addf %179, %183 : vector<8x128xf32>
    %185 = arith.truncf %177 : vector<8x128xf32> to vector<8x128xbf16>
    %cst_33 = arith.constant dense<0.000000e+00> : vector<8x1024xf32>
    %186 = tpu.matmul %185, %26, %cst_33 {dimension_numbers = #tpu.dot_dimension_numbers<[1], [0], [0], [1], [0, 0, 1, 1], [], []>} : vector<8x128xbf16>, vector<128x1024xbf16>, vector<8x1024xf32> -> vector<8x1024xf32>
    %187 = vector.extract_strided_slice %15 {offsets = [24, 0], sizes = [8, 512], strides = [1, 1]} : vector<64x512xf32> to vector<8x512xf32>
    %188 = vector.extract_strided_slice %186 {offsets = [0, 0], sizes = [8, 512], strides = [1, 1]} : vector<8x1024xf32> to vector<8x512xf32>
    %189 = arith.mulf %23, %188 : vector<8x512xf32>
    %190 = arith.addf %187, %189 : vector<8x512xf32>
    %191 = vector.extract_strided_slice %186 {offsets = [0, 512], sizes = [8, 512], strides = [1, 1]} : vector<8x1024xf32> to vector<8x512xf32>
    %192 = arith.mulf %25, %191 : vector<8x512xf32>
    %193 = arith.addf %190, %192 : vector<8x512xf32>
    %194 = vector.extract_strided_slice %193 {offsets = [0, 0], sizes = [8, 128], strides = [1, 1]} : vector<8x512xf32> to vector<8x128xf32>
    %195 = arith.negf %194 : vector<8x128xf32>
    %196 = math.exp %195 : vector<8x128xf32>
    %cst_34 = arith.constant 1.000000e+00 : f32
    %197 = vector.broadcast %cst_34 : f32 to vector<8x128xf32>
    %198 = arith.addf %197, %196 : vector<8x128xf32>
    %199 = arith.divf %197, %198 : vector<8x128xf32>
    %200 = vector.extract_strided_slice %193 {offsets = [0, 128], sizes = [8, 128], strides = [1, 1]} : vector<8x512xf32> to vector<8x128xf32>
    %201 = arith.negf %200 : vector<8x128xf32>
    %202 = math.exp %201 : vector<8x128xf32>
    %cst_35 = arith.constant 1.000000e+00 : f32
    %203 = vector.broadcast %cst_35 : f32 to vector<8x128xf32>
    %204 = arith.addf %203, %202 : vector<8x128xf32>
    %205 = arith.divf %203, %204 : vector<8x128xf32>
    %206 = vector.extract_strided_slice %193 {offsets = [0, 256], sizes = [8, 128], strides = [1, 1]} : vector<8x512xf32> to vector<8x128xf32>
    %207 = math.tanh %206 : vector<8x128xf32>
    %208 = vector.extract_strided_slice %193 {offsets = [0, 384], sizes = [8, 128], strides = [1, 1]} : vector<8x512xf32> to vector<8x128xf32>
    %209 = arith.negf %208 : vector<8x128xf32>
    %210 = math.exp %209 : vector<8x128xf32>
    %cst_36 = arith.constant 1.000000e+00 : f32
    %211 = vector.broadcast %cst_36 : f32 to vector<8x128xf32>
    %212 = arith.addf %211, %210 : vector<8x128xf32>
    %213 = arith.divf %211, %212 : vector<8x128xf32>
    %214 = arith.mulf %205, %184 : vector<8x128xf32>
    %215 = arith.mulf %199, %207 : vector<8x128xf32>
    %216 = arith.addf %214, %215 : vector<8x128xf32>
    %217 = math.tanh %216 : vector<8x128xf32>
    %218 = arith.mulf %213, %217 : vector<8x128xf32>
    %c3_i32 = arith.constant 3 : i32
    %219 = vector.broadcast %c3_i32 : i32 to vector<8x1xi32>
    %220 = arith.cmpi sgt, %16, %219 : vector<8x1xi32>
    %221 = arith.extui %220 : vector<8x1xi1> to vector<8x1xi32>
    %222 = arith.sitofp %221 : vector<8x1xi32> to vector<8x1xf32>
    %223 = vector.broadcast %222 : vector<8x1xf32> to vector<8x128xf32>
    %224 = arith.mulf %223, %218 : vector<8x128xf32>
    %cst_37 = arith.constant 1.000000e+00 : f32
    %225 = vector.broadcast %cst_37 : f32 to vector<8x1xf32>
    %226 = arith.subf %225, %222 : vector<8x1xf32>
    %227 = vector.broadcast %226 : vector<8x1xf32> to vector<8x128xf32>
    %228 = arith.mulf %227, %177 : vector<8x128xf32>
    %229 = arith.addf %224, %228 : vector<8x128xf32>
    %230 = vector.broadcast %222 : vector<8x1xf32> to vector<8x128xf32>
    %231 = arith.mulf %230, %216 : vector<8x128xf32>
    %cst_38 = arith.constant 1.000000e+00 : f32
    %232 = vector.broadcast %cst_38 : f32 to vector<8x1xf32>
    %233 = arith.subf %232, %222 : vector<8x1xf32>
    %234 = vector.broadcast %233 : vector<8x1xf32> to vector<8x128xf32>
    %235 = arith.mulf %234, %184 : vector<8x128xf32>
    %236 = arith.addf %231, %235 : vector<8x128xf32>
    %237 = arith.truncf %229 : vector<8x128xf32> to vector<8x128xbf16>
    %cst_39 = arith.constant dense<0.000000e+00> : vector<8x1024xf32>
    %238 = tpu.matmul %237, %26, %cst_39 {dimension_numbers = #tpu.dot_dimension_numbers<[1], [0], [0], [1], [0, 0, 1, 1], [], []>} : vector<8x128xbf16>, vector<128x1024xbf16>, vector<8x1024xf32> -> vector<8x1024xf32>
    %239 = vector.extract_strided_slice %15 {offsets = [32, 0], sizes = [8, 512], strides = [1, 1]} : vector<64x512xf32> to vector<8x512xf32>
    %240 = vector.extract_strided_slice %238 {offsets = [0, 0], sizes = [8, 512], strides = [1, 1]} : vector<8x1024xf32> to vector<8x512xf32>
    %241 = arith.mulf %23, %240 : vector<8x512xf32>
    %242 = arith.addf %239, %241 : vector<8x512xf32>
    %243 = vector.extract_strided_slice %238 {offsets = [0, 512], sizes = [8, 512], strides = [1, 1]} : vector<8x1024xf32> to vector<8x512xf32>
    %244 = arith.mulf %25, %243 : vector<8x512xf32>
    %245 = arith.addf %242, %244 : vector<8x512xf32>
    %246 = vector.extract_strided_slice %245 {offsets = [0, 0], sizes = [8, 128], strides = [1, 1]} : vector<8x512xf32> to vector<8x128xf32>
    %247 = arith.negf %246 : vector<8x128xf32>
    %248 = math.exp %247 : vector<8x128xf32>
    %cst_40 = arith.constant 1.000000e+00 : f32
    %249 = vector.broadcast %cst_40 : f32 to vector<8x128xf32>
    %250 = arith.addf %249, %248 : vector<8x128xf32>
    %251 = arith.divf %249, %250 : vector<8x128xf32>
    %252 = vector.extract_strided_slice %245 {offsets = [0, 128], sizes = [8, 128], strides = [1, 1]} : vector<8x512xf32> to vector<8x128xf32>
    %253 = arith.negf %252 : vector<8x128xf32>
    %254 = math.exp %253 : vector<8x128xf32>
    %cst_41 = arith.constant 1.000000e+00 : f32
    %255 = vector.broadcast %cst_41 : f32 to vector<8x128xf32>
    %256 = arith.addf %255, %254 : vector<8x128xf32>
    %257 = arith.divf %255, %256 : vector<8x128xf32>
    %258 = vector.extract_strided_slice %245 {offsets = [0, 256], sizes = [8, 128], strides = [1, 1]} : vector<8x512xf32> to vector<8x128xf32>
    %259 = math.tanh %258 : vector<8x128xf32>
    %260 = vector.extract_strided_slice %245 {offsets = [0, 384], sizes = [8, 128], strides = [1, 1]} : vector<8x512xf32> to vector<8x128xf32>
    %261 = arith.negf %260 : vector<8x128xf32>
    %262 = math.exp %261 : vector<8x128xf32>
    %cst_42 = arith.constant 1.000000e+00 : f32
    %263 = vector.broadcast %cst_42 : f32 to vector<8x128xf32>
    %264 = arith.addf %263, %262 : vector<8x128xf32>
    %265 = arith.divf %263, %264 : vector<8x128xf32>
    %266 = arith.mulf %257, %236 : vector<8x128xf32>
    %267 = arith.mulf %251, %259 : vector<8x128xf32>
    %268 = arith.addf %266, %267 : vector<8x128xf32>
    %269 = math.tanh %268 : vector<8x128xf32>
    %270 = arith.mulf %265, %269 : vector<8x128xf32>
    %c4_i32_43 = arith.constant 4 : i32
    %271 = vector.broadcast %c4_i32_43 : i32 to vector<8x1xi32>
    %272 = arith.cmpi sgt, %16, %271 : vector<8x1xi32>
    %273 = arith.extui %272 : vector<8x1xi1> to vector<8x1xi32>
    %274 = arith.sitofp %273 : vector<8x1xi32> to vector<8x1xf32>
    %275 = vector.broadcast %274 : vector<8x1xf32> to vector<8x128xf32>
    %276 = arith.mulf %275, %270 : vector<8x128xf32>
    %cst_44 = arith.constant 1.000000e+00 : f32
    %277 = vector.broadcast %cst_44 : f32 to vector<8x1xf32>
    %278 = arith.subf %277, %274 : vector<8x1xf32>
    %279 = vector.broadcast %278 : vector<8x1xf32> to vector<8x128xf32>
    %280 = arith.mulf %279, %229 : vector<8x128xf32>
    %281 = arith.addf %276, %280 : vector<8x128xf32>
    %282 = vector.broadcast %274 : vector<8x1xf32> to vector<8x128xf32>
    %283 = arith.mulf %282, %268 : vector<8x128xf32>
    %cst_45 = arith.constant 1.000000e+00 : f32
    %284 = vector.broadcast %cst_45 : f32 to vector<8x1xf32>
    %285 = arith.subf %284, %274 : vector<8x1xf32>
    %286 = vector.broadcast %285 : vector<8x1xf32> to vector<8x128xf32>
    %287 = arith.mulf %286, %236 : vector<8x128xf32>
    %288 = arith.addf %283, %287 : vector<8x128xf32>
    %289 = arith.truncf %281 : vector<8x128xf32> to vector<8x128xbf16>
    %cst_46 = arith.constant dense<0.000000e+00> : vector<8x1024xf32>
    %290 = tpu.matmul %289, %26, %cst_46 {dimension_numbers = #tpu.dot_dimension_numbers<[1], [0], [0], [1], [0, 0, 1, 1], [], []>} : vector<8x128xbf16>, vector<128x1024xbf16>, vector<8x1024xf32> -> vector<8x1024xf32>
    %291 = vector.extract_strided_slice %15 {offsets = [40, 0], sizes = [8, 512], strides = [1, 1]} : vector<64x512xf32> to vector<8x512xf32>
    %292 = vector.extract_strided_slice %290 {offsets = [0, 0], sizes = [8, 512], strides = [1, 1]} : vector<8x1024xf32> to vector<8x512xf32>
    %293 = arith.mulf %23, %292 : vector<8x512xf32>
    %294 = arith.addf %291, %293 : vector<8x512xf32>
    %295 = vector.extract_strided_slice %290 {offsets = [0, 512], sizes = [8, 512], strides = [1, 1]} : vector<8x1024xf32> to vector<8x512xf32>
    %296 = arith.mulf %25, %295 : vector<8x512xf32>
    %297 = arith.addf %294, %296 : vector<8x512xf32>
    %298 = vector.extract_strided_slice %297 {offsets = [0, 0], sizes = [8, 128], strides = [1, 1]} : vector<8x512xf32> to vector<8x128xf32>
    %299 = arith.negf %298 : vector<8x128xf32>
    %300 = math.exp %299 : vector<8x128xf32>
    %cst_47 = arith.constant 1.000000e+00 : f32
    %301 = vector.broadcast %cst_47 : f32 to vector<8x128xf32>
    %302 = arith.addf %301, %300 : vector<8x128xf32>
    %303 = arith.divf %301, %302 : vector<8x128xf32>
    %304 = vector.extract_strided_slice %297 {offsets = [0, 128], sizes = [8, 128], strides = [1, 1]} : vector<8x512xf32> to vector<8x128xf32>
    %305 = arith.negf %304 : vector<8x128xf32>
    %306 = math.exp %305 : vector<8x128xf32>
    %cst_48 = arith.constant 1.000000e+00 : f32
    %307 = vector.broadcast %cst_48 : f32 to vector<8x128xf32>
    %308 = arith.addf %307, %306 : vector<8x128xf32>
    %309 = arith.divf %307, %308 : vector<8x128xf32>
    %310 = vector.extract_strided_slice %297 {offsets = [0, 256], sizes = [8, 128], strides = [1, 1]} : vector<8x512xf32> to vector<8x128xf32>
    %311 = math.tanh %310 : vector<8x128xf32>
    %312 = vector.extract_strided_slice %297 {offsets = [0, 384], sizes = [8, 128], strides = [1, 1]} : vector<8x512xf32> to vector<8x128xf32>
    %313 = arith.negf %312 : vector<8x128xf32>
    %314 = math.exp %313 : vector<8x128xf32>
    %cst_49 = arith.constant 1.000000e+00 : f32
    %315 = vector.broadcast %cst_49 : f32 to vector<8x128xf32>
    %316 = arith.addf %315, %314 : vector<8x128xf32>
    %317 = arith.divf %315, %316 : vector<8x128xf32>
    %318 = arith.mulf %309, %288 : vector<8x128xf32>
    %319 = arith.mulf %303, %311 : vector<8x128xf32>
    %320 = arith.addf %318, %319 : vector<8x128xf32>
    %321 = math.tanh %320 : vector<8x128xf32>
    %322 = arith.mulf %317, %321 : vector<8x128xf32>
    %c5_i32 = arith.constant 5 : i32
    %323 = vector.broadcast %c5_i32 : i32 to vector<8x1xi32>
    %324 = arith.cmpi sgt, %16, %323 : vector<8x1xi32>
    %325 = arith.extui %324 : vector<8x1xi1> to vector<8x1xi32>
    %326 = arith.sitofp %325 : vector<8x1xi32> to vector<8x1xf32>
    %327 = vector.broadcast %326 : vector<8x1xf32> to vector<8x128xf32>
    %328 = arith.mulf %327, %322 : vector<8x128xf32>
    %cst_50 = arith.constant 1.000000e+00 : f32
    %329 = vector.broadcast %cst_50 : f32 to vector<8x1xf32>
    %330 = arith.subf %329, %326 : vector<8x1xf32>
    %331 = vector.broadcast %330 : vector<8x1xf32> to vector<8x128xf32>
    %332 = arith.mulf %331, %281 : vector<8x128xf32>
    %333 = arith.addf %328, %332 : vector<8x128xf32>
    %334 = vector.broadcast %326 : vector<8x1xf32> to vector<8x128xf32>
    %335 = arith.mulf %334, %320 : vector<8x128xf32>
    %cst_51 = arith.constant 1.000000e+00 : f32
    %336 = vector.broadcast %cst_51 : f32 to vector<8x1xf32>
    %337 = arith.subf %336, %326 : vector<8x1xf32>
    %338 = vector.broadcast %337 : vector<8x1xf32> to vector<8x128xf32>
    %339 = arith.mulf %338, %288 : vector<8x128xf32>
    %340 = arith.addf %335, %339 : vector<8x128xf32>
    %341 = arith.truncf %333 : vector<8x128xf32> to vector<8x128xbf16>
    %cst_52 = arith.constant dense<0.000000e+00> : vector<8x1024xf32>
    %342 = tpu.matmul %341, %26, %cst_52 {dimension_numbers = #tpu.dot_dimension_numbers<[1], [0], [0], [1], [0, 0, 1, 1], [], []>} : vector<8x128xbf16>, vector<128x1024xbf16>, vector<8x1024xf32> -> vector<8x1024xf32>
    %343 = vector.extract_strided_slice %15 {offsets = [48, 0], sizes = [8, 512], strides = [1, 1]} : vector<64x512xf32> to vector<8x512xf32>
    %344 = vector.extract_strided_slice %342 {offsets = [0, 0], sizes = [8, 512], strides = [1, 1]} : vector<8x1024xf32> to vector<8x512xf32>
    %345 = arith.mulf %23, %344 : vector<8x512xf32>
    %346 = arith.addf %343, %345 : vector<8x512xf32>
    %347 = vector.extract_strided_slice %342 {offsets = [0, 512], sizes = [8, 512], strides = [1, 1]} : vector<8x1024xf32> to vector<8x512xf32>
    %348 = arith.mulf %25, %347 : vector<8x512xf32>
    %349 = arith.addf %346, %348 : vector<8x512xf32>
    %350 = vector.extract_strided_slice %349 {offsets = [0, 0], sizes = [8, 128], strides = [1, 1]} : vector<8x512xf32> to vector<8x128xf32>
    %351 = arith.negf %350 : vector<8x128xf32>
    %352 = math.exp %351 : vector<8x128xf32>
    %cst_53 = arith.constant 1.000000e+00 : f32
    %353 = vector.broadcast %cst_53 : f32 to vector<8x128xf32>
    %354 = arith.addf %353, %352 : vector<8x128xf32>
    %355 = arith.divf %353, %354 : vector<8x128xf32>
    %356 = vector.extract_strided_slice %349 {offsets = [0, 128], sizes = [8, 128], strides = [1, 1]} : vector<8x512xf32> to vector<8x128xf32>
    %357 = arith.negf %356 : vector<8x128xf32>
    %358 = math.exp %357 : vector<8x128xf32>
    %cst_54 = arith.constant 1.000000e+00 : f32
    %359 = vector.broadcast %cst_54 : f32 to vector<8x128xf32>
    %360 = arith.addf %359, %358 : vector<8x128xf32>
    %361 = arith.divf %359, %360 : vector<8x128xf32>
    %362 = vector.extract_strided_slice %349 {offsets = [0, 256], sizes = [8, 128], strides = [1, 1]} : vector<8x512xf32> to vector<8x128xf32>
    %363 = math.tanh %362 : vector<8x128xf32>
    %364 = vector.extract_strided_slice %349 {offsets = [0, 384], sizes = [8, 128], strides = [1, 1]} : vector<8x512xf32> to vector<8x128xf32>
    %365 = arith.negf %364 : vector<8x128xf32>
    %366 = math.exp %365 : vector<8x128xf32>
    %cst_55 = arith.constant 1.000000e+00 : f32
    %367 = vector.broadcast %cst_55 : f32 to vector<8x128xf32>
    %368 = arith.addf %367, %366 : vector<8x128xf32>
    %369 = arith.divf %367, %368 : vector<8x128xf32>
    %370 = arith.mulf %361, %340 : vector<8x128xf32>
    %371 = arith.mulf %355, %363 : vector<8x128xf32>
    %372 = arith.addf %370, %371 : vector<8x128xf32>
    %373 = math.tanh %372 : vector<8x128xf32>
    %374 = arith.mulf %369, %373 : vector<8x128xf32>
    %c6_i32 = arith.constant 6 : i32
    %375 = vector.broadcast %c6_i32 : i32 to vector<8x1xi32>
    %376 = arith.cmpi sgt, %16, %375 : vector<8x1xi32>
    %377 = arith.extui %376 : vector<8x1xi1> to vector<8x1xi32>
    %378 = arith.sitofp %377 : vector<8x1xi32> to vector<8x1xf32>
    %379 = vector.broadcast %378 : vector<8x1xf32> to vector<8x128xf32>
    %380 = arith.mulf %379, %374 : vector<8x128xf32>
    %cst_56 = arith.constant 1.000000e+00 : f32
    %381 = vector.broadcast %cst_56 : f32 to vector<8x1xf32>
    %382 = arith.subf %381, %378 : vector<8x1xf32>
    %383 = vector.broadcast %382 : vector<8x1xf32> to vector<8x128xf32>
    %384 = arith.mulf %383, %333 : vector<8x128xf32>
    %385 = arith.addf %380, %384 : vector<8x128xf32>
    %386 = vector.broadcast %378 : vector<8x1xf32> to vector<8x128xf32>
    %387 = arith.mulf %386, %372 : vector<8x128xf32>
    %cst_57 = arith.constant 1.000000e+00 : f32
    %388 = vector.broadcast %cst_57 : f32 to vector<8x1xf32>
    %389 = arith.subf %388, %378 : vector<8x1xf32>
    %390 = vector.broadcast %389 : vector<8x1xf32> to vector<8x128xf32>
    %391 = arith.mulf %390, %340 : vector<8x128xf32>
    %392 = arith.addf %387, %391 : vector<8x128xf32>
    %393 = arith.truncf %385 : vector<8x128xf32> to vector<8x128xbf16>
    %cst_58 = arith.constant dense<0.000000e+00> : vector<8x1024xf32>
    %394 = tpu.matmul %393, %26, %cst_58 {dimension_numbers = #tpu.dot_dimension_numbers<[1], [0], [0], [1], [0, 0, 1, 1], [], []>} : vector<8x128xbf16>, vector<128x1024xbf16>, vector<8x1024xf32> -> vector<8x1024xf32>
    %395 = vector.extract_strided_slice %15 {offsets = [56, 0], sizes = [8, 512], strides = [1, 1]} : vector<64x512xf32> to vector<8x512xf32>
    %396 = vector.extract_strided_slice %394 {offsets = [0, 0], sizes = [8, 512], strides = [1, 1]} : vector<8x1024xf32> to vector<8x512xf32>
    %397 = arith.mulf %23, %396 : vector<8x512xf32>
    %398 = arith.addf %395, %397 : vector<8x512xf32>
    %399 = vector.extract_strided_slice %394 {offsets = [0, 512], sizes = [8, 512], strides = [1, 1]} : vector<8x1024xf32> to vector<8x512xf32>
    %400 = arith.mulf %25, %399 : vector<8x512xf32>
    %401 = arith.addf %398, %400 : vector<8x512xf32>
    %402 = vector.extract_strided_slice %401 {offsets = [0, 0], sizes = [8, 128], strides = [1, 1]} : vector<8x512xf32> to vector<8x128xf32>
    %403 = arith.negf %402 : vector<8x128xf32>
    %404 = math.exp %403 : vector<8x128xf32>
    %cst_59 = arith.constant 1.000000e+00 : f32
    %405 = vector.broadcast %cst_59 : f32 to vector<8x128xf32>
    %406 = arith.addf %405, %404 : vector<8x128xf32>
    %407 = arith.divf %405, %406 : vector<8x128xf32>
    %408 = vector.extract_strided_slice %401 {offsets = [0, 128], sizes = [8, 128], strides = [1, 1]} : vector<8x512xf32> to vector<8x128xf32>
    %409 = arith.negf %408 : vector<8x128xf32>
    %410 = math.exp %409 : vector<8x128xf32>
    %cst_60 = arith.constant 1.000000e+00 : f32
    %411 = vector.broadcast %cst_60 : f32 to vector<8x128xf32>
    %412 = arith.addf %411, %410 : vector<8x128xf32>
    %413 = arith.divf %411, %412 : vector<8x128xf32>
    %414 = vector.extract_strided_slice %401 {offsets = [0, 256], sizes = [8, 128], strides = [1, 1]} : vector<8x512xf32> to vector<8x128xf32>
    %415 = math.tanh %414 : vector<8x128xf32>
    %416 = vector.extract_strided_slice %401 {offsets = [0, 384], sizes = [8, 128], strides = [1, 1]} : vector<8x512xf32> to vector<8x128xf32>
    %417 = arith.negf %416 : vector<8x128xf32>
    %418 = math.exp %417 : vector<8x128xf32>
    %cst_61 = arith.constant 1.000000e+00 : f32
    %419 = vector.broadcast %cst_61 : f32 to vector<8x128xf32>
    %420 = arith.addf %419, %418 : vector<8x128xf32>
    %421 = arith.divf %419, %420 : vector<8x128xf32>
    %422 = arith.mulf %413, %392 : vector<8x128xf32>
    %423 = arith.mulf %407, %415 : vector<8x128xf32>
    %424 = arith.addf %422, %423 : vector<8x128xf32>
    %425 = math.tanh %424 : vector<8x128xf32>
    %426 = arith.mulf %421, %425 : vector<8x128xf32>
    %c7_i32 = arith.constant 7 : i32
    %427 = vector.broadcast %c7_i32 : i32 to vector<8x1xi32>
    %428 = arith.cmpi sgt, %16, %427 : vector<8x1xi32>
    %429 = arith.extui %428 : vector<8x1xi1> to vector<8x1xi32>
    %430 = arith.sitofp %429 : vector<8x1xi32> to vector<8x1xf32>
    %431 = vector.broadcast %430 : vector<8x1xf32> to vector<8x128xf32>
    %432 = arith.mulf %431, %426 : vector<8x128xf32>
    %cst_62 = arith.constant 1.000000e+00 : f32
    %433 = vector.broadcast %cst_62 : f32 to vector<8x1xf32>
    %434 = arith.subf %433, %430 : vector<8x1xf32>
    %435 = vector.broadcast %434 : vector<8x1xf32> to vector<8x128xf32>
    %436 = arith.mulf %435, %385 : vector<8x128xf32>
    %437 = arith.addf %432, %436 : vector<8x128xf32>
    %438 = vector.extract_strided_slice %437 {offsets = [0, 0], sizes = [4, 128], strides = [1, 1]} : vector<8x128xf32> to vector<4x128xf32>
    %439 = vector.extract_strided_slice %437 {offsets = [4, 0], sizes = [4, 128], strides = [1, 1]} : vector<8x128xf32> to vector<4x128xf32>
    %440 = tpu.concatenate %438, %439 in 1 : vector<4x128xf32>, vector<4x128xf32> -> vector<4x256xf32>
    %c0_63 = arith.constant 0 : index
    %c0_64 = arith.constant 0 : index
    %441 = vector.load %arg4[%c0_63, %c0_64] : memref<16x16xf32, #tpu.memory_space<vmem>>, vector<16x16xf32>
    %c0_65 = arith.constant 0 : index
    %c0_66 = arith.constant 0 : index
    %442 = vector.load %arg5[%c0_65, %c0_66] : memref<16x1xf32, #tpu.memory_space<vmem>>, vector<16x1xf32>
    %cst_67 = arith.constant dense<0.000000e+00> : vector<16x1xf32>
    %443 = tpu.matmul %441, %442, %cst_67 {dimension_numbers = #tpu.dot_dimension_numbers<[1], [0], [0], [1], [0, 0, 1, 1], [], []>} : vector<16x16xf32>, vector<16x1xf32>, vector<16x1xf32> -> vector<16x1xf32>
    %c0_68 = arith.constant 0 : index
    %c0_69 = arith.constant 0 : index
    %444 = vector.load %arg6[%c0_68, %c0_69] : memref<1x256xf32, #tpu.memory_space<vmem>>, vector<1x256xf32>
    %445 = vector.broadcast %443 : vector<16x1xf32> to vector<16x256xf32>
    %446 = vector.broadcast %444 : vector<1x256xf32> to vector<16x256xf32>
    %447 = arith.mulf %445, %446 : vector<16x256xf32>
    %c0_70 = arith.constant 0 : index
    %c0_71 = arith.constant 0 : index
    %448 = vector.load %arg7[%c0_70, %c0_71] : memref<1x256xf32, #tpu.memory_space<vmem>>, vector<1x256xf32>
    %449 = vector.broadcast %448 : vector<1x256xf32> to vector<16x256xf32>
    %450 = arith.addf %447, %449 : vector<16x256xf32>
    %cst_72 = arith.constant 0.000000e+00 : f32
    %451 = vector.broadcast %cst_72 : f32 to vector<16x256xf32>
    %452 = arith.maximumf %450, %451 : vector<16x256xf32>
    %c0_i32_73 = arith.constant 0 : i32
    %453 = tpu.memref_slice %arg21[%c0_i32_73] : memref<3x!tpu.dma_semaphore, #tpu.memory_space<semaphore_mem>> -> memref<1x!tpu.dma_semaphore, #tpu.memory_space<semaphore_mem>>
    %454 = tpu.memref_squeeze %453 : memref<1x!tpu.dma_semaphore, #tpu.memory_space<semaphore_mem>> -> memref<!tpu.dma_semaphore, #tpu.memory_space<semaphore_mem>>
    tpu.wait_dma2 semaphore(%454 : memref<!tpu.dma_semaphore, #tpu.memory_space<semaphore_mem>>) src(%arg8 : memref<256x256xbf16, #tpu.memory_space<any>>) dst(%arg18 : memref<256x256xbf16, #tpu.memory_space<vmem>>)
    %455 = arith.truncf %452 : vector<16x256xf32> to vector<16x256xbf16>
    %c0_74 = arith.constant 0 : index
    %c0_75 = arith.constant 0 : index
    %456 = vector.load %arg18[%c0_74, %c0_75] : memref<256x256xbf16, #tpu.memory_space<vmem>>, vector<256x256xbf16>
    %cst_76 = arith.constant dense<0.000000e+00> : vector<16x256xf32>
    %457 = tpu.matmul %455, %456, %cst_76 {dimension_numbers = #tpu.dot_dimension_numbers<[1], [0], [0], [1], [0, 0, 1, 1], [], []>} : vector<16x256xbf16>, vector<256x256xbf16>, vector<16x256xf32> -> vector<16x256xf32>
    %c0_77 = arith.constant 0 : index
    %c0_78 = arith.constant 0 : index
    %458 = vector.load %arg4[%c0_77, %c0_78] : memref<16x16xf32, #tpu.memory_space<vmem>>, vector<16x16xf32>
    %cst_79 = arith.constant dense<0.000000e+00> : vector<16x256xf32>
    %459 = tpu.matmul %458, %457, %cst_79 {dimension_numbers = #tpu.dot_dimension_numbers<[1], [0], [0], [1], [0, 0, 1, 1], [], []>} : vector<16x16xf32>, vector<16x256xf32>, vector<16x256xf32> -> vector<16x256xf32>
    %c0_80 = arith.constant 0 : index
    %c0_81 = arith.constant 0 : index
    %460 = vector.load %arg9[%c0_80, %c0_81] : memref<1x256xf32, #tpu.memory_space<vmem>>, vector<1x256xf32>
    %461 = vector.broadcast %460 : vector<1x256xf32> to vector<16x256xf32>
    %462 = arith.addf %459, %461 : vector<16x256xf32>
    %cst_82 = arith.constant 0.000000e+00 : f32
    %463 = vector.broadcast %cst_82 : f32 to vector<16x256xf32>
    %464 = arith.maximumf %462, %463 : vector<16x256xf32>
    %c0_83 = arith.constant 0 : index
    %c0_84 = arith.constant 0 : index
    %465 = vector.load %arg10[%c0_83, %c0_84] : memref<4x16xf32, #tpu.memory_space<vmem>>, vector<4x16xf32>
    %cst_85 = arith.constant dense<0.000000e+00> : vector<4x256xf32>
    %466 = tpu.matmul %465, %464, %cst_85 {dimension_numbers = #tpu.dot_dimension_numbers<[1], [0], [0], [1], [0, 0, 1, 1], [], []>} : vector<4x16xf32>, vector<16x256xf32>, vector<4x256xf32> -> vector<4x256xf32>
    %c1_i32_86 = arith.constant 1 : i32
    %467 = tpu.memref_slice %arg21[%c1_i32_86] : memref<3x!tpu.dma_semaphore, #tpu.memory_space<semaphore_mem>> -> memref<1x!tpu.dma_semaphore, #tpu.memory_space<semaphore_mem>>
    %468 = tpu.memref_squeeze %467 : memref<1x!tpu.dma_semaphore, #tpu.memory_space<semaphore_mem>> -> memref<!tpu.dma_semaphore, #tpu.memory_space<semaphore_mem>>
    tpu.wait_dma2 semaphore(%468 : memref<!tpu.dma_semaphore, #tpu.memory_space<semaphore_mem>>) src(%arg11 : memref<256x256xbf16, #tpu.memory_space<any>>) dst(%arg19 : memref<256x256xbf16, #tpu.memory_space<vmem>>)
    %c2_i32_87 = arith.constant 2 : i32
    %469 = tpu.memref_slice %arg21[%c2_i32_87] : memref<3x!tpu.dma_semaphore, #tpu.memory_space<semaphore_mem>> -> memref<1x!tpu.dma_semaphore, #tpu.memory_space<semaphore_mem>>
    %470 = tpu.memref_squeeze %469 : memref<1x!tpu.dma_semaphore, #tpu.memory_space<semaphore_mem>> -> memref<!tpu.dma_semaphore, #tpu.memory_space<semaphore_mem>>
    tpu.wait_dma2 semaphore(%470 : memref<!tpu.dma_semaphore, #tpu.memory_space<semaphore_mem>>) src(%arg13 : memref<256x256xbf16, #tpu.memory_space<any>>) dst(%arg20 : memref<256x256xbf16, #tpu.memory_space<vmem>>)
    %471 = arith.truncf %440 : vector<4x256xf32> to vector<4x256xbf16>
    %c0_88 = arith.constant 0 : index
    %c0_89 = arith.constant 0 : index
    %472 = vector.load %arg19[%c0_88, %c0_89] : memref<256x256xbf16, #tpu.memory_space<vmem>>, vector<256x256xbf16>
    %cst_90 = arith.constant dense<0.000000e+00> : vector<4x256xf32>
    %473 = tpu.matmul %471, %472, %cst_90 {dimension_numbers = #tpu.dot_dimension_numbers<[1], [0], [0], [1], [0, 0, 1, 1], [], []>} : vector<4x256xbf16>, vector<256x256xbf16>, vector<4x256xf32> -> vector<4x256xf32>
    %c0_91 = arith.constant 0 : index
    %c0_92 = arith.constant 0 : index
    %474 = vector.load %arg12[%c0_91, %c0_92] : memref<1x256xf32, #tpu.memory_space<vmem>>, vector<1x256xf32>
    %475 = vector.broadcast %474 : vector<1x256xf32> to vector<4x256xf32>
    %476 = arith.addf %473, %475 : vector<4x256xf32>
    %477 = arith.truncf %466 : vector<4x256xf32> to vector<4x256xbf16>
    %c0_93 = arith.constant 0 : index
    %c0_94 = arith.constant 0 : index
    %478 = vector.load %arg20[%c0_93, %c0_94] : memref<256x256xbf16, #tpu.memory_space<vmem>>, vector<256x256xbf16>
    %cst_95 = arith.constant dense<0.000000e+00> : vector<4x256xf32>
    %479 = tpu.matmul %477, %478, %cst_95 {dimension_numbers = #tpu.dot_dimension_numbers<[1], [0], [0], [1], [0, 0, 1, 1], [], []>} : vector<4x256xbf16>, vector<256x256xbf16>, vector<4x256xf32> -> vector<4x256xf32>
    %c0_96 = arith.constant 0 : index
    %c0_97 = arith.constant 0 : index
    %480 = vector.load %arg14[%c0_96, %c0_97] : memref<1x256xf32, #tpu.memory_space<vmem>>, vector<1x256xf32>
    %481 = vector.broadcast %480 : vector<1x256xf32> to vector<4x256xf32>
    %482 = arith.addf %479, %481 : vector<4x256xf32>
    %483 = arith.addf %482, %476 : vector<4x256xf32>
    %cst_98 = arith.constant 0.000000e+00 : f32
    %484 = vector.broadcast %cst_98 : f32 to vector<4x256xf32>
    %485 = arith.maximumf %483, %484 : vector<4x256xf32>
    %c0_99 = arith.constant 0 : index
    %c0_100 = arith.constant 0 : index
    %486 = vector.load %arg15[%c0_99, %c0_100] : memref<256x8xf32, #tpu.memory_space<vmem>>, vector<256x8xf32>
    %cst_101 = arith.constant dense<0.000000e+00> : vector<4x8xf32>
    %487 = tpu.matmul %485, %486, %cst_101 {dimension_numbers = #tpu.dot_dimension_numbers<[1], [0], [0], [1], [0, 0, 1, 1], [], []>} : vector<4x256xf32>, vector<256x8xf32>, vector<4x8xf32> -> vector<4x8xf32>
    %c0_102 = arith.constant 0 : index
    %c0_103 = arith.constant 0 : index
    %488 = vector.load %arg16[%c0_102, %c0_103] : memref<1x8xf32, #tpu.memory_space<vmem>>, vector<1x8xf32>
    %489 = vector.broadcast %488 : vector<1x8xf32> to vector<4x8xf32>
    %490 = arith.addf %487, %489 : vector<4x8xf32>
    %c0_104 = arith.constant 0 : index
    %c0_105 = arith.constant 0 : index
    %491 = vector.load %arg17[%c0_104, %c0_105] : memref<4x8xf32, #tpu.memory_space<vmem>>, vector<4x8xf32>
    tpu.vector_store %arg17[%c0_104, %c0_105], %490 {strides = array<i32>} : memref<4x8xf32, #tpu.memory_space<vmem>>, vector<4x8xf32>,
    return
  }
}

</mosaic_0001>

<bundles_post_ra>
// kernel: tpu_custom_call.1
= control target key start
LH: loop header
LB: loop body
LE: loop exit
PB: predicated region body
PF: predicated region fallthrough
CT: control target
= control target key end

     0   :  { %s6366_s0 = inlined_call_operand.vmem [shape: s32[64,1], index: 0, kind: input, shape index: {}]   ;;  %s6367_s1 = inlined_call_operand.vmem [shape: s32[8,1], index: 1, kind: input, shape index: {}]   ;;  %s6368_s2 = inlined_call_operand.vmem [shape: bf16[128,512], index: 2, kind: input, shape index: {}]   ;;  %s6369_s3 = inlined_call_operand.hbm [shape: bf16[128,1024], index: 3, kind: input, shape index: {}]   ;;  %s6370_s4 = inlined_call_operand.vmem [shape: f32[16,16], index: 4, kind: input, shape index: {}]   ;;  %s6371_s5 = inlined_call_operand.vmem [shape: f32[16,1], index: 5, kind: input, shape index: {}]   ;;  %s6372_s6 = inlined_call_operand.vmem [shape: f32[1,256], index: 6, kind: input, shape index: {}]   ;;  %s6373_s7 = inlined_call_operand.vmem [shape: f32[1,256], index: 7, kind: input, shape index: {}]   ;;  %s6374_s8 = inlined_call_operand.hbm [shape: bf16[256,256], index: 8, kind: input, shape index: {}]   ;;  %s6375_s9 = inlined_call_operand.vmem [shape: f32[1,256], index: 9, kind: input, shape index: {}]   ;;  %s6376_s10 = inlined_call_operand.vmem [shape: f32[4,16], index: 10, kind: input, shape index: {}]   ;;  %s6377_s11 = inlined_call_operand.hbm [shape: bf16[256,256], index: 11, kind: input, shape index: {}]   ;;  %s6378_s12 = inlined_call_operand.vmem [shape: f32[1,256], index: 12, kind: input, shape index: {}]   ;;  %s6379_s13 = inlined_call_operand.hbm [shape: bf16[256,256], index: 13, kind: input, shape index: {}]   ;;  %s6380_s14 = inlined_call_operand.vmem [shape: f32[1,256], index: 14, kind: input, shape index: {}]   ;;  %s6381_s15 = inlined_call_operand.vmem [shape: f32[256,8], index: 15, kind: input, shape index: {}]   ;;  %s6382_s16 = inlined_call_operand.vmem [shape: f32[1,8], index: 16, kind: input, shape index: {}]   ;;  %s6383_s17 = inlined_call_operand.hbm [shape: f32[4,8], index: 17, kind: output, shape index: {}]  }
   0x1   :  { %6461 = sst [smem:[#allocation82_spill]] %s6366_s0 }
   0x2   :  { %6462 = sst [smem:[#allocation83_spill]] %s6367_s1 }
   0x3   :  { %22 = vsyncpa [#allocation7], 0 }
   0x4   :  { %23 = vsyncpa [#allocation8], 0  ;;  %s34_s26 = sshll.u32 %s6369_s3, 4  ;;  %s4857_s27 = smov [#allocation6]   ;;  %s35_s26 = int_to_ptr.hbm [resolvable:$true] %s34_s26 }
   0x5   :  { %s36_s28 = sshll.u32 %s4857_s27, 4  ;;  %s4858_s29 = smov 512   ;;  %s37_s28 = int_to_ptr.vmem [resolvable:$true] %s36_s28 }
   0x6   :  { %s4859_s0 = smov 32  }
   0x7   :  { %42 = dma.hbm_to_vmem [thread:$0]  %s35_s26, 8192, %s37_s28, [#allocation7], %s4858_s29, %s4858_s29, %s4859_s0  }
   0x8   :  { %4847 = dma.done.wait [#allocation7], 8192  }
   0x9   :  { %4848 = vsyncadd [#allocation7], 4294959104  ;;  %v6385_v0 = vmov 0   ;;  %s6463_s19 = sld [smem:[#allocation82_spill]]  ;;  %v4861_v8 = vmov 0.0   ;;  %v117_v16 = vlaneseq  ;;  %s75_s27 = sshll.u32 %s6374_s8, 4  ;;  %s76_s27 = int_to_ptr.hbm [resolvable:$true] %s75_s27 }
   0xa   :  { %4597 = vset.pattern.permute.xlu2 %v6385_v0  ;;  %4596 = vset.pattern.permute.xlu1 %v6385_v0  ;;  %s6464_s0 = sld [smem:[#allocation83_spill]]  ;;  %v3663_v30 = vld [vmem:[%s6368_s2 + $0xe0] sm:$0xf]  ;;  %v4423_v31 = vld [vmem:[%s6368_s2 + $0xec] sm:$0xf0]  ;;  %s4863_s28 = smov [#allocation2]  }
   0xb   :  { %4595 = vset.pattern.permute.xlu0 %v6385_v0  ;;  %v473_v17 = vshrl.u32 %v117_v16, 7  ;;  %v4421_v32 = vld [vmem:[%s6368_s2 + $0xe4] sm:$0xf]  ;;  %v3664_v33 = vor.u32 %v4423_v31, %v3663_v30  ;;  %v3665_v34 = vld [vmem:[%s6368_s2 + $0xf0] sm:$0xf0]  ;;  %s77_s29 = sshll.u32 %s4863_s28, 4  ;;  %s78_s29 = int_to_ptr.vmem [resolvable:$true] %s77_s29 }
   0xc   :  { %v3671_v35 = vld [vmem:[%s6368_s2 + $0xe8] sm:$0xf]  ;;  %v4424_v36 = vld [vmem:[%s6368_s2 + $0xf4] sm:$0xf0]  ;;  %v3668_v37 = vor.u32 %v4421_v32, %v3665_v34  ;;  %v4422_v39 = vld [vmem:[%s6368_s2 + $0xec] sm:$0xf] }
   0xd   :  { %vm474_vm4 = vcmp.lt.s32.totalorder %v473_v17, 4  ;;  %v3672_v38 = vor.u32 %v4424_v36, %v3671_v35  ;;  %v3673_v40 = vld [vmem:[%s6368_s2 + $0xf8] sm:$0xf0]  ;;  %v3647_v41 = vld [vmem:[%s6368_s2 + $0xc0] sm:$0xf]  ;;  %355 = vmatpush.bf16.msra.mxu0 %v3664_v33  ;;  %s89_s18 = sshll.u32 %s6377_s11, 4  ;;  %s90_s18 = int_to_ptr.hbm [resolvable:$true] %s89_s18 }
   0xe   :  { %v4991_v20 = vsel %vm474_vm4, 1.0, %v4861_v8  ;;  %v3676_v42 = vor.u32 %v4422_v39, %v3673_v40  ;;  %v4419_v43 = vld [vmem:[%s6368_s2 + $0xcc] sm:$0xf0]  ;;  %v4417_v44 = vld [vmem:[%s6368_s2 + $0xc4] sm:$0xf]  ;;  %384 = vmatpush.bf16.msra.mxu1 %v3668_v37  ;;  %s4864_s8 = smov [#allocation3]  }
   0xf   :  { %v113_v1 = vld [vmem:[%s6463_s19 + $0x20] sm:$0xff]  ;;  %v111_v2 = vld [vmem:[%s6463_s19 + $0x10] sm:$0xff]  ;;  %v114_v4 = vld [vmem:[%s6463_s19 + $0x28] sm:$0xff]  ;;  %6465 = vst [vmem:[#allocation23_spill] sm:$0xff] %v4991_v20  ;;  %413 = vmatpush.bf16.msra.mxu2 %v3672_v38  ;;  %v3648_v46 = vor.u32 %v4419_v43, %v3647_v41  ;;  %80 = dma.hbm_to_vmem [thread:$0]  %s76_s27, 4096, %s78_s29, [#allocation5] }
  0x10   :  { %v109_v3 = vld [vmem:[%s6463_s19] sm:$0xff]  ;;  %132 = vperm.xlu2 %4597, %v113_v1   ;;  %126 = vperm.xlu1 %4596, %v111_v2   ;;  %v112_v5 = vld [vmem:[%s6463_s19 + $0x18] sm:$0xff]  ;;  %v110_v6 = vld [vmem:[%s6463_s19 + $0x8] sm:$0xff]  ;;  %s91_s3 = sshll.u32 %s4864_s8, 4  ;;  %s4865_s11 = smov [#allocation4]   ;;  %s92_s3 = int_to_ptr.vmem [resolvable:$true] %s91_s3 }
  0x11   :  { %120 = vperm.xlu0 %4595, %v109_v3   ;;  %v471_v7 = vld [vmem:[%s6464_s0] sm:$0xff]  ;;  %v116_v10 = vld [vmem:[%s6463_s19 + $0x38] sm:$0xff]  ;;  %v115_v11 = vld [vmem:[%s6463_s19 + $0x30] sm:$0xff]  ;;  %442 = vmatpush.bf16.msra.mxu3 %v3676_v42  ;;  %s103_s19 = sshll.u32 %s6379_s13, 4  ;;  %s105_s13 = sshll.u32 %s4865_s11, 4  ;;  %s104_s19 = int_to_ptr.hbm [resolvable:$true] %s103_s19  ;;  %s106_s13 = int_to_ptr.vmem [resolvable:$true] %s105_s13 }
  0x12   :  { %vm1045_vm0 = vcmp.gt.s32.totalorder %v471_v7, 0  ;;  %vm1248_vm1 = vcmp.gt.s32.totalorder %v471_v7, 1  ;;  %vm1452_vm2 = vcmp.gt.s32.totalorder %v471_v7, 2  ;;  %vm1656_vm3 = vcmp.gt.s32.totalorder %v471_v7, 3  ;;  %v3649_v45 = vld [vmem:[%s6368_s2 + $0xd0] sm:$0xf0]  ;;  %356 = vmatpush.bf16.msra.mxu0 %v3648_v46 }
  0x13   :  { %v3969_v9 = vsel %vm1045_vm0, 1.0, %v4861_v8  ;;  %v3973_v12 = vsel %vm1248_vm1, 1.0, %v4861_v8  ;;  %v3977_v15 = vsel %vm1452_vm2, 1.0, %v4861_v8  ;;  %v3981_v19 = vsel %vm1656_vm3, 1.0, %v4861_v8  ;;  %v3655_v48 = vld [vmem:[%s6368_s2 + $0xc8] sm:$0xf] }
  0x14   :  { %v1257_v13 = vsub.f32 1.0, %v3973_v12  ;;  %v1054_v14 = vsub.f32 1.0, %v3969_v9  ;;  %v1461_v18 = vsub.f32 1.0, %v3977_v15  ;;  %vm1860_vm5 = vcmp.gt.s32.totalorder %v471_v7, 4  ;;  %v4420_v49 = vld [vmem:[%s6368_s2 + $0xd4] sm:$0xf0] }
  0x15   :  { %v3985_v21 = vsel %vm1860_vm5, 1.0, %v4861_v8  ;;  %v1665_v23 = vsub.f32 1.0, %v3981_v19  ;;  %vm2064_vm6 = vcmp.gt.s32.totalorder %v471_v7, 5  ;;  %vm2268_vm7 = vcmp.gt.s32.totalorder %v471_v7, 6  ;;  %v4418_v50 = vld [vmem:[%s6368_s2 + $0xcc] sm:$0xf] }
  0x16   :  { %v1869_v22 = vsub.f32 1.0, %v3985_v21  ;;  %v3989_v24 = vsel %vm2064_vm6, 1.0, %v4861_v8  ;;  %v3993_v26 = vsel %vm2268_vm7, 1.0, %v4861_v8  ;;  %vm2472_vm8 = vcmp.gt.s32.totalorder %v471_v7, 7  ;;  %v3657_v52 = vld [vmem:[%s6368_s2 + $0xd8] sm:$0xf0] }
  0x17   :  { %v2073_v25 = vsub.f32 1.0, %v3989_v24  ;;  %v3997_v27 = vsel %vm2472_vm8, 1.0, %v4861_v8  ;;  %v2277_v29 = vsub.f32 1.0, %v3993_v26  ;;  %v3652_v47 = vor.u32 %v4417_v44, %v3649_v45  ;;  %v3631_v54 = vld [vmem:[%s6368_s2 + $0xa0] sm:$0xf] }
  0x18   :  { %135 = vperm.xlu2 %4597, %v114_v4   ;;  %129 = vperm.xlu1 %4596, %v112_v5   ;;  %v2481_v28 = vsub.f32 1.0, %v3997_v27  ;;  %v3656_v51 = vor.u32 %v4420_v49, %v3655_v48  ;;  %v3660_v53 = vor.u32 %v4418_v50, %v3657_v52  ;;  %v4415_v55 = vld [vmem:[%s6368_s2 + $0xac] sm:$0xf0]  ;;  %v4413_v56 = vld [vmem:[%s6368_s2 + $0xa4] sm:$0xf] }
  0x19   :  { %123 = vperm.xlu0 %4595, %v110_v6   ;;  %385 = vmatpush.bf16.msra.mxu1 %v3652_v47  ;;  %v3632_v57 = vor.u32 %v4415_v55, %v3631_v54  ;;  %v3633_v58 = vld [vmem:[%s6368_s2 + $0xb0] sm:$0xf0]  ;;  %v3639_v59 = vld [vmem:[%s6368_s2 + $0xa8] sm:$0xf]  ;;  %v4416_v60 = vld [vmem:[%s6368_s2 + $0xb4] sm:$0xf0] }
  0x1a   :  { %414 = vmatpush.bf16.msra.mxu2 %v3656_v51  ;;  %443 = vmatpush.bf16.msra.mxu3 %v3660_v53  ;;  %v3636_v61 = vor.u32 %v4413_v56, %v3633_v58  ;;  %v3640_v62 = vor.u32 %v4416_v60, %v3639_v59  ;;  %v4414_v63 = vld [vmem:[%s6368_s2 + $0xac] sm:$0xf]  ;;  %v3641_v1 = vld [vmem:[%s6368_s2 + $0xb8] sm:$0xf0]  ;;  %v3615_v2 = vld [vmem:[%s6368_s2 + $0x80] sm:$0xf] }
  0x1b   :  { %357 = vmatpush.bf16.msra.mxu0 %v3632_v57  ;;  %v3644_v3 = vor.u32 %v4414_v63, %v3641_v1  ;;  %v4411_v4 = vld [vmem:[%s6368_s2 + $0x8c] sm:$0xf0]  ;;  %v4409_v5 = vld [vmem:[%s6368_s2 + $0x84] sm:$0xf]  ;;  %v3617_v6 = vld [vmem:[%s6368_s2 + $0x90] sm:$0xf0] }
  0x1c   :  { %v3616_v7 = vor.u32 %v4411_v4, %v3615_v2  ;;  %v3620_v8 = vor.u32 %v4409_v5, %v3617_v6  ;;  %v4407_v17 = vld [vmem:[%s6368_s2 + $0x6c] sm:$0xf0]  ;;  %v4401_v31 = vld [vmem:[%s6368_s2 + $0x44] sm:$0xf]  ;;  %v3585_v32 = vld [vmem:[%s6368_s2 + $0x50] sm:$0xf0] }
  0x1d   :  { %386 = vmatpush.bf16.msra.mxu1 %v3636_v61  ;;  %v4403_v30 = vld [vmem:[%s6368_s2 + $0x4c] sm:$0xf0]  ;;  %v3591_v33 = vld [vmem:[%s6368_s2 + $0x48] sm:$0xf]  ;;  %v4404_v34 = vld [vmem:[%s6368_s2 + $0x54] sm:$0xf0]  ;;  %v3588_v38 = vor.u32 %v4401_v31, %v3585_v32 }
  0x1e   :  { %415 = vmatpush.bf16.msra.mxu2 %v3640_v62  ;;  %444 = vmatpush.bf16.msra.mxu3 %v3644_v3  ;;  %v4402_v35 = vld [vmem:[%s6368_s2 + $0x4c] sm:$0xf]  ;;  %v3593_v37 = vld [vmem:[%s6368_s2 + $0x58] sm:$0xf0]  ;;  %v3592_v39 = vor.u32 %v4404_v34, %v3591_v33  ;;  %v3567_v41 = vld [vmem:[%s6368_s2 + $0x20] sm:$0xf] }
  0x1f   :  { %358 = vmatpush.bf16.msra.mxu0 %v3616_v7  ;;  %v3596_v40 = vor.u32 %v4402_v35, %v3593_v37  ;;  %v4399_v42 = vld [vmem:[%s6368_s2 + $0x2c] sm:$0xf0]  ;;  %v4397_v43 = vld [vmem:[%s6368_s2 + $0x24] sm:$0xf]  ;;  %v3569_v45 = vld [vmem:[%s6368_s2 + $0x30] sm:$0xf0] }
  0x20   :  { %1050 = vperm.xlu2 %4597, %v3969_v9   ;;  %141 = vperm.xlu1 %4596, %v116_v10   ;;  %v3623_v9 = vld [vmem:[%s6368_s2 + $0x88] sm:$0xf]  ;;  %v4412_v10 = vld [vmem:[%s6368_s2 + $0x94] sm:$0xf0]  ;;  %v3568_v44 = vor.u32 %v4399_v42, %v3567_v41  ;;  %v3572_v48 = vor.u32 %v4397_v43, %v3569_v45  ;;  %v4398_v50 = vld [vmem:[%s6368_s2 + $0x2c] sm:$0xf] }
  0x21   :  { %138 = vperm.xlu0 %4595, %v115_v11   ;;  %v4410_v11 = vld [vmem:[%s6368_s2 + $0x8c] sm:$0xf]  ;;  %387 = vmatpush.bf16.msra.mxu1 %v3620_v8  ;;  %v3575_v46 = vld [vmem:[%s6368_s2 + $0x28] sm:$0xf]  ;;  %v4400_v47 = vld [vmem:[%s6368_s2 + $0x34] sm:$0xf0] }
  0x22   :  { %v3576_v49 = vor.u32 %v4400_v47, %v3575_v46  ;;  %v3577_v51 = vld [vmem:[%s6368_s2 + $0x38] sm:$0xf0]  ;;  %v3551_v52 = vld [vmem:[%s6368_s2] sm:$0xf]  ;;  %v4395_v54 = vld [vmem:[%s6368_s2 + $0xc] sm:$0xf0] }
  0x23   :  { %v3580_v53 = vor.u32 %v4398_v50, %v3577_v51  ;;  %v4393_v55 = vld [vmem:[%s6368_s2 + $0x4] sm:$0xf]  ;;  %v3553_v56 = vld [vmem:[%s6368_s2 + $0x10] sm:$0xf0]  ;;  %v3552_v57 = vor.u32 %v4395_v54, %v3551_v52  ;;  %v3559_v59 = vld [vmem:[%s6368_s2 + $0x8] sm:$0xf] }
  0x24   :  { %v3556_v58 = vor.u32 %v4393_v55, %v3553_v56  ;;  %v4396_v60 = vld [vmem:[%s6368_s2 + $0x14] sm:$0xf0]  ;;  %v4394_v61 = vld [vmem:[%s6368_s2 + $0xc] sm:$0xf]  ;;  %v3561_v63 = vld [vmem:[%s6368_s2 + $0x18] sm:$0xf0] }
  0x25   :  { %v3560_v62 = vor.u32 %v4396_v60, %v3559_v59  ;;  %v3564_v1 = vor.u32 %v4394_v61, %v3561_v63  ;;  %v3936_v2 = vld [vmem:[#allocation6 + $0x1c0] sm:$0xf]  ;;  %v4481_v4 = vld [vmem:[#allocation6 + $0x1c4] sm:$0xf]  ;;  %v4482_v7 = vld [vmem:[#allocation6 + $0x1cc] sm:$0xf] }
  0x26   :  { %v4485_v3 = vld [vmem:[#allocation6 + $0x1dc] sm:$0xf0]  ;;  %v3938_v6 = vld [vmem:[#allocation6 + $0x1e0] sm:$0xf0]  ;;  %v3946_v8 = vld [vmem:[#allocation6 + $0x1e8] sm:$0xf0] }
  0x27   :  { %v5185_v5 = vor.u32 %v4485_v3, %v3936_v2  ;;  %v3882_v31 = vld [vmem:[#allocation6 + $0x168] sm:$0xf0]  ;;  %v3912_v35 = vld [vmem:[#allocation6 + $0x188] sm:$0xf]  ;;  %v3840_v37 = vld [vmem:[#allocation6 + $0x100] sm:$0xf] }
  0x28   :  { %1260 = vperm.xlu2 %4597, %v1257_v13   ;;  %1253 = vperm.xlu1 %4596, %v3973_v12   ;;  %v3624_v12 = vor.u32 %v4412_v10, %v3623_v9  ;;  %v3625_v13 = vld [vmem:[%s6368_s2 + $0x98] sm:$0xf0]  ;;  %v5187_v9 = vor.u32 %v4481_v4, %v3938_v6  ;;  %v5189_v10 = vor.u32 %v4482_v7, %v3946_v8  ;;  %v3842_v41 = vld [vmem:[#allocation6 + $0x120] sm:$0xf0]  ;;  %v4470_v45 = vld [vmem:[#allocation6 + $0x164] sm:$0xf0] }
  0x29   :  { %1057 = vperm.xlu0 %4595, %v1054_v14   ;;  %v3628_v14 = vor.u32 %v4410_v11, %v3625_v13  ;;  %v3904_v11 = vld [vmem:[#allocation6 + $0x180] sm:$0xf]  ;;  %v4473_v13 = vld [vmem:[#allocation6 + $0x184] sm:$0xf]  ;;  %v4458_v46 = vld [vmem:[#allocation6 + $0x10c] sm:$0xf] }
  0x2a   :  { %416 = vmatpush.bf16.msra.mxu2 %v3624_v12  ;;  %v4477_v12 = vld [vmem:[#allocation6 + $0x19c] sm:$0xf0]  ;;  %v5229_v50 = vand.u32 127, %v117_v16  ;;  %v3848_v52 = vld [vmem:[#allocation6 + $0x108] sm:$0xf] }
  0x2b   :  { %445 = vmatpush.bf16.msra.mxu3 %v3628_v14  ;;  %v5194_v14 = vor.u32 %v4477_v12, %v3904_v11  ;;  %v6388_v56 = vmov 1.0|1.0   ;;  %v3808_v16 = vld [vmem:[#allocation6 + $0xc0] sm:$0xf]  ;;  %v3810_v60 = vld [vmem:[#allocation6 + $0xe0] sm:$0xf0] }
  0x2c   :  { %v3816_v61 = vld [vmem:[#allocation6 + $0xc8] sm:$0xf]  ;;  %v4450_v2 = vld [vmem:[#allocation6 + $0xcc] sm:$0xf]  ;;  %v3776_v6 = vld [vmem:[#allocation6 + $0x80] sm:$0xf] }
  0x2d   :  { %v3818_v3 = vld [vmem:[#allocation6 + $0xe8] sm:$0xf0]  ;;  %v4445_v7 = vld [vmem:[#allocation6 + $0x9c] sm:$0xf0]  ;;  %v4441_v8 = vld [vmem:[#allocation6 + $0x84] sm:$0xf] }
  0x2e   :  { %v5249_v4 = vor.u32 %v4450_v2, %v3818_v3  ;;  %v5254_v11 = vor.u32 %v4445_v7, %v3776_v6  ;;  %v3778_v12 = vld [vmem:[#allocation6 + $0xa0] sm:$0xf0]  ;;  %v3952_v3 = vld [vmem:[#allocation6 + $0x1d0] sm:$0xf]  ;;  %v4483_v7 = vld [vmem:[#allocation6 + $0x1d4] sm:$0xf] }
  0x2f   :  { %v4487_v6 = vld [vmem:[#allocation6 + $0x1ec] sm:$0xf0]  ;;  %v3832_v0 = vld [vmem:[#allocation6 + $0xd8] sm:$0xf]  ;;  %94 = dma.hbm_to_vmem [thread:$0]  %s90_s18, 4096, %s92_s3, [#allocation5 + $0x1] }
  0x30   :  { %1661 = vperm.xlu2 %4597, %v3981_v19   ;;  %1464 = vperm.xlu1 %4596, %v1461_v18   ;;  %v4405_v18 = vld [vmem:[%s6368_s2 + $0x64] sm:$0xf]  ;;  %v4456_v20 = vld [vmem:[#allocation6 + $0xf4] sm:$0xf0]  ;;  %108 = dma.hbm_to_vmem [thread:$0]  %s104_s19, 4096, %s106_s13, [#allocation5 + $0x2] }
  0x31   :  { %1457 = vperm.xlu0 %4595, %v3977_v15   ;;  %v3599_v15 = vld [vmem:[%s6368_s2 + $0x60] sm:$0xf] }
  0x32   :  { %v3600_v19 = vor.u32 %v4407_v17, %v3599_v15  ;;  %v3906_v15 = vld [vmem:[#allocation6 + $0x1a0] sm:$0xf0]  ;;  %v4474_v17 = vld [vmem:[#allocation6 + $0x18c] sm:$0xf] }
  0x34   :  { %359 = vmatpush.bf16.msra.mxu0 %v3600_v19  ;;  %v5196_v19 = vor.u32 %v4473_v13, %v3906_v15  ;;  %v3784_v13 = vld [vmem:[#allocation6 + $0x88] sm:$0xf] }
  0x35   :  { %v4446_v15 = vld [vmem:[#allocation6 + $0xa4] sm:$0xf0] }
  0x38   :  { %1872 = vperm.xlu2 %4597, %v1869_v22   ;;  %1865 = vperm.xlu1 %4596, %v3985_v21   ;;  %v3601_v21 = vld [vmem:[%s6368_s2 + $0x70] sm:$0xf0]  ;;  %v3607_v22 = vld [vmem:[%s6368_s2 + $0x68] sm:$0xf] }
  0x39   :  { %1668 = vperm.xlu0 %4595, %v1665_v23   ;;  %v4408_v23 = vld [vmem:[%s6368_s2 + $0x74] sm:$0xf0] }
  0x40   :  { %2273 = vperm.xlu2 %4597, %v3993_v26   ;;  %2076 = vperm.xlu1 %4596, %v2073_v25   ;;  %v3608_v25 = vor.u32 %v4408_v23, %v3607_v22  ;;  %v4406_v26 = vld [vmem:[%s6368_s2 + $0x6c] sm:$0xf]  ;;  %v3944_v22 = vld [vmem:[#allocation6 + $0x1c8] sm:$0xf] }
  0x41   :  { %2069 = vperm.xlu0 %4595, %v3989_v24   ;;  %v3604_v24 = vor.u32 %v4405_v18, %v3601_v21  ;;  %v3914_v18 = vld [vmem:[#allocation6 + $0x1a8] sm:$0xf0]  ;;  %v4486_v23 = vld [vmem:[#allocation6 + $0x1e4] sm:$0xf0] }
  0x42   :  { %417 = vmatpush.bf16.msra.mxu2 %v3608_v25  ;;  %v5198_v21 = vor.u32 %v4474_v17, %v3914_v18  ;;  %v3872_v25 = vld [vmem:[#allocation6 + $0x140] sm:$0xf]  ;;  %v5256_v17 = vor.u32 %v4441_v8, %v3778_v12  ;;  %v5258_v18 = vor.u32 %v4446_v15, %v3784_v13  ;;  %v5308_v8 = vor.u32 %v4487_v6, %v3952_v3  ;;  %v3954_v12 = vld [vmem:[#allocation6 + $0x1f0] sm:$0xf0]  ;;  %v3960_v13 = vld [vmem:[#allocation6 + $0x1d8] sm:$0xf] }
  0x43   :  { %388 = vmatpush.bf16.msra.mxu1 %v3604_v24  ;;  %v5203_v24 = vor.u32 %v4486_v23, %v3944_v22  ;;  %v4442_v22 = vld [vmem:[#allocation6 + $0x8c] sm:$0xf]  ;;  %v4488_v15 = vld [vmem:[#allocation6 + $0x1f4] sm:$0xf0]  ;;  %v3890_v3 = vld [vmem:[#allocation6 + $0x170] sm:$0xf0] }
  0x44   :  { %v3786_v23 = vld [vmem:[#allocation6 + $0xa8] sm:$0xf0]  ;;  %v3896_v6 = vld [vmem:[#allocation6 + $0x158] sm:$0xf] }
  0x46   :  { %418 = vmatpush.bf16.msra.mxu2 %v3592_v39  ;;  %v4461_v39 = vld [vmem:[#allocation6 + $0x11c] sm:$0xf0] }
  0x47   :  { %389 = vmatpush.bf16.msra.mxu1 %v3588_v38  ;;  %v5217_v42 = vor.u32 %v4461_v39, %v3840_v37 }
  0x48   :  { %2484 = vperm.xlu2 %4597, %v2481_v28   ;;  %2477 = vperm.xlu1 %4596, %v3997_v27   ;;  %v3609_v27 = vld [vmem:[%s6368_s2 + $0x78] sm:$0xf0]  ;;  %v3583_v28 = vld [vmem:[%s6368_s2 + $0x40] sm:$0xf] }
  0x49   :  { %2280 = vperm.xlu0 %4595, %v2277_v29   ;;  %v3612_v29 = vor.u32 %v4406_v26, %v3609_v27  ;;  %v3584_v36 = vor.u32 %v4403_v30, %v3583_v28  ;;  %v4469_v26 = vld [vmem:[#allocation6 + $0x15c] sm:$0xf0]  ;;  %v4465_v27 = vld [vmem:[#allocation6 + $0x144] sm:$0xf]  ;;  %v4466_v30 = vld [vmem:[#allocation6 + $0x14c] sm:$0xf] }
  0x4a   :  { %419 = vmatpush.bf16.msra.mxu2 %v3576_v49  ;;  %v5206_v28 = vor.u32 %v4469_v26, %v3872_v25  ;;  %v5210_v33 = vor.u32 %v4466_v30, %v3882_v31  ;;  %v5261_v25 = vor.u32 %v4442_v22, %v3786_v23  ;;  %v3744_v26 = vld [vmem:[#allocation6 + $0x40] sm:$0xf]  ;;  %v3746_v31 = vld [vmem:[#allocation6 + $0x60] sm:$0xf0]  ;;  %v5312_v22 = vor.u32 %v4483_v7, %v3954_v12  ;;  %v4472_v12 = vld [vmem:[#allocation6 + $0x174] sm:$0xf0] }
  0x4b   :  { %446 = vmatpush.bf16.msra.mxu3 %v3612_v29  ;;  %360 = vmatpush.bf16.msra.mxu0 %v3584_v36  ;;  %v3874_v29 = vld [vmem:[#allocation6 + $0x160] sm:$0xf0]  ;;  %v4478_v36 = vld [vmem:[#allocation6 + $0x1a4] sm:$0xf0]  ;;  %v5314_v23 = vor.u32 %v4488_v15, %v3960_v13  ;;  %v4468_v13 = vld [vmem:[#allocation6 + $0x15c] sm:$0xf] }
  0x4c   :  { %390 = vmatpush.bf16.msra.mxu1 %v3572_v48  ;;  %v5208_v32 = vor.u32 %v4465_v27, %v3874_v29  ;;  %v5215_v38 = vor.u32 %v4478_v36, %v3912_v35  ;;  %v3850_v48 = vld [vmem:[#allocation6 + $0x128] sm:$0xf0]  ;;  %v4437_v27 = vld [vmem:[#allocation6 + $0x5c] sm:$0xf0]  ;;  %v4433_v29 = vld [vmem:[#allocation6 + $0x44] sm:$0xf] }
  0x4d   :  { %v5226_v49 = vor.u32 %v4458_v46, %v3850_v48  ;;  %v5264_v30 = vor.u32 %v4437_v27, %v3744_v26  ;;  %v4438_v35 = vld [vmem:[#allocation6 + $0x64] sm:$0xf0]  ;;  %v5268_v37 = vor.u32 %v4433_v29, %v3746_v31  ;;  %v3712_v46 = vld [vmem:[#allocation6] sm:$0xf]  ;;  %v4484_v26 = vld [vmem:[#allocation6 + $0x1dc] sm:$0xf] }
  0x4e   :  { %420 = vmatpush.bf16.msra.mxu2 %v3560_v62  ;;  %v4454_v62 = vld [vmem:[#allocation6 + $0xe4] sm:$0xf0]  ;;  %v4429_v48 = vld [vmem:[#allocation6 + $0x1c] sm:$0xf0]  ;;  %v3962_v27 = vld [vmem:[#allocation6 + $0x1f8] sm:$0xf0] }
  0x4f   :  { %447 = vmatpush.bf16.msra.mxu3 %v3596_v40  ;;  %361 = vmatpush.bf16.msra.mxu0 %v3568_v44  ;;  %v4457_v40 = vld [vmem:[#allocation6 + $0x104] sm:$0xf]  ;;  %v3880_v44 = vld [vmem:[#allocation6 + $0x148] sm:$0xf]  ;;  %v3920_v29 = vld [vmem:[#allocation6 + $0x190] sm:$0xf]  ;;  %v5317_v31 = vor.u32 %v4484_v26, %v3962_v27  ;;  %v5337_v27 = vor.u32 %v4472_v12, %v3896_v6 }
  0x50   :  { %391 = vmatpush.bf16.msra.mxu1 %v3556_v58  ;;  %v5219_v43 = vor.u32 %v4457_v40, %v3842_v41  ;;  %v5222_v47 = vor.u32 %v4470_v45, %v3880_v44  ;;  %v4449_v58 = vld [vmem:[#allocation6 + $0xc4] sm:$0xf]  ;;  %v4434_v40 = vld [vmem:[#allocation6 + $0x4c] sm:$0xf]  ;;  %v3928_v45 = vld [vmem:[#allocation6 + $0x198] sm:$0xf] }
  0x51   :  { %v5244_v63 = vor.u32 %v4449_v58, %v3810_v60  ;;  %v3754_v41 = vld [vmem:[#allocation6 + $0x68] sm:$0xf0]  ;;  %v4430_v58 = vld [vmem:[#allocation6 + $0x24] sm:$0xf0]  ;;  %6468 = vst [vmem:[#allocation24_spill] sm:$0xff] %v5317_v31 }
  0x52   :  { %888 = vmatpush.bf16.msrb.mxu2 %v5203_v24  ;;  %v5274_v44 = vor.u32 %v4434_v40, %v3754_v41  ;;  %v4426_v60 = vld [vmem:[#allocation6 + $0xc] sm:$0xf]  ;;  %v3898_v15 = vld [vmem:[#allocation6 + $0x178] sm:$0xf0]  ;;  %6475 = vst [vmem:[#allocation31_spill] sm:$0xff] %v5337_v27 }
  0x53   :  { %448 = vmatpush.bf16.msra.mxu3 %v3580_v53  ;;  %362 = vmatpush.bf16.msra.mxu0 %v3552_v57  ;;  %v4462_v53 = vld [vmem:[#allocation6 + $0x124] sm:$0xf0]  ;;  %v4453_v57 = vld [vmem:[#allocation6 + $0xdc] sm:$0xf0]  ;;  %v3824_v12 = vld [vmem:[#allocation6 + $0xd0] sm:$0xf] }
  0x54   :  { %875 = vmatpush.bf16.msrb.mxu1 %v5187_v9  ;;  %v5235_v54 = vor.u32 %v4462_v53, %v3848_v52  ;;  %v5241_v59 = vor.u32 %v4453_v57, %v3808_v16  ;;  %v4425_v52 = vld [vmem:[#allocation6 + $0x4] sm:$0xf] }
  0x55   :  { %v3714_v53 = vld [vmem:[#allocation6 + $0x20] sm:$0xf0] }
  0x56   :  { %889 = vmatpush.bf16.msrb.mxu2 %v5215_v38  ;;  %v5294_v57 = vor.u32 %v4425_v52, %v3714_v53  ;;  %v3930_v53 = vld [vmem:[#allocation6 + $0x1b8] sm:$0xf0] }
  0x57   :  { %449 = vmatpush.bf16.msra.mxu3 %v3564_v1  ;;  %862 = vmatpush.bf16.msrb.mxu0 %v5185_v5  ;;  %v5246_v1 = vor.u32 %v4454_v62, %v3816_v61  ;;  %v3722_v61 = vld [vmem:[#allocation6 + $0x28] sm:$0xf0] }
  0x58   :  { %876 = vmatpush.bf16.msrb.mxu1 %v5196_v19  ;;  %v5304_v2 = vor.u32 %v4426_v60, %v3722_v61  ;;  %v4467_v61 = vld [vmem:[#allocation6 + $0x154] sm:$0xf] }
  0x59   :  { %v5335_v26 = vor.u32 %v4467_v61, %v3890_v3 }
  0x5a   :  { %890 = vmatpush.bf16.msrb.mxu2 %v5222_v47 }
  0x5b   :  { %901 = vmatpush.bf16.msrb.mxu3 %v5189_v10  ;;  %863 = vmatpush.bf16.msrb.mxu0 %v5194_v14  ;;  %6474 = vst [vmem:[#allocation30_spill] sm:$0xff] %v5335_v26 }
  0x5c   :  { %877 = vmatpush.bf16.msrb.mxu1 %v5208_v32 }
  0x5e   :  { %891 = vmatpush.bf16.msrb.mxu2 %v5235_v54 }
  0x5f   :  { %902 = vmatpush.bf16.msrb.mxu3 %v5198_v21  ;;  %864 = vmatpush.bf16.msrb.mxu0 %v5206_v28 }
  0x60   :  { %878 = vmatpush.bf16.msrb.mxu1 %v5219_v43 }
  0x62   :  { %892 = vmatpush.bf16.msrb.mxu2 %v5246_v1 }
  0x63   :  { %903 = vmatpush.bf16.msrb.mxu3 %v5210_v33  ;;  %865 = vmatpush.bf16.msrb.mxu0 %v5217_v42 }
  0x64   :  { %879 = vmatpush.bf16.msrb.mxu1 %v5244_v63 }
  0x66   :  { %893 = vmatpush.bf16.msrb.mxu2 %v5258_v18 }
  0x67   :  { %904 = vmatpush.bf16.msrb.mxu3 %v5226_v49  ;;  %866 = vmatpush.bf16.msrb.mxu0 %v5241_v59 }
  0x68   :  { %880 = vmatpush.bf16.msrb.mxu1 %v5256_v17 }
  0x6a   :  { %v5286_v16 = vpop.permute.xlu2 %132 }
  0x6b   :  { %905 = vmatpush.bf16.msrb.mxu3 %v5249_v4  ;;  %867 = vmatpush.bf16.msrb.mxu0 %v5254_v11  ;;  %vm147_vm15 = vcmp.eq.s32.totalorder %v5286_v16, %v5229_v50 }
  0x6c   :  { %881 = vmatpush.bf16.msrb.mxu1 %v5268_v37 }
  0x6f   :  { %906 = vmatpush.bf16.msrb.mxu3 %v5261_v25  ;;  %868 = vmatpush.bf16.msrb.mxu0 %v5264_v30 }
  0x70   :  { %882 = vmatpush.bf16.msrb.mxu1 %v5294_v57 }
  0x73   :  { %907 = vmatpush.bf16.msrb.mxu3 %v5274_v44 }
  0x77   :  { %908 = vmatpush.bf16.msrb.mxu3 %v5304_v2 }
  0x82   :  { %v127_v55 = vpop.permute.xlu1 %126 }
  0x83   :  { %v121_v34 = vpop.permute.xlu0 %120  ;;  %vm145_vm12 = vcmp.eq.s32.totalorder %v127_v55, %v5229_v50  ;;  %v3720_v55 = vld [vmem:[#allocation6 + $0x8] sm:$0xf] }
  0x84   :  { %vm143_vm9 = vcmp.eq.s32.totalorder %v121_v34, %v5229_v50  ;;  %v3752_v34 = vld [vmem:[#allocation6 + $0x48] sm:$0xf]  ;;  %v5302_v62 = vor.u32 %v4430_v58, %v3720_v55  ;;  %v3888_v55 = vld [vmem:[#allocation6 + $0x150] sm:$0xf] }
  0x85   :  { %v5270_v39 = vor.u32 %v4438_v35, %v3752_v34  ;;  %v4479_v34 = vld [vmem:[#allocation6 + $0x1ac] sm:$0xf0]  ;;  %v4475_v35 = vld [vmem:[#allocation6 + $0x194] sm:$0xf] }
  0x86   :  { %v5321_v40 = vor.u32 %v4479_v34, %v3920_v29  ;;  %v4471_v58 = vld [vmem:[#allocation6 + $0x16c] sm:$0xf0]  ;;  %v136_v29 = vpop.permute.xlu2 %135  ;;  %v5340_v34 = vor.u32 %v4468_v13, %v3898_v15  ;;  %v4451_v15 = vld [vmem:[#allocation6 + $0xd4] sm:$0xf] }
  0x87   :  { %894 = vmatpush.bf16.msrb.mxu2 %v5270_v39  ;;  %v5331_v7 = vor.u32 %v4471_v58, %v3888_v55  ;;  %vm148_vm0 = vcmp.eq.s32.totalorder %v136_v29, %v5229_v50  ;;  %v4460_v55 = vld [vmem:[#allocation6 + $0x11c] sm:$0xf]  ;;  %v4455_v13 = vld [vmem:[#allocation6 + $0xec] sm:$0xf0]  ;;  %v3826_v29 = vld [vmem:[#allocation6 + $0xf0] sm:$0xf0] }
  0x88   :  { %6469 = vst [vmem:[#allocation25_spill] sm:$0xff] %v5321_v40  ;;  %v3866_v58 = vld [vmem:[#allocation6 + $0x138] sm:$0xf0]  ;;  %vm3681_vm1 = vmpackc.low %vm148_vm0, %vm147_vm15 }
  0x89   :  { %6473 = vst [vmem:[#allocation29_spill] sm:$0xff] %v5331_v7  ;;  %v5355_v6 = vor.u32 %v4460_v55, %v3866_v58  ;;  %v5369_v55 = vor.u32 %v4456_v20, %v3832_v0 }
  0x8a   :  { %v130_v36 = vpop.permute.xlu1 %129  ;;  %6476 = vst [vmem:[#allocation32_spill] sm:$0xff] %v5340_v34 }
  0x8b   :  { %v124_v51 = vpop.permute.xlu0 %123  ;;  %vm146_vm13 = vcmp.eq.s32.totalorder %v130_v36, %v5229_v50  ;;  %895 = vmatpush.bf16.msrb.mxu2 %v5302_v62  ;;  %v3922_v36 = vld [vmem:[#allocation6 + $0x1b0] sm:$0xf0]  ;;  %6480 = vst [vmem:[#allocation36_spill] sm:$0xff] %v5355_v6 }
  0x8c   :  { %vm144_vm10 = vcmp.eq.s32.totalorder %v124_v51, %v5229_v50  ;;  %vm5278_vm14 = vmpackc.low %vm146_vm13, %vm145_vm12  ;;  %v5284_v51 = vor.u32 %v4429_v48, %v3712_v46  ;;  %v5323_v41 = vor.u32 %v4475_v35, %v3922_v36  ;;  %v4480_v46 = vld [vmem:[#allocation6 + $0x1b4] sm:$0xf0]  ;;  %v4476_v48 = vld [vmem:[#allocation6 + $0x19c] sm:$0xf]  ;;  %6483 = vst [vmem:[#allocation39_spill] sm:$0xff] %v5369_v55 }
  0x8d   :  { %vm3677_vm11 = vmpackc.low %vm144_vm10, %vm143_vm9  ;;  %v5326_v52 = vor.u32 %v4480_v46, %v3928_v45  ;;  %v5328_v60 = vor.u32 %v4476_v48, %v3930_v53  ;;  %v3856_v35 = vld [vmem:[#allocation6 + $0x110] sm:$0xf]  ;;  %v4459_v45 = vld [vmem:[#allocation6 + $0x114] sm:$0xf] }
  0x8e   :  { %3678 = vmatmul.msk.bf16.vlgmr.msra.gmra.mxu0 %vm3677_vm11, %v6388_v56  ;;  %3686 = vmatmul.msk.bf16.vlgmr.msra.gmra.mxu1 %vm3677_vm11, %v6388_v56  ;;  %6470 = vst [vmem:[#allocation26_spill] sm:$0xff] %v5323_v41  ;;  %v4463_v36 = vld [vmem:[#allocation6 + $0x12c] sm:$0xf0]  ;;  %v3858_v46 = vld [vmem:[#allocation6 + $0x130] sm:$0xf0] }
  0x8f   :  { %3694 = vmatmul.msk.bf16.vlgmr.msra.gmra.mxu2 %vm3677_vm11, %v6388_v56  ;;  %3702 = vmatmul.msk.bf16.vlgmr.msra.gmra.mxu3 %vm3677_vm11, %v6388_v56  ;;  %6471 = vst [vmem:[#allocation27_spill] sm:$0xff] %v5326_v52  ;;  %v3864_v48 = vld [vmem:[#allocation6 + $0x118] sm:$0xf]  ;;  %v5349_v61 = vor.u32 %v4463_v36, %v3856_v35  ;;  %v5351_v16 = vor.u32 %v4459_v45, %v3858_v46  ;;  %v4452_v35 = vld [vmem:[#allocation6 + $0xdc] sm:$0xf] }
  0x90   :  { %869 = vmatpush.bf16.msrb.mxu0 %v5284_v51  ;;  %927 = vmatpush.bf16.msra.mxu1 %v5312_v22  ;;  %6472 = vst [vmem:[#allocation28_spill] sm:$0xff] %v5328_v60  ;;  %v4464_v53 = vld [vmem:[#allocation6 + $0x134] sm:$0xf0]  ;;  %v3834_v36 = vld [vmem:[#allocation6 + $0xf8] sm:$0xf0]  ;;  %v5363_v45 = vor.u32 %v4455_v13, %v3824_v12  ;;  %v5365_v46 = vor.u32 %v4451_v15, %v3826_v29 }
  0x91   :  { %940 = vmatpush.bf16.msra.mxu2 %v5314_v23  ;;  %953 = vmatpush.bf16.msra.mxu3 %v5317_v31  ;;  %6477 = vst [vmem:[#allocation33_spill] sm:$0xff] %v5349_v61  ;;  %v5353_v3 = vor.u32 %v4464_v53, %v3864_v48  ;;  %v3792_v48 = vld [vmem:[#allocation6 + $0x90] sm:$0xf]  ;;  %v5371_v58 = vor.u32 %v4452_v35, %v3834_v36  ;;  %v4435_v35 = vld [vmem:[#allocation6 + $0x54] sm:$0xf] }
  0x92   :  { %6478 = vst [vmem:[#allocation34_spill] sm:$0xff] %v5351_v16  ;;  %v4447_v53 = vld [vmem:[#allocation6 + $0xac] sm:$0xf0]  ;;  %v3762_v36 = vld [vmem:[#allocation6 + $0x70] sm:$0xf0] }
  0x93   :  { %6479 = vst [vmem:[#allocation35_spill] sm:$0xff] %v5353_v3  ;;  %v5375_v12 = vor.u32 %v4447_v53, %v3792_v48  ;;  %v3760_v15 = vld [vmem:[#allocation6 + $0x50] sm:$0xf]  ;;  %v142_v48 = vpop.permute.xlu1 %141  ;;  %v139_v53 = vpop.permute.xlu0 %138 }
  0x94   :  { %914 = vmatpush.bf16.msra.mxu0 %v5308_v8  ;;  %928 = vmatpush.bf16.msra.mxu1 %v5323_v41  ;;  %6481 = vst [vmem:[#allocation37_spill] sm:$0xff] %v5363_v45  ;;  %v4439_v29 = vld [vmem:[#allocation6 + $0x6c] sm:$0xf0]  ;;  %vm150_vm2 = vcmp.eq.s32.totalorder %v142_v48, %v5229_v50  ;;  %vm149_vm3 = vcmp.eq.s32.totalorder %v139_v53, %v5229_v50  ;;  %v6497_v50 = vmov 1.0|1.0  }
  0x95   :  { %941 = vmatpush.bf16.msra.mxu2 %v5326_v52  ;;  %954 = vmatpush.bf16.msra.mxu3 %v5328_v60  ;;  %6482 = vst [vmem:[#allocation38_spill] sm:$0xff] %v5365_v46  ;;  %vm3683_vm4 = vmpackc.low %vm150_vm2, %vm149_vm3  ;;  %v6502_v48 = vld [vmem:[#allocation32_spill] sm:$0xff] }
  0x96   :  { %6484 = vst [vmem:[#allocation40_spill] sm:$0xff] %v5371_v58 }
  0x97   :  { %6485 = vst [vmem:[#allocation41_spill] sm:$0xff] %v5375_v12 }
  0x98   :  { %915 = vmatpush.bf16.msra.mxu0 %v5321_v40  ;;  %929 = vmatpush.bf16.msra.mxu1 %v5335_v26  ;;  %v4444_v26 = vld [vmem:[#allocation6 + $0x9c] sm:$0xf]  ;;  %v6503_v53 = vld [vmem:[#allocation33_spill] sm:$0xff] }
  0x99   :  { %942 = vmatpush.bf16.msra.mxu2 %v5337_v27  ;;  %955 = vmatpush.bf16.msra.mxu3 %v5340_v34  ;;  %v3794_v34 = vld [vmem:[#allocation6 + $0xb0] sm:$0xf0]  ;;  %v3800_v27 = vld [vmem:[#allocation6 + $0x98] sm:$0xf] }
  0x9c   :  { %916 = vmatpush.bf16.msra.mxu0 %v5331_v7  ;;  %930 = vmatpush.bf16.msra.mxu1 %v5351_v16  ;;  %v3802_v16 = vld [vmem:[#allocation6 + $0xb8] sm:$0xf0]  ;;  %v3736_v7 = vld [vmem:[#allocation6 + $0x18] sm:$0xf] }
  0x9d   :  { %943 = vmatpush.bf16.msra.mxu2 %v5353_v3  ;;  %956 = vmatpush.bf16.msra.mxu3 %v5355_v6  ;;  %v5383_v20 = vor.u32 %v4444_v26, %v3802_v16  ;;  %v3768_v6 = vld [vmem:[#allocation6 + $0x58] sm:$0xf]  ;;  %v4436_v3 = vld [vmem:[#allocation6 + $0x5c] sm:$0xf] }
  0x9e   :  { %3680 = vmatmul.msk.bf16.gmra.mxu0 %vm5278_vm14, %v6388_v56  ;;  %3688 = vmatmul.msk.bf16.gmra.mxu1 %vm5278_vm14, %v6388_v56 }
  0x9f   :  { %3696 = vmatmul.msk.bf16.gmra.mxu2 %vm5278_vm14, %v6388_v56  ;;  %3704 = vmatmul.msk.bf16.gmra.mxu3 %vm5278_vm14, %v6388_v56  ;;  %6488 = vst [vmem:[#allocation44_spill] sm:$0xff] %v5383_v20 }
  0xa0   :  { %917 = vmatpush.bf16.msra.mxu0 %v5349_v61  ;;  %v4448_v61 = vld [vmem:[#allocation6 + $0xb4] sm:$0xf0]  ;;  %931 = vmatpush.bf16.msra.mxu1 %v5365_v46  ;;  %v3770_v46 = vld [vmem:[#allocation6 + $0x78] sm:$0xf0] }
  0xa1   :  { %944 = vmatpush.bf16.msra.mxu2 %v5369_v55  ;;  %957 = vmatpush.bf16.msra.mxu3 %v5371_v58  ;;  %v5381_v0 = vor.u32 %v4448_v61, %v3800_v27  ;;  %v3728_v27 = vld [vmem:[#allocation6 + $0x10] sm:$0xf]  ;;  %v5395_v16 = vor.u32 %v4436_v3, %v3770_v46  ;;  %v4427_v58 = vld [vmem:[#allocation6 + $0x14] sm:$0xf] }
  0xa2   :  { %v4431_v61 = vld [vmem:[#allocation6 + $0x2c] sm:$0xf0]  ;;  %v3730_v55 = vld [vmem:[#allocation6 + $0x30] sm:$0xf0] }
  0xa3   :  { %6487 = vst [vmem:[#allocation43_spill] sm:$0xff] %v5381_v0  ;;  %v6499_v46 = vld [vmem:[#allocation29_spill] sm:$0xff] }
  0xa4   :  { %918 = vmatpush.bf16.msra.mxu0 %v5363_v45  ;;  %v4440_v45 = vld [vmem:[#allocation6 + $0x74] sm:$0xf0]  ;;  %6492 = vst [vmem:[#allocation48_spill] sm:$0xff] %v5395_v16 }
  0xa5   :  { %945 = vmatpush.bf16.msra.mxu2 %v5381_v0  ;;  %958 = vmatpush.bf16.msra.mxu3 %v5383_v20  ;;  %v5393_v26 = vor.u32 %v4440_v45, %v3768_v6  ;;  %v5403_v6 = vor.u32 %v4427_v58, %v3730_v55  ;;  %v6500_v55 = vld [vmem:[#allocation30_spill] sm:$0xff]  ;;  %v6501_v58 = vld [vmem:[#allocation31_spill] sm:$0xff] }
  0xa7   :  { %6491 = vst [vmem:[#allocation47_spill] sm:$0xff] %v5393_v26 }
  0xa8   :  { %919 = vmatpush.bf16.msra.mxu0 %v5375_v12  ;;  %6494 = vst [vmem:[#allocation50_spill] sm:$0xff] %v5403_v6 }
  0xa9   :  { %946 = vmatpush.bf16.msra.mxu2 %v5393_v26  ;;  %959 = vmatpush.bf16.msra.mxu3 %v5395_v16 }
  0xae   :  { %3682 = vmatmul.msk.bf16.gmra.mxu0 %vm3681_vm1, %v6388_v56  ;;  %3690 = vmatmul.msk.bf16.gmra.mxu1 %vm3681_vm1, %v6388_v56 }
  0xaf   :  { %3698 = vmatmul.msk.bf16.gmra.mxu2 %vm3681_vm1, %v6388_v56  ;;  %3706 = vmatmul.msk.bf16.gmra.mxu3 %vm3681_vm1, %v6388_v56  ;;  %v4443_v56 = vld [vmem:[#allocation6 + $0x94] sm:$0xf] }
  0xb0   :  { %v5377_v13 = vor.u32 %v4443_v56, %v3794_v34  ;;  %v5387_v56 = vor.u32 %v4439_v29, %v3760_v15  ;;  %v5389_v34 = vor.u32 %v4435_v35, %v3762_v36  ;;  %v4432_v15 = vld [vmem:[#allocation6 + $0x34] sm:$0xf0]  ;;  %v4428_v29 = vld [vmem:[#allocation6 + $0x1c] sm:$0xf]  ;;  %v5401_v36 = vor.u32 %v4431_v61, %v3728_v27  ;;  %v6505_v61 = vld [vmem:[#allocation35_spill] sm:$0xff] }
  0xb1   :  { %v3738_v35 = vld [vmem:[#allocation6 + $0x38] sm:$0xf0]  ;;  %v5407_v3 = vor.u32 %v4432_v15, %v3736_v7  ;;  %v6498_v7 = vmov 0   ;;  %v6506_v15 = vld [vmem:[#allocation36_spill] sm:$0xff] }
  0xb2   :  { %6486 = vst [vmem:[#allocation42_spill] sm:$0xff] %v5377_v13  ;;  %932 = vmatpush.bf16.msra.mxu1 %v5377_v13  ;;  %920 = vmatpush.bf16.msra.mxu0 %v5387_v56  ;;  %v5409_v45 = vor.u32 %v4428_v29, %v3738_v35  ;;  %v6504_v27 = vld [vmem:[#allocation34_spill] sm:$0xff]  ;;  %v6507_v29 = vld [vmem:[#allocation37_spill] sm:$0xff] }
  0xb3   :  { %6489 = vst [vmem:[#allocation45_spill] sm:$0xff] %v5387_v56  ;;  %947 = vmatpush.bf16.msra.mxu2 %v5407_v3  ;;  %v6508_v35 = vld [vmem:[#allocation38_spill] sm:$0xff] }
  0xb4   :  { %6490 = vst [vmem:[#allocation46_spill] sm:$0xff] %v5389_v34  ;;  %960 = vmatpush.bf16.msra.mxu3 %v5409_v45 }
  0xb5   :  { %6493 = vst [vmem:[#allocation49_spill] sm:$0xff] %v5401_v36 }
  0xb6   :  { %933 = vmatpush.bf16.msra.mxu1 %v5389_v34  ;;  %6495 = vst [vmem:[#allocation51_spill] sm:$0xff] %v5407_v3  ;;  %921 = vmatpush.bf16.msra.mxu0 %v5401_v36 }
  0xb7   :  { %6496 = vst [vmem:[#allocation52_spill] sm:$0xff] %v5409_v45 }
  0xba   :  { %934 = vmatpush.bf16.msra.mxu1 %v5403_v6 }
  0xbe   :  { %3684 = vmatmul.msk.bf16.gmra.mxu0 %vm3683_vm4, %v6497_v50  ;;  %3692 = vmatmul.msk.bf16.gmra.mxu1 %vm3683_vm4, %v6497_v50 }
  0xbf   :  { %3700 = vmatmul.msk.bf16.gmra.mxu2 %vm3683_vm4, %v6497_v50  ;;  %3708 = vmatmul.msk.bf16.gmra.mxu3 %vm3683_vm4, %v6497_v50  ;;  %v6509_v50 = vld [vmem:[#allocation39_spill] sm:$0xff] }
  0xce   :  { %870 = vmatmul.bf16.vlgmr.msrb.gmra.mxu0 %v6498_v7  ;;  %883 = vmatmul.bf16.vlgmr.msrb.gmra.mxu1 %v6498_v7 }
  0xcf   :  { %896 = vmatmul.bf16.vlgmr.msrb.gmra.mxu2 %v6498_v7  ;;  %909 = vmatmul.bf16.vlgmr.msrb.gmra.mxu3 %v6498_v7 }
  0xd0   :  { %1065 = vmatpush.bf16.msrb.mxu0 %v5185_v5  ;;  %1078 = vmatpush.bf16.msrb.mxu1 %v5187_v9 }
  0xd1   :  { %1091 = vmatpush.bf16.msrb.mxu2 %v5203_v24  ;;  %1104 = vmatpush.bf16.msrb.mxu3 %v5189_v10 }
  0xd4   :  { %1066 = vmatpush.bf16.msrb.mxu0 %v5194_v14  ;;  %1079 = vmatpush.bf16.msrb.mxu1 %v5196_v19 }
  0xd5   :  { %1092 = vmatpush.bf16.msrb.mxu2 %v5215_v38  ;;  %1105 = vmatpush.bf16.msrb.mxu3 %v5198_v21 }
  0xd8   :  { %1067 = vmatpush.bf16.msrb.mxu0 %v5206_v28  ;;  %1080 = vmatpush.bf16.msrb.mxu1 %v5208_v32 }
  0xd9   :  { %1093 = vmatpush.bf16.msrb.mxu2 %v5222_v47  ;;  %1106 = vmatpush.bf16.msrb.mxu3 %v5210_v33 }
  0xdc   :  { %1068 = vmatpush.bf16.msrb.mxu0 %v5217_v42  ;;  %1081 = vmatpush.bf16.msrb.mxu1 %v5219_v43 }
  0xdd   :  { %1094 = vmatpush.bf16.msrb.mxu2 %v5235_v54  ;;  %1107 = vmatpush.bf16.msrb.mxu3 %v5226_v49 }
  0xde   :  { %922 = vmatmul.bf16.vlgmr.msra.gmra.mxu0 %v6498_v7  ;;  %935 = vmatmul.bf16.vlgmr.msra.gmra.mxu1 %v6498_v7 }
  0xdf   :  { %948 = vmatmul.bf16.vlgmr.msra.gmra.mxu2 %v6498_v7  ;;  %961 = vmatmul.bf16.vlgmr.msra.gmra.mxu3 %v6498_v7  ;;  %v6510_v7 = vld [vmem:[#allocation40_spill] sm:$0xff] }
  0xe0   :  { %1069 = vmatpush.bf16.msrb.mxu0 %v5241_v59  ;;  %1082 = vmatpush.bf16.msrb.mxu1 %v5244_v63 }
  0xe1   :  { %1095 = vmatpush.bf16.msrb.mxu2 %v5246_v1  ;;  %1108 = vmatpush.bf16.msrb.mxu3 %v5249_v4 }
  0xe4   :  { %1070 = vmatpush.bf16.msrb.mxu0 %v5254_v11  ;;  %1083 = vmatpush.bf16.msrb.mxu1 %v5256_v17 }
  0xe5   :  { %1096 = vmatpush.bf16.msrb.mxu2 %v5258_v18  ;;  %1109 = vmatpush.bf16.msrb.mxu3 %v5261_v25 }
  0xe8   :  { %1071 = vmatpush.bf16.msrb.mxu0 %v5264_v30  ;;  %1084 = vmatpush.bf16.msrb.mxu1 %v5268_v37 }
  0xe9   :  { %1097 = vmatpush.bf16.msrb.mxu2 %v5270_v39  ;;  %1110 = vmatpush.bf16.msrb.mxu3 %v5274_v44 }
  0xec   :  { %1072 = vmatpush.bf16.msrb.mxu0 %v5284_v51  ;;  %1085 = vmatpush.bf16.msrb.mxu1 %v5294_v57 }
  0xed   :  { %1098 = vmatpush.bf16.msrb.mxu2 %v5302_v62  ;;  %1111 = vmatpush.bf16.msrb.mxu3 %v5304_v2 }
  0xf0   :  { %1117 = vmatpush.bf16.msra.mxu0 %v5308_v8  ;;  %1130 = vmatpush.bf16.msra.mxu1 %v5312_v22 }
  0xf1   :  { %1143 = vmatpush.bf16.msra.mxu2 %v5314_v23  ;;  %1156 = vmatpush.bf16.msra.mxu3 %v5317_v31 }
  0xf4   :  { %1118 = vmatpush.bf16.msra.mxu0 %v5321_v40  ;;  %1131 = vmatpush.bf16.msra.mxu1 %v5323_v41 }
  0xf5   :  { %1144 = vmatpush.bf16.msra.mxu2 %v5326_v52  ;;  %1157 = vmatpush.bf16.msra.mxu3 %v5328_v60 }
  0xf8   :  { %1119 = vmatpush.bf16.msra.mxu0 %v6499_v46  ;;  %1132 = vmatpush.bf16.msra.mxu1 %v6500_v55 }
  0xf9   :  { %1145 = vmatpush.bf16.msra.mxu2 %v6501_v58  ;;  %1158 = vmatpush.bf16.msra.mxu3 %v6502_v48 }
  0xfc   :  { %1120 = vmatpush.bf16.msra.mxu0 %v6503_v53  ;;  %1133 = vmatpush.bf16.msra.mxu1 %v6504_v27 }
  0xfd   :  { %1146 = vmatpush.bf16.msra.mxu2 %v6505_v61  ;;  %1159 = vmatpush.bf16.msra.mxu3 %v6506_v15  ;;  %v6539_v61 = vld [vmem:[#allocation23_spill] sm:$0xff] }
 0x100   :  { %1121 = vmatpush.bf16.msra.mxu0 %v6507_v29  ;;  %1134 = vmatpush.bf16.msra.mxu1 %v6508_v35 }
 0x101   :  { %1147 = vmatpush.bf16.msra.mxu2 %v6509_v50  ;;  %1160 = vmatpush.bf16.msra.mxu3 %v6510_v7 }
 0x104   :  { %1122 = vmatpush.bf16.msra.mxu0 %v5375_v12  ;;  %1135 = vmatpush.bf16.msra.mxu1 %v5377_v13 }
 0x105   :  { %1148 = vmatpush.bf16.msra.mxu2 %v5381_v0  ;;  %1161 = vmatpush.bf16.msra.mxu3 %v5383_v20 }
 0x108   :  { %1123 = vmatpush.bf16.msra.mxu0 %v5387_v56  ;;  %1136 = vmatpush.bf16.msra.mxu1 %v5389_v34 }
 0x109   :  { %1149 = vmatpush.bf16.msra.mxu2 %v5393_v26  ;;  %1162 = vmatpush.bf16.msra.mxu3 %v5395_v16 }
 0x10b   :  { %v364_v7 = vpop.f32.mrf.mxu0  ;;  %v393_v12 = vpop.f32.mrf.mxu1 }
 0x10c   :  { %1124 = vmatpush.bf16.msra.mxu0 %v5401_v36  ;;  %1137 = vmatpush.bf16.msra.mxu1 %v5403_v6 }
 0x10d   :  { %1150 = vmatpush.bf16.msra.mxu2 %v5407_v3  ;;  %1163 = vmatpush.bf16.msra.mxu3 %v5409_v45 }
 0x112   :  { %v5491_v0 = vpop.f32.mrf.mxu2  ;;  %v451_v20 = vpop.f32.mrf.mxu3 }
 0x113   :  { %v5493_v56 = vpop.f32.mrf.mxu0  ;;  %v5495_v34 = vpop.f32.mrf.mxu1 }
 0x114   :  { %6511 = vst [vmem:[#allocation53_spill] sm:$0xff] %v5493_v56 }
 0x115   :  { %6512 = vst [vmem:[#allocation54_spill] sm:$0xff] %v5495_v34 }
 0x11a   :  { %v5497_v26 = vpop.f32.mrf.mxu2  ;;  %v5499_v16 = vpop.f32.mrf.mxu3 }
 0x11b   :  { %6513 = vst [vmem:[#allocation55_spill] sm:$0xff] %v5497_v26  ;;  %v5501_v36 = vpop.f32.mrf.mxu0  ;;  %v5503_v6 = vpop.f32.mrf.mxu1 }
 0x11c   :  { %6514 = vst [vmem:[#allocation56_spill] sm:$0xff] %v5499_v16 }
 0x11d   :  { %6515 = vst [vmem:[#allocation57_spill] sm:$0xff] %v5501_v36 }
 0x11e   :  { %6516 = vst [vmem:[#allocation58_spill] sm:$0xff] %v5503_v6 }
 0x122   :  { %v5505_v13 = vpop.f32.mrf.mxu2  ;;  %v5507_v3 = vpop.f32.mrf.mxu3 }
 0x123   :  { %6517 = vst [vmem:[#allocation59_spill] sm:$0xff] %v5505_v13  ;;  %v5509_v45 = vpop.f32.mrf.mxu0  ;;  %v5511_v50 = vpop.f32.mrf.mxu1 }
 0x124   :  { %6518 = vst [vmem:[#allocation60_spill] sm:$0xff] %v5507_v3 }
 0x125   :  { %6519 = vst [vmem:[#allocation61_spill] sm:$0xff] %v5509_v45 }
 0x126   :  { %6520 = vst [vmem:[#allocation62_spill] sm:$0xff] %v5511_v50 }
 0x12a   :  { %v5513_v35 = vpop.f32.mrf.mxu2  ;;  %v5515_v56 = vpop.f32.mrf.mxu3 }
 0x12b   :  { %6521 = vst [vmem:[#allocation63_spill] sm:$0xff] %v5513_v35  ;;  %v5517_v34 = vpop.f32.mrf.mxu0  ;;  %v5519_v26 = vpop.f32.mrf.mxu1 }
 0x12c   :  { %6522 = vst [vmem:[#allocation64_spill] sm:$0xff] %v5515_v56 }
 0x12d   :  { %6523 = vst [vmem:[#allocation65_spill] sm:$0xff] %v5517_v34 }
 0x12e   :  { %6524 = vst [vmem:[#allocation66_spill] sm:$0xff] %v5519_v26 }
 0x132   :  { %v5521_v16 = vpop.f32.mrf.mxu2  ;;  %v5523_v36 = vpop.f32.mrf.mxu3 }
 0x133   :  { %6525 = vst [vmem:[#allocation67_spill] sm:$0xff] %v5521_v16  ;;  %v5525_v6 = vpop.f32.mrf.mxu0  ;;  %v5527_v13 = vpop.f32.mrf.mxu1 }
 0x134   :  { %6526 = vst [vmem:[#allocation68_spill] sm:$0xff] %v5523_v36 }
 0x135   :  { %6527 = vst [vmem:[#allocation69_spill] sm:$0xff] %v5525_v6 }
 0x136   :  { %6528 = vst [vmem:[#allocation70_spill] sm:$0xff] %v5527_v13 }
 0x13a   :  { %v5529_v3 = vpop.f32.mrf.mxu2  ;;  %v5531_v45 = vpop.f32.mrf.mxu3 }
 0x13b   :  { %6529 = vst [vmem:[#allocation71_spill] sm:$0xff] %v5529_v3  ;;  %v5533_v50 = vpop.f32.mrf.mxu0  ;;  %v5535_v35 = vpop.f32.mrf.mxu1 }
 0x13c   :  { %6530 = vst [vmem:[#allocation72_spill] sm:$0xff] %v5531_v45 }
 0x13d   :  { %6531 = vst [vmem:[#allocation73_spill] sm:$0xff] %v5533_v50 }
 0x13e   :  { %6532 = vst [vmem:[#allocation74_spill] sm:$0xff] %v5535_v35 }
 0x142   :  { %v5537_v56 = vpop.f32.mrf.mxu2  ;;  %v5539_v34 = vpop.f32.mrf.mxu3 }
 0x143   :  { %6533 = vst [vmem:[#allocation75_spill] sm:$0xff] %v5537_v56  ;;  %v5541_v26 = vpop.f32.mrf.mxu0  ;;  %v5543_v16 = vpop.f32.mrf.mxu1 }
 0x144   :  { %6534 = vst [vmem:[#allocation76_spill] sm:$0xff] %v5539_v34  ;;  %v5552_v34 = vsub.f32 1.0, %v6539_v61 }
 0x145   :  { %6535 = vst [vmem:[#allocation77_spill] sm:$0xff] %v5541_v26 }
 0x146   :  { %6536 = vst [vmem:[#allocation78_spill] sm:$0xff] %v5543_v16 }
 0x147   :  { %6540 = vst [vmem:[#allocation81_spill] sm:$0xff] %v5552_v34 }
 0x14a   :  { %v5545_v36 = vpop.f32.mrf.mxu2  ;;  %v5547_v6 = vpop.f32.mrf.mxu3 }
 0x14b   :  { %6537 = vst [vmem:[#allocation79_spill] sm:$0xff] %v5545_v36  ;;  %v871_v13 = vpop.f32.mrf.mxu0  ;;  %v884_v3 = vpop.f32.mrf.mxu1 }
 0x14c   :  { %6538 = vst [vmem:[#allocation80_spill] sm:$0xff] %v5547_v6  ;;  %v966_v35 = vmul.f32 %v6539_v61, %v871_v13  ;;  %v967_v56 = vmul.f32 %v6539_v61, %v884_v3 }
 0x14e   :  { %v970_v36 = vadd.f32 %v966_v35, %v364_v7  ;;  %v971_v48 = vadd.f32 %v967_v56, %v393_v12 }
 0x152   :  { %v897_v29 = vpop.f32.mrf.mxu2  ;;  %v910_v45 = vpop.f32.mrf.mxu3 }
 0x153   :  { %v873_v15 = vpop.f32.mrf.mxu0  ;;  %v886_v50 = vpop.f32.mrf.mxu1 }
 0x154   :  { %v969_v50 = vmul.f32 %v6539_v61, %v910_v45 }
 0x156   :  { %v973_v52 = vadd.f32 %v969_v50, %v451_v20 }
 0x15a   :  { %v899_v26 = vpop.f32.mrf.mxu2  ;;  %v912_v27 = vpop.f32.mrf.mxu3 }
 0x15b   :  { %v923_v16 = vpop.f32.mrf.mxu0  ;;  %v936_v53 = vpop.f32.mrf.mxu1 }
 0x15c   :  { %v974_v6 = vmul.f32 %v923_v16, %v5552_v34  ;;  %v975_v58 = vmul.f32 %v936_v53, %v5552_v34 }
 0x15e   :  { %v978_v55 = vadd.f32 %v974_v6, %v970_v36  ;;  %v979_v15 = vadd.f32 %v975_v58, %v971_v48 }
 0x160   :  { %v3966_v13 = vmul.f32 -1.442695, %v978_v55  ;;  %v3967_v46 = vmul.f32 -1.442695, %v979_v15  ;;  %v968_v55 = vmul.f32 %v6539_v61, %v897_v29 }
 0x162   :  { %4598 = vpow2.f32 %v3966_v13  ;;  %v949_v3 = vpop.f32.mrf.mxu2  ;;  %v962_v60 = vpop.f32.mrf.mxu3 }
 0x163   :  { %4600 = vpow2.f32 %v3967_v46  ;;  %v977_v26 = vmul.f32 %v962_v60, %v5552_v34  ;;  %v925_v27 = vpop.f32.mrf.mxu0  ;;  %v938_v35 = vpop.f32.mrf.mxu1  ;;  %v976_v20 = vmul.f32 %v949_v3, %v5552_v34  ;;  %v972_v60 = vadd.f32 %v968_v55, %v5491_v0 }
 0x165   :  { %v981_v12 = vadd.f32 %v977_v26, %v973_v52  ;;  %v980_v52 = vadd.f32 %v976_v20, %v972_v60 }
 0x167   :  { %v3968_v56 = vmul.f32 -1.442695, %v981_v12 }
 0x168   :  { %v4599_v16 = vpop.eup %4598 }
 0x169   :  { %v4601_v7 = vpop.eup %4600  ;;  %v985_v53 = vadd.f32 1.0, %v4599_v16  ;;  %4602 = vpow2.f32 %v3968_v56 }
 0x16a   :  { %v1004_v36 = vadd.f32 1.0, %v4601_v7  ;;  %v964_v6 = vpop.f32.mrf.mxu3  ;;  %v951_v45 = vpop.f32.mrf.mxu2 }
 0x16b   :  { %4604 = vrcp.f32 %v985_v53  ;;  %v997_v35 = vand.u32 2147483648, %v985_v53  ;;  %v995_v56 = vand.u32 2147483647, %v985_v53  ;;  %vm991_vm7 = vweird.f32 %v985_v53 }
 0x16c   :  { %4606 = vrcp.f32 %v1004_v36  ;;  %v1016_v12 = vand.u32 2147483648, %v1004_v36  ;;  %v1014_v3 = vand.u32 2147483647, %v1004_v36  ;;  %vm1010_vm8 = vweird.f32 %v1004_v36 }
 0x16d   :  { %v998_v6 = vor.u32 1.1754944e-38, %v997_v35  ;;  %vm996_vm10 = vcmp.eq.f32.partialorder %v995_v56, 8.507059e+37 }
 0x16e   :  { %v1017_v20 = vor.u32 1.1754944e-38, %v1016_v12  ;;  %vm1015_vm12 = vcmp.eq.f32.partialorder %v1014_v3, 8.507059e+37 }
 0x16f   :  { %v4603_v46 = vpop.eup %4602 }
 0x170   :  { %v1024_v58 = vadd.f32 1.0, %v4603_v46 }
 0x171   :  { %v4605_v48 = vpop.eup %4604 }
 0x172   :  { %v4607_v15 = vpop.eup %4606  ;;  %v987_v50 = vmul.f32 %v4605_v48, %v985_v53  ;;  %4608 = vrcp.f32 %v1024_v58  ;;  %vm992_vm5 = vweird.f32 %v4605_v48  ;;  %vm1030_vm14 = vweird.f32 %v1024_v58 }
 0x173   :  { %v1006_v13 = vmul.f32 %v4607_v15, %v1004_v36  ;;  %4610 = vtanh.f32 %v980_v52  ;;  %vm1011_vm6 = vweird.f32 %v4607_v15  ;;  %vm993_vm9 = vmor %vm991_vm7, %vm992_vm5  ;;  %v1051_v36 = vpop.permute.xlu2 %1050  ;;  %v1034_v56 = vand.u32 2147483647, %v1024_v58 }
 0x174   :  { %v988_v26 = vsub.f32 1.0, %v987_v50  ;;  %vm1012_vm11 = vmor %vm1010_vm8, %vm1011_vm6 }
 0x175   :  { %v1007_v27 = vsub.f32 1.0, %v1006_v13  ;;  %vm1035_vm0 = vcmp.eq.f32.partialorder %v1034_v56, 8.507059e+37  ;;  %v6558_v56 = vld [vmem:[#allocation43_spill] sm:$0xff] }
 0x176   :  { %v989_v29 = vmul.f32 %v4605_v48, %v988_v26 }
 0x177   :  { %v1008_v16 = vmul.f32 %v4607_v15, %v1007_v27 }
 0x178   :  { %v4609_v7 = vpop.eup %4608  ;;  %v990_v0 = vadd.f32 %v4605_v48, %v989_v29  ;;  %v1058_v29 = vpop.permute.xlu0 %1057 }
 0x179   :  { %v1009_v45 = vadd.f32 %v4607_v15, %v1008_v16  ;;  %v1026_v55 = vmul.f32 %v4609_v7, %v1024_v58  ;;  %v4611_v60 = vpop.eup %4610  ;;  %vm1031_vm13 = vweird.f32 %v4609_v7  ;;  %v1060_v35 = vmul.f32 0.0, %v1058_v29  ;;  %v6552_v29 = vld [vmem:[#allocation37_spill] sm:$0xff] }
 0x17a   :  { %v994_v46 = vsel %vm993_vm9, %v4605_v48, %v990_v0  ;;  %v1036_v48 = vand.u32 2147483648, %v1024_v58  ;;  %vm1032_vm15 = vmor %vm1030_vm14, %vm1031_vm13  ;;  %v6542_v58 = vld [vmem:[#allocation27_spill] sm:$0xff] }
 0x17b   :  { %v999_v52 = vsel %vm996_vm10, %v998_v6, %v994_v46  ;;  %v1013_v50 = vsel %vm1012_vm11, %v4607_v15, %v1009_v45  ;;  %v1027_v13 = vsub.f32 1.0, %v1026_v55  ;;  %v6545_v46 = vld [vmem:[#allocation30_spill] sm:$0xff] }
 0x17c   :  { %v1018_v26 = vsel %vm1015_vm12, %v1017_v20, %v1013_v50  ;;  %v1041_v27 = vmul.f32 %v4611_v60, %v999_v52  ;;  %v1037_v3 = vor.u32 1.1754944e-38, %v1036_v48  ;;  %v6544_v20 = vld [vmem:[#allocation29_spill] sm:$0xff]  ;;  %v6546_v60 = vld [vmem:[#allocation31_spill] sm:$0xff]  ;;  %v6547_v52 = vld [vmem:[#allocation32_spill] sm:$0xff] }
 0x17d   :  { %v1040_v34 = vmul.f32 0.0, %v1018_v26  ;;  %v1028_v61 = vmul.f32 %v4609_v7, %v1027_v13  ;;  %v6548_v50 = vld [vmem:[#allocation33_spill] sm:$0xff]  ;;  %v6549_v13 = vld [vmem:[#allocation34_spill] sm:$0xff]  ;;  %v6550_v26 = vld [vmem:[#allocation35_spill] sm:$0xff] }
 0x17e   :  { %v6557_v48 = vld [vmem:[#allocation42_spill] sm:$0xff] }
 0x17f   :  { %v1042_v53 = vadd.f32 %v1041_v27, %v1040_v34  ;;  %v1029_v41 = vadd.f32 %v4609_v7, %v1028_v61  ;;  %v6551_v27 = vld [vmem:[#allocation36_spill] sm:$0xff] }
 0x181   :  { %4612 = vtanh.f32 %v1042_v53  ;;  %v1062_v12 = vmul.f32 %v1051_v36, %v1042_v53  ;;  %v1033_v15 = vsel %vm1032_vm15, %v4609_v7, %v1029_v41  ;;  %v6541_v41 = vld [vmem:[#allocation26_spill] sm:$0xff]  ;;  %v6543_v7 = vld [vmem:[#allocation28_spill] sm:$0xff] }
 0x182   :  { %v1038_v6 = vsel %vm1035_vm0, %v1037_v3, %v1033_v15  ;;  %v6553_v53 = vld [vmem:[#allocation38_spill] sm:$0xff]  ;;  %v6559_v15 = vld [vmem:[#allocation44_spill] sm:$0xff]  ;;  %v6560_v3 = vld [vmem:[#allocation45_spill] sm:$0xff] }
 0x183   :  { %v5561_v16 = vadd.f32 %v1062_v12, %v1060_v35  ;;  %v6556_v12 = vld [vmem:[#allocation41_spill] sm:$0xff] }
 0x187   :  { %v4613_v0 = vpop.eup %4612 }
 0x188   :  { %v1044_v45 = vmul.f32 %v4613_v0, %v1038_v6  ;;  %v6561_v0 = vld [vmem:[#allocation46_spill] sm:$0xff]  ;;  %v6562_v6 = vld [vmem:[#allocation47_spill] sm:$0xff] }
 0x18a   :  { %v1053_v55 = vmul.f32 %v1051_v36, %v1044_v45  ;;  %v6554_v36 = vld [vmem:[#allocation39_spill] sm:$0xff]  ;;  %v6563_v45 = vld [vmem:[#allocation48_spill] sm:$0xff] }
 0x18c   :  { %v5563_v34 = vadd.f32 %v1060_v35, %v1053_v55  ;;  %v6555_v35 = vld [vmem:[#allocation40_spill] sm:$0xff]  ;;  %v6564_v55 = vld [vmem:[#allocation49_spill] sm:$0xff] }
 0x18e   :  { %v1064_v61 = vpack.c.bf16 %v5563_v34, %v5563_v34 }
 0x190   :  { %1073 = vmatmul.bf16.vlgmr.msrb.gmra.mxu0 %v1064_v61  ;;  %1086 = vmatmul.bf16.vlgmr.msrb.gmra.mxu1 %v1064_v61 }
 0x191   :  { %1099 = vmatmul.bf16.vlgmr.msrb.gmra.mxu2 %v1064_v61  ;;  %1112 = vmatmul.bf16.vlgmr.msrb.gmra.mxu3 %v1064_v61 }
 0x192   :  { %1269 = vmatpush.bf16.msrb.mxu0 %v5185_v5  ;;  %1282 = vmatpush.bf16.msrb.mxu1 %v5187_v9 }
 0x193   :  { %1295 = vmatpush.bf16.msrb.mxu2 %v5203_v24  ;;  %1308 = vmatpush.bf16.msrb.mxu3 %v5189_v10 }
 0x196   :  { %1270 = vmatpush.bf16.msrb.mxu0 %v5194_v14  ;;  %1283 = vmatpush.bf16.msrb.mxu1 %v5196_v19 }
 0x197   :  { %1296 = vmatpush.bf16.msrb.mxu2 %v5215_v38  ;;  %1309 = vmatpush.bf16.msrb.mxu3 %v5198_v21 }
 0x19a   :  { %1271 = vmatpush.bf16.msrb.mxu0 %v5206_v28  ;;  %1284 = vmatpush.bf16.msrb.mxu1 %v5208_v32 }
 0x19b   :  { %1297 = vmatpush.bf16.msrb.mxu2 %v5222_v47  ;;  %1310 = vmatpush.bf16.msrb.mxu3 %v5210_v33 }
 0x19e   :  { %1272 = vmatpush.bf16.msrb.mxu0 %v5217_v42  ;;  %1285 = vmatpush.bf16.msrb.mxu1 %v5219_v43 }
 0x19f   :  { %1298 = vmatpush.bf16.msrb.mxu2 %v5235_v54  ;;  %1311 = vmatpush.bf16.msrb.mxu3 %v5226_v49 }
 0x1a0   :  { %1125 = vmatmul.bf16.vlgmr.msra.gmra.mxu0 %v1064_v61  ;;  %1138 = vmatmul.bf16.vlgmr.msra.gmra.mxu1 %v1064_v61 }
 0x1a1   :  { %1151 = vmatmul.bf16.vlgmr.msra.gmra.mxu2 %v1064_v61  ;;  %1164 = vmatmul.bf16.vlgmr.msra.gmra.mxu3 %v1064_v61  ;;  %v6565_v61 = vld [vmem:[#allocation50_spill] sm:$0xff] }
 0x1a2   :  { %1273 = vmatpush.bf16.msrb.mxu0 %v5241_v59  ;;  %1286 = vmatpush.bf16.msrb.mxu1 %v5244_v63 }
 0x1a3   :  { %1299 = vmatpush.bf16.msrb.mxu2 %v5246_v1  ;;  %1312 = vmatpush.bf16.msrb.mxu3 %v5249_v4 }
 0x1a6   :  { %1274 = vmatpush.bf16.msrb.mxu0 %v5254_v11  ;;  %1287 = vmatpush.bf16.msrb.mxu1 %v5256_v17 }
 0x1a7   :  { %1300 = vmatpush.bf16.msrb.mxu2 %v5258_v18  ;;  %1313 = vmatpush.bf16.msrb.mxu3 %v5261_v25 }
 0x1aa   :  { %1275 = vmatpush.bf16.msrb.mxu0 %v5264_v30  ;;  %1288 = vmatpush.bf16.msrb.mxu1 %v5268_v37 }
 0x1ab   :  { %1301 = vmatpush.bf16.msrb.mxu2 %v5270_v39  ;;  %1314 = vmatpush.bf16.msrb.mxu3 %v5274_v44 }
 0x1ae   :  { %1276 = vmatpush.bf16.msrb.mxu0 %v5284_v51  ;;  %1289 = vmatpush.bf16.msrb.mxu1 %v5294_v57 }
 0x1af   :  { %1302 = vmatpush.bf16.msrb.mxu2 %v5302_v62  ;;  %1315 = vmatpush.bf16.msrb.mxu3 %v5304_v2 }
 0x1b2   :  { %1321 = vmatpush.bf16.msra.mxu0 %v5308_v8  ;;  %1334 = vmatpush.bf16.msra.mxu1 %v5312_v22 }
 0x1b3   :  { %1347 = vmatpush.bf16.msra.mxu2 %v5314_v23  ;;  %1360 = vmatpush.bf16.msra.mxu3 %v5317_v31 }
 0x1b6   :  { %1322 = vmatpush.bf16.msra.mxu0 %v5321_v40  ;;  %1335 = vmatpush.bf16.msra.mxu1 %v6541_v41 }
 0x1b7   :  { %1348 = vmatpush.bf16.msra.mxu2 %v6542_v58  ;;  %1361 = vmatpush.bf16.msra.mxu3 %v6543_v7 }
 0x1ba   :  { %1323 = vmatpush.bf16.msra.mxu0 %v6544_v20  ;;  %1336 = vmatpush.bf16.msra.mxu1 %v6545_v46 }
 0x1bb   :  { %1349 = vmatpush.bf16.msra.mxu2 %v6546_v60  ;;  %1362 = vmatpush.bf16.msra.mxu3 %v6547_v52  ;;  %v6571_v52 = vld [vmem:[#allocation81_spill] sm:$0xff] }
 0x1be   :  { %1324 = vmatpush.bf16.msra.mxu0 %v6548_v50  ;;  %1337 = vmatpush.bf16.msra.mxu1 %v6549_v13  ;;  %v6569_v13 = vld [vmem:[#allocation53_spill] sm:$0xff]  ;;  %v6570_v50 = vld [vmem:[#allocation54_spill] sm:$0xff] }
 0x1bf   :  { %1350 = vmatpush.bf16.msra.mxu2 %v6550_v26  ;;  %1363 = vmatpush.bf16.msra.mxu3 %v6551_v27 }
 0x1c2   :  { %1325 = vmatpush.bf16.msra.mxu0 %v6552_v29  ;;  %1338 = vmatpush.bf16.msra.mxu1 %v6553_v53  ;;  %v6568_v29 = vld [vmem:[#allocation23_spill] sm:$0xff] }
 0x1c3   :  { %1351 = vmatpush.bf16.msra.mxu2 %v6554_v36  ;;  %1364 = vmatpush.bf16.msra.mxu3 %v6555_v35  ;;  %v6566_v35 = vld [vmem:[#allocation51_spill] sm:$0xff] }
 0x1c6   :  { %1326 = vmatpush.bf16.msra.mxu0 %v6556_v12  ;;  %1339 = vmatpush.bf16.msra.mxu1 %v6557_v48  ;;  %v6567_v12 = vld [vmem:[#allocation52_spill] sm:$0xff] }
 0x1c7   :  { %1352 = vmatpush.bf16.msra.mxu2 %v6558_v56  ;;  %1365 = vmatpush.bf16.msra.mxu3 %v6559_v15 }
 0x1ca   :  { %1327 = vmatpush.bf16.msra.mxu0 %v6560_v3  ;;  %1340 = vmatpush.bf16.msra.mxu1 %v6561_v0 }
 0x1cb   :  { %1353 = vmatpush.bf16.msra.mxu2 %v6562_v6  ;;  %1366 = vmatpush.bf16.msra.mxu3 %v6563_v45 }
 0x1ce   :  { %1328 = vmatpush.bf16.msra.mxu0 %v6564_v55  ;;  %1341 = vmatpush.bf16.msra.mxu1 %v6565_v61 }
 0x1cf   :  { %1354 = vmatpush.bf16.msra.mxu2 %v6566_v35  ;;  %1367 = vmatpush.bf16.msra.mxu3 %v6567_v12 }
 0x20d   :  { %v1074_v48 = vpop.f32.mrf.mxu0  ;;  %v1087_v56 = vpop.f32.mrf.mxu1 }
 0x20e   :  { %v1169_v0 = vmul.f32 %v6568_v29, %v1074_v48  ;;  %v1170_v6 = vmul.f32 %v6568_v29, %v1087_v56 }
 0x210   :  { %v1173_v61 = vadd.f32 %v1169_v0, %v6569_v13  ;;  %v1174_v35 = vadd.f32 %v1170_v6, %v6570_v50 }
 0x214   :  { %v1100_v36 = vpop.f32.mrf.mxu2  ;;  %v1113_v15 = vpop.f32.mrf.mxu3 }
 0x215   :  { %v1076_v53 = vpop.f32.mrf.mxu0  ;;  %v1089_v3 = vpop.f32.mrf.mxu1 }
 0x216   :  { %v1172_v53 = vmul.f32 %v6568_v29, %v1113_v15 }
 0x21c   :  { %v1102_v27 = vpop.f32.mrf.mxu2  ;;  %v1115_v45 = vpop.f32.mrf.mxu3 }
 0x21d   :  { %v1126_v26 = vpop.f32.mrf.mxu0  ;;  %v1139_v55 = vpop.f32.mrf.mxu1  ;;  %v6572_v45 = vld [vmem:[#allocation56_spill] sm:$0xff] }
 0x21e   :  { %v1177_v12 = vmul.f32 %v1126_v26, %v6571_v52  ;;  %v1178_v60 = vmul.f32 %v1139_v55, %v6571_v52  ;;  %v1176_v7 = vadd.f32 %v1172_v53, %v6572_v45  ;;  %v6573_v53 = vld [vmem:[#allocation55_spill] sm:$0xff] }
 0x220   :  { %v1181_v46 = vadd.f32 %v1177_v12, %v1173_v61  ;;  %v1182_v20 = vadd.f32 %v1178_v60, %v1174_v35 }
 0x222   :  { %v3970_v3 = vmul.f32 -1.442695, %v1181_v46  ;;  %v3971_v48 = vmul.f32 -1.442695, %v1182_v20  ;;  %v1171_v20 = vmul.f32 %v6568_v29, %v1100_v36 }
 0x224   :  { %4614 = vpow2.f32 %v3970_v3  ;;  %v1152_v56 = vpop.f32.mrf.mxu2  ;;  %v1165_v27 = vpop.f32.mrf.mxu3  ;;  %v1175_v3 = vadd.f32 %v1171_v20, %v6573_v53 }
 0x225   :  { %4616 = vpow2.f32 %v3971_v48  ;;  %v1180_v13 = vmul.f32 %v1165_v27, %v6571_v52  ;;  %v1128_v0 = vpop.f32.mrf.mxu0  ;;  %v1141_v50 = vpop.f32.mrf.mxu1  ;;  %v1179_v15 = vmul.f32 %v1152_v56, %v6571_v52 }
 0x227   :  { %v1184_v6 = vadd.f32 %v1180_v13, %v1176_v7  ;;  %v1183_v7 = vadd.f32 %v1179_v15, %v1175_v3 }
 0x229   :  { %v3972_v26 = vmul.f32 -1.442695, %v1184_v6 }
 0x22a   :  { %v4615_v58 = vpop.eup %4614 }
 0x22b   :  { %v4617_v55 = vpop.eup %4616  ;;  %v1188_v12 = vadd.f32 1.0, %v4615_v58  ;;  %4618 = vpow2.f32 %v3972_v26 }
 0x22c   :  { %v1207_v60 = vadd.f32 1.0, %v4617_v55  ;;  %v1154_v35 = vpop.f32.mrf.mxu2  ;;  %v1167_v46 = vpop.f32.mrf.mxu3 }
 0x22d   :  { %4620 = vrcp.f32 %v1188_v12  ;;  %v1200_v6 = vand.u32 2147483648, %v1188_v12  ;;  %v1198_v55 = vand.u32 2147483647, %v1188_v12  ;;  %vm1194_vm3 = vweird.f32 %v1188_v12 }
 0x22e   :  { %4622 = vrcp.f32 %v1207_v60  ;;  %v1219_v26 = vand.u32 2147483648, %v1207_v60  ;;  %v1217_v56 = vand.u32 2147483647, %v1207_v60  ;;  %vm1213_vm4 = vweird.f32 %v1207_v60 }
 0x22f   :  { %v1201_v15 = vor.u32 1.1754944e-38, %v1200_v6  ;;  %vm1199_vm7 = vcmp.eq.f32.partialorder %v1198_v55, 8.507059e+37 }
 0x230   :  { %v1220_v3 = vor.u32 1.1754944e-38, %v1219_v26  ;;  %vm1218_vm8 = vcmp.eq.f32.partialorder %v1217_v56, 8.507059e+37 }
 0x231   :  { %v4619_v61 = vpop.eup %4618 }
 0x232   :  { %v1227_v48 = vadd.f32 1.0, %v4619_v61 }
 0x233   :  { %v4621_v27 = vpop.eup %4620 }
 0x234   :  { %v4623_v45 = vpop.eup %4622  ;;  %v1190_v13 = vmul.f32 %v4621_v27, %v1188_v12  ;;  %4624 = vrcp.f32 %v1227_v48  ;;  %vm1195_vm1 = vweird.f32 %v4621_v27  ;;  %v1239_v6 = vand.u32 2147483648, %v1227_v48 }
 0x235   :  { %v1209_v58 = vmul.f32 %v4623_v45, %v1207_v60  ;;  %4626 = vtanh.f32 %v1183_v7  ;;  %vm1214_vm2 = vweird.f32 %v4623_v45  ;;  %vm1196_vm5 = vmor %vm1194_vm3, %vm1195_vm1  ;;  %vm1233_vm10 = vweird.f32 %v1227_v48 }
 0x236   :  { %v1191_v0 = vsub.f32 1.0, %v1190_v13  ;;  %vm1215_vm6 = vmor %vm1213_vm4, %vm1214_vm2  ;;  %v1240_v55 = vor.u32 1.1754944e-38, %v1239_v6  ;;  %v6586_v6 = vld [vmem:[#allocation38_spill] sm:$0xff] }
 0x237   :  { %v1210_v50 = vsub.f32 1.0, %v1209_v58 }
 0x238   :  { %v1192_v36 = vmul.f32 %v4621_v27, %v1191_v0 }
 0x239   :  { %v1211_v35 = vmul.f32 %v4623_v45, %v1210_v50 }
 0x23a   :  { %v4625_v46 = vpop.eup %4624  ;;  %v1193_v20 = vadd.f32 %v4621_v27, %v1192_v36 }
 0x23b   :  { %v1212_v61 = vadd.f32 %v4623_v45, %v1211_v35  ;;  %v1229_v53 = vmul.f32 %v4625_v46, %v1227_v48  ;;  %v4627_v7 = vpop.eup %4626  ;;  %vm1234_vm9 = vweird.f32 %v4625_v46 }
 0x23c   :  { %v1197_v13 = vsel %vm1196_vm5, %v4621_v27, %v1193_v20  ;;  %v1237_v27 = vand.u32 2147483647, %v1227_v48  ;;  %vm1235_vm11 = vmor %vm1233_vm10, %vm1234_vm9  ;;  %v5647_v20 = vpop.permute.xlu2 %1260 }
 0x23d   :  { %v1202_v58 = vsel %vm1199_vm7, %v1201_v15, %v1197_v13  ;;  %v1216_v0 = vsel %vm1215_vm6, %v4623_v45, %v1212_v61  ;;  %v1230_v52 = vsub.f32 1.0, %v1229_v53  ;;  %v5649_v15 = vpop.permute.xlu1 %1253  ;;  %v6576_v61 = vld [vmem:[#allocation28_spill] sm:$0xff]  ;;  %v6577_v53 = vld [vmem:[#allocation29_spill] sm:$0xff]  ;;  %v6579_v13 = vld [vmem:[#allocation31_spill] sm:$0xff] }
 0x23e   :  { %v1221_v50 = vsel %vm1218_vm8, %v1220_v3, %v1216_v0  ;;  %v1244_v29 = vmul.f32 %v4627_v7, %v1202_v58  ;;  %vm1238_vm12 = vcmp.eq.f32.partialorder %v1237_v27, 8.507059e+37  ;;  %v6578_v3 = vld [vmem:[#allocation30_spill] sm:$0xff]  ;;  %v6580_v7 = vld [vmem:[#allocation32_spill] sm:$0xff]  ;;  %v6581_v58 = vld [vmem:[#allocation33_spill] sm:$0xff] }
 0x23f   :  { %v1243_v41 = vmul.f32 %v1221_v50, %v5561_v16  ;;  %v1231_v36 = vmul.f32 %v4625_v46, %v1230_v52  ;;  %v1263_v52 = vmul.f32 %v5647_v20, %v5563_v34  ;;  %v6574_v34 = vld [vmem:[#allocation26_spill] sm:$0xff]  ;;  %v6583_v50 = vld [vmem:[#allocation35_spill] sm:$0xff] }
 0x240   :  { %v6582_v0 = vld [vmem:[#allocation34_spill] sm:$0xff]  ;;  %v6587_v27 = vld [vmem:[#allocation39_spill] sm:$0xff] }
 0x241   :  { %v5644_v12 = vadd.f32 %v1244_v29, %v1243_v41  ;;  %v1232_v60 = vadd.f32 %v4625_v46, %v1231_v36  ;;  %v6584_v36 = vld [vmem:[#allocation36_spill] sm:$0xff] }
 0x243   :  { %4628 = vtanh.f32 %v5644_v12  ;;  %v1236_v26 = vsel %vm1235_vm11, %v4625_v46, %v1232_v60  ;;  %v6575_v46 = vld [vmem:[#allocation27_spill] sm:$0xff]  ;;  %v6585_v60 = vld [vmem:[#allocation37_spill] sm:$0xff] }
 0x244   :  { %v1241_v35 = vsel %vm1238_vm12, %v1240_v55, %v1236_v26  ;;  %v6588_v26 = vld [vmem:[#allocation40_spill] sm:$0xff]  ;;  %v6589_v55 = vld [vmem:[#allocation41_spill] sm:$0xff] }
 0x249   :  { %v4629_v45 = vpop.eup %4628 }
 0x24a   :  { %v1247_v56 = vmul.f32 %v4629_v45, %v1241_v35  ;;  %v6590_v45 = vld [vmem:[#allocation42_spill] sm:$0xff]  ;;  %v6591_v35 = vld [vmem:[#allocation43_spill] sm:$0xff] }
 0x24c   :  { %v1256_v41 = vmul.f32 %v5649_v15, %v1247_v56  ;;  %v6592_v56 = vld [vmem:[#allocation44_spill] sm:$0xff] }
 0x24e   :  { %v5654_v29 = vadd.f32 %v1263_v52, %v1256_v41  ;;  %v6593_v41 = vld [vmem:[#allocation45_spill] sm:$0xff]  ;;  %v6594_v52 = vld [vmem:[#allocation46_spill] sm:$0xff] }
 0x250   :  { %v1268_v48 = vpack.c.bf16 %v5654_v29, %v5654_v29 }
 0x252   :  { %1277 = vmatmul.bf16.vlgmr.msrb.gmra.mxu0 %v1268_v48  ;;  %1290 = vmatmul.bf16.vlgmr.msrb.gmra.mxu1 %v1268_v48 }
 0x253   :  { %1303 = vmatmul.bf16.vlgmr.msrb.gmra.mxu2 %v1268_v48  ;;  %1316 = vmatmul.bf16.vlgmr.msrb.gmra.mxu3 %v1268_v48 }
 0x254   :  { %1473 = vmatpush.bf16.msrb.mxu0 %v5185_v5  ;;  %1486 = vmatpush.bf16.msrb.mxu1 %v5187_v9 }
 0x255   :  { %1499 = vmatpush.bf16.msrb.mxu2 %v5203_v24  ;;  %1512 = vmatpush.bf16.msrb.mxu3 %v5189_v10 }
 0x258   :  { %1474 = vmatpush.bf16.msrb.mxu0 %v5194_v14  ;;  %1487 = vmatpush.bf16.msrb.mxu1 %v5196_v19 }
 0x259   :  { %1500 = vmatpush.bf16.msrb.mxu2 %v5215_v38  ;;  %1513 = vmatpush.bf16.msrb.mxu3 %v5198_v21 }
 0x25c   :  { %1475 = vmatpush.bf16.msrb.mxu0 %v5206_v28  ;;  %1488 = vmatpush.bf16.msrb.mxu1 %v5208_v32 }
 0x25d   :  { %1501 = vmatpush.bf16.msrb.mxu2 %v5222_v47  ;;  %1514 = vmatpush.bf16.msrb.mxu3 %v5210_v33 }
 0x260   :  { %1476 = vmatpush.bf16.msrb.mxu0 %v5217_v42  ;;  %1489 = vmatpush.bf16.msrb.mxu1 %v5219_v43 }
 0x261   :  { %1502 = vmatpush.bf16.msrb.mxu2 %v5235_v54  ;;  %1515 = vmatpush.bf16.msrb.mxu3 %v5226_v49 }
 0x262   :  { %1329 = vmatmul.bf16.vlgmr.msra.gmra.mxu0 %v1268_v48  ;;  %1342 = vmatmul.bf16.vlgmr.msra.gmra.mxu1 %v1268_v48 }
 0x263   :  { %1355 = vmatmul.bf16.vlgmr.msra.gmra.mxu2 %v1268_v48  ;;  %1368 = vmatmul.bf16.vlgmr.msra.gmra.mxu3 %v1268_v48  ;;  %v6595_v48 = vld [vmem:[#allocation47_spill] sm:$0xff] }
 0x264   :  { %1477 = vmatpush.bf16.msrb.mxu0 %v5241_v59  ;;  %1490 = vmatpush.bf16.msrb.mxu1 %v5244_v63 }
 0x265   :  { %1503 = vmatpush.bf16.msrb.mxu2 %v5246_v1  ;;  %1516 = vmatpush.bf16.msrb.mxu3 %v5249_v4 }
 0x268   :  { %1478 = vmatpush.bf16.msrb.mxu0 %v5254_v11  ;;  %1491 = vmatpush.bf16.msrb.mxu1 %v5256_v17 }
 0x269   :  { %1504 = vmatpush.bf16.msrb.mxu2 %v5258_v18  ;;  %1517 = vmatpush.bf16.msrb.mxu3 %v5261_v25 }
 0x26c   :  { %1479 = vmatpush.bf16.msrb.mxu0 %v5264_v30  ;;  %1492 = vmatpush.bf16.msrb.mxu1 %v5268_v37 }
 0x26d   :  { %1505 = vmatpush.bf16.msrb.mxu2 %v5270_v39  ;;  %1518 = vmatpush.bf16.msrb.mxu3 %v5274_v44 }
 0x270   :  { %1480 = vmatpush.bf16.msrb.mxu0 %v5284_v51  ;;  %1493 = vmatpush.bf16.msrb.mxu1 %v5294_v57 }
 0x271   :  { %1506 = vmatpush.bf16.msrb.mxu2 %v5302_v62  ;;  %1519 = vmatpush.bf16.msrb.mxu3 %v5304_v2 }
 0x274   :  { %1525 = vmatpush.bf16.msra.mxu0 %v5308_v8  ;;  %1538 = vmatpush.bf16.msra.mxu1 %v5312_v22 }
 0x275   :  { %1551 = vmatpush.bf16.msra.mxu2 %v5314_v23  ;;  %1564 = vmatpush.bf16.msra.mxu3 %v5317_v31 }
 0x278   :  { %1526 = vmatpush.bf16.msra.mxu0 %v5321_v40  ;;  %1539 = vmatpush.bf16.msra.mxu1 %v6574_v34 }
 0x279   :  { %1552 = vmatpush.bf16.msra.mxu2 %v6575_v46  ;;  %1565 = vmatpush.bf16.msra.mxu3 %v6576_v61 }
 0x27c   :  { %1527 = vmatpush.bf16.msra.mxu0 %v6577_v53  ;;  %1540 = vmatpush.bf16.msra.mxu1 %v6578_v3  ;;  %v6603_v3 = vld [vmem:[#allocation58_spill] sm:$0xff]  ;;  %v6604_v53 = vld [vmem:[#allocation81_spill] sm:$0xff] }
 0x27d   :  { %1553 = vmatpush.bf16.msra.mxu2 %v6579_v13  ;;  %1566 = vmatpush.bf16.msra.mxu3 %v6580_v7  ;;  %v6602_v13 = vld [vmem:[#allocation57_spill] sm:$0xff] }
 0x280   :  { %1528 = vmatpush.bf16.msra.mxu0 %v6581_v58  ;;  %1541 = vmatpush.bf16.msra.mxu1 %v6582_v0  ;;  %v6601_v0 = vld [vmem:[#allocation23_spill] sm:$0xff] }
 0x281   :  { %1554 = vmatpush.bf16.msra.mxu2 %v6583_v50  ;;  %1567 = vmatpush.bf16.msra.mxu3 %v6584_v36 }
 0x284   :  { %1529 = vmatpush.bf16.msra.mxu0 %v6585_v60  ;;  %1542 = vmatpush.bf16.msra.mxu1 %v6586_v6  ;;  %v6596_v60 = vld [vmem:[#allocation48_spill] sm:$0xff]  ;;  %v6597_v6 = vld [vmem:[#allocation49_spill] sm:$0xff] }
 0x285   :  { %1555 = vmatpush.bf16.msra.mxu2 %v6587_v27  ;;  %1568 = vmatpush.bf16.msra.mxu3 %v6588_v26  ;;  %v6598_v27 = vld [vmem:[#allocation50_spill] sm:$0xff]  ;;  %v6599_v26 = vld [vmem:[#allocation51_spill] sm:$0xff] }
 0x288   :  { %1530 = vmatpush.bf16.msra.mxu0 %v6589_v55  ;;  %1543 = vmatpush.bf16.msra.mxu1 %v6590_v45  ;;  %v6600_v55 = vld [vmem:[#allocation52_spill] sm:$0xff] }
 0x289   :  { %1556 = vmatpush.bf16.msra.mxu2 %v6591_v35  ;;  %1569 = vmatpush.bf16.msra.mxu3 %v6592_v56 }
 0x28c   :  { %1531 = vmatpush.bf16.msra.mxu0 %v6593_v41  ;;  %1544 = vmatpush.bf16.msra.mxu1 %v6594_v52 }
 0x28d   :  { %1557 = vmatpush.bf16.msra.mxu2 %v6595_v48  ;;  %1570 = vmatpush.bf16.msra.mxu3 %v6596_v60 }
 0x290   :  { %1532 = vmatpush.bf16.msra.mxu0 %v6597_v6  ;;  %1545 = vmatpush.bf16.msra.mxu1 %v6598_v27 }
 0x291   :  { %1558 = vmatpush.bf16.msra.mxu2 %v6599_v26  ;;  %1571 = vmatpush.bf16.msra.mxu3 %v6600_v55 }
 0x2cf   :  { %v1278_v45 = vpop.f32.mrf.mxu0  ;;  %v1291_v35 = vpop.f32.mrf.mxu1 }
 0x2d0   :  { %v1373_v52 = vmul.f32 %v6601_v0, %v1278_v45  ;;  %v1374_v48 = vmul.f32 %v6601_v0, %v1291_v35 }
 0x2d2   :  { %v1377_v27 = vadd.f32 %v1373_v52, %v6602_v13  ;;  %v1378_v26 = vadd.f32 %v1374_v48, %v6603_v3 }
 0x2d6   :  { %v1304_v36 = vpop.f32.mrf.mxu2  ;;  %v1317_v56 = vpop.f32.mrf.mxu3 }
 0x2d7   :  { %v1280_v50 = vpop.f32.mrf.mxu0  ;;  %v1293_v41 = vpop.f32.mrf.mxu1 }
 0x2d8   :  { %v1376_v50 = vmul.f32 %v6601_v0, %v1317_v56 }
 0x2de   :  { %v1306_v58 = vpop.f32.mrf.mxu2  ;;  %v1319_v60 = vpop.f32.mrf.mxu3 }
 0x2df   :  { %v1330_v7 = vpop.f32.mrf.mxu0  ;;  %v1343_v6 = vpop.f32.mrf.mxu1  ;;  %v6605_v60 = vld [vmem:[#allocation60_spill] sm:$0xff] }
 0x2e0   :  { %v1381_v55 = vmul.f32 %v1330_v7, %v6604_v53  ;;  %v1382_v61 = vmul.f32 %v1343_v6, %v6604_v53  ;;  %v1380_v40 = vadd.f32 %v1376_v50, %v6605_v60  ;;  %v6606_v50 = vld [vmem:[#allocation59_spill] sm:$0xff] }
 0x2e2   :  { %v1385_v46 = vadd.f32 %v1381_v55, %v1377_v27  ;;  %v1386_v34 = vadd.f32 %v1382_v61, %v1378_v26 }
 0x2e4   :  { %v3974_v41 = vmul.f32 -1.442695, %v1385_v46  ;;  %v3975_v45 = vmul.f32 -1.442695, %v1386_v34  ;;  %v1375_v34 = vmul.f32 %v6601_v0, %v1304_v36 }
 0x2e6   :  { %4630 = vpow2.f32 %v3974_v41  ;;  %v1356_v35 = vpop.f32.mrf.mxu2  ;;  %v1369_v58 = vpop.f32.mrf.mxu3  ;;  %v1379_v41 = vadd.f32 %v1375_v34, %v6606_v50 }
 0x2e7   :  { %4632 = vpow2.f32 %v3975_v45  ;;  %v1384_v13 = vmul.f32 %v1369_v58, %v6604_v53  ;;  %v1332_v52 = vpop.f32.mrf.mxu0  ;;  %v1345_v3 = vpop.f32.mrf.mxu1  ;;  %v1383_v55 = vmul.f32 %v1356_v35, %v6604_v53 }
 0x2e8   :  { %v1265_v3 = vmul.f32 %v5649_v15, %v5644_v12 }
 0x2e9   :  { %v1388_v48 = vadd.f32 %v1384_v13, %v1380_v40  ;;  %v1387_v40 = vadd.f32 %v1383_v55, %v1379_v41  ;;  %v1266_v55 = vmul.f32 %v5647_v20, %v5561_v16 }
 0x2eb   :  { %v3976_v7 = vmul.f32 -1.442695, %v1388_v48 }
 0x2ec   :  { %v4631_v31 = vpop.eup %4630 }
 0x2ed   :  { %v4633_v6 = vpop.eup %4632  ;;  %v1392_v27 = vadd.f32 1.0, %v4631_v31  ;;  %4634 = vpow2.f32 %v3976_v7 }
 0x2ee   :  { %v1411_v61 = vadd.f32 1.0, %v4633_v6  ;;  %v1358_v26 = vpop.f32.mrf.mxu2  ;;  %v1371_v46 = vpop.f32.mrf.mxu3 }
 0x2ef   :  { %4636 = vrcp.f32 %v1392_v27  ;;  %v1404_v36 = vand.u32 2147483648, %v1392_v27  ;;  %v1402_v35 = vand.u32 2147483647, %v1392_v27  ;;  %vm1398_vm15 = vweird.f32 %v1392_v27 }
 0x2f0   :  { %4638 = vrcp.f32 %v1411_v61  ;;  %v1423_v7 = vand.u32 2147483648, %v1411_v61  ;;  %v1421_v46 = vand.u32 2147483647, %v1411_v61  ;;  %vm1417_vm0 = vweird.f32 %v1411_v61 }
 0x2f1   :  { %v1405_v50 = vor.u32 1.1754944e-38, %v1404_v36  ;;  %vm1403_vm3 = vcmp.eq.f32.partialorder %v1402_v35, 8.507059e+37 }
 0x2f2   :  { %v1424_v41 = vor.u32 1.1754944e-38, %v1423_v7  ;;  %vm1422_vm4 = vcmp.eq.f32.partialorder %v1421_v46, 8.507059e+37  ;;  %v5744_v46 = vpop.permute.xlu1 %1464 }
 0x2f3   :  { %v4635_v56 = vpop.eup %4634 }
 0x2f4   :  { %v1431_v45 = vadd.f32 1.0, %v4635_v56 }
 0x2f5   :  { %v4637_v58 = vpop.eup %4636 }
 0x2f6   :  { %v4639_v60 = vpop.eup %4638  ;;  %v1394_v13 = vmul.f32 %v4637_v58, %v1392_v27  ;;  %4640 = vrcp.f32 %v1431_v45  ;;  %vm1399_vm13 = vweird.f32 %v4637_v58  ;;  %vm1437_vm6 = vweird.f32 %v1431_v45 }
 0x2f7   :  { %v1413_v31 = vmul.f32 %v4639_v60, %v1411_v61  ;;  %4642 = vtanh.f32 %v1387_v40  ;;  %vm1418_vm14 = vweird.f32 %v4639_v60  ;;  %vm1400_vm1 = vmor %vm1398_vm15, %vm1399_vm13  ;;  %v5738_v40 = vadd.f32 %v1266_v55, %v1265_v3 }
 0x2f8   :  { %v1395_v52 = vsub.f32 1.0, %v1394_v13  ;;  %vm1419_vm2 = vmor %vm1417_vm0, %vm1418_vm14  ;;  %v1443_v3 = vand.u32 2147483648, %v1431_v45  ;;  %v1467_v55 = vmul.f32 %v5744_v46, %v5654_v29  ;;  %v6607_v29 = vld [vmem:[#allocation24_spill] sm:$0xff] }
 0x2f9   :  { %v1414_v48 = vsub.f32 1.0, %v1413_v31 }
 0x2fa   :  { %v1396_v6 = vmul.f32 %v4637_v58, %v1395_v52 }
 0x2fb   :  { %v1415_v26 = vmul.f32 %v4639_v60, %v1414_v48 }
 0x2fc   :  { %v4641_v34 = vpop.eup %4640  ;;  %v1397_v56 = vadd.f32 %v4637_v58, %v1396_v6  ;;  %v1444_v6 = vor.u32 1.1754944e-38, %v1443_v3  ;;  %v6621_v3 = vld [vmem:[#allocation38_spill] sm:$0xff] }
 0x2fd   :  { %v1416_v12 = vadd.f32 %v4639_v60, %v1415_v26  ;;  %v1433_v15 = vmul.f32 %v4641_v34, %v1431_v45  ;;  %v4643_v31 = vpop.eup %4642  ;;  %vm1438_vm5 = vweird.f32 %v4641_v34 }
 0x2fe   :  { %v1401_v13 = vsel %vm1400_vm1, %v4637_v58, %v1397_v56  ;;  %v1441_v58 = vand.u32 2147483647, %v1431_v45  ;;  %vm1439_vm7 = vmor %vm1437_vm6, %vm1438_vm5 }
 0x2ff   :  { %v1406_v52 = vsel %vm1403_vm3, %v1405_v50, %v1401_v13  ;;  %v1420_v48 = vsel %vm1419_vm2, %v4639_v60, %v1416_v12  ;;  %v1434_v53 = vsub.f32 1.0, %v1433_v15  ;;  %v6609_v50 = vld [vmem:[#allocation26_spill] sm:$0xff]  ;;  %v6610_v12 = vld [vmem:[#allocation27_spill] sm:$0xff]  ;;  %v6611_v15 = vld [vmem:[#allocation28_spill] sm:$0xff] }
 0x300   :  { %v1425_v0 = vsel %vm1422_vm4, %v1424_v41, %v1420_v48  ;;  %v1448_v16 = vmul.f32 %v4643_v31, %v1406_v52  ;;  %vm1442_vm8 = vcmp.eq.f32.partialorder %v1441_v58, 8.507059e+37  ;;  %v6612_v41 = vld [vmem:[#allocation29_spill] sm:$0xff]  ;;  %v6613_v13 = vld [vmem:[#allocation30_spill] sm:$0xff]  ;;  %v6614_v31 = vld [vmem:[#allocation31_spill] sm:$0xff] }
 0x301   :  { %v1447_v20 = vmul.f32 %v1425_v0, %v5738_v40  ;;  %v1435_v27 = vmul.f32 %v4641_v34, %v1434_v53  ;;  %v5746_v0 = vpop.permute.xlu0 %1457  ;;  %v6615_v52 = vld [vmem:[#allocation32_spill] sm:$0xff]  ;;  %v6616_v48 = vld [vmem:[#allocation33_spill] sm:$0xff]  ;;  %v6622_v58 = vld [vmem:[#allocation39_spill] sm:$0xff] }
 0x303   :  { %v5741_v61 = vadd.f32 %v1448_v16, %v1447_v20  ;;  %v1436_v36 = vadd.f32 %v4641_v34, %v1435_v27  ;;  %v6617_v16 = vld [vmem:[#allocation34_spill] sm:$0xff]  ;;  %v6618_v20 = vld [vmem:[#allocation35_spill] sm:$0xff]  ;;  %v6619_v27 = vld [vmem:[#allocation36_spill] sm:$0xff] }
 0x305   :  { %4644 = vtanh.f32 %v5741_v61  ;;  %v1440_v7 = vsel %vm1439_vm7, %v4641_v34, %v1436_v36  ;;  %v6608_v34 = vld [vmem:[#allocation25_spill] sm:$0xff] }
 0x306   :  { %v1445_v35 = vsel %vm1442_vm8, %v1444_v6, %v1440_v7  ;;  %v6620_v36 = vld [vmem:[#allocation37_spill] sm:$0xff]  ;;  %v6623_v7 = vld [vmem:[#allocation40_spill] sm:$0xff] }
 0x307   :  { %v6624_v6 = vld [vmem:[#allocation41_spill] sm:$0xff] }
 0x30b   :  { %v4645_v60 = vpop.eup %4644 }
 0x30c   :  { %v1451_v26 = vmul.f32 %v4645_v60, %v1445_v35  ;;  %v6625_v60 = vld [vmem:[#allocation42_spill] sm:$0xff]  ;;  %v6626_v35 = vld [vmem:[#allocation43_spill] sm:$0xff] }
 0x30e   :  { %v1460_v53 = vmul.f32 %v5746_v0, %v1451_v26  ;;  %v6627_v26 = vld [vmem:[#allocation44_spill] sm:$0xff] }
 0x310   :  { %v5751_v56 = vadd.f32 %v1467_v55, %v1460_v53  ;;  %v6628_v53 = vld [vmem:[#allocation45_spill] sm:$0xff]  ;;  %v6629_v55 = vld [vmem:[#allocation46_spill] sm:$0xff] }
 0x312   :  { %v1472_v45 = vpack.c.bf16 %v5751_v56, %v5751_v56 }
 0x314   :  { %1481 = vmatmul.bf16.vlgmr.msrb.gmra.mxu0 %v1472_v45  ;;  %1494 = vmatmul.bf16.vlgmr.msrb.gmra.mxu1 %v1472_v45 }
 0x315   :  { %1507 = vmatmul.bf16.vlgmr.msrb.gmra.mxu2 %v1472_v45  ;;  %1520 = vmatmul.bf16.vlgmr.msrb.gmra.mxu3 %v1472_v45 }
 0x316   :  { %1677 = vmatpush.bf16.msrb.mxu0 %v5185_v5  ;;  %1690 = vmatpush.bf16.msrb.mxu1 %v5187_v9 }
 0x317   :  { %1703 = vmatpush.bf16.msrb.mxu2 %v5203_v24  ;;  %1716 = vmatpush.bf16.msrb.mxu3 %v5189_v10 }
 0x31a   :  { %1678 = vmatpush.bf16.msrb.mxu0 %v5194_v14  ;;  %1691 = vmatpush.bf16.msrb.mxu1 %v5196_v19 }
 0x31b   :  { %1704 = vmatpush.bf16.msrb.mxu2 %v5215_v38  ;;  %1717 = vmatpush.bf16.msrb.mxu3 %v5198_v21 }
 0x31e   :  { %1679 = vmatpush.bf16.msrb.mxu0 %v5206_v28  ;;  %1692 = vmatpush.bf16.msrb.mxu1 %v5208_v32 }
 0x31f   :  { %1705 = vmatpush.bf16.msrb.mxu2 %v5222_v47  ;;  %1718 = vmatpush.bf16.msrb.mxu3 %v5210_v33 }
 0x322   :  { %1680 = vmatpush.bf16.msrb.mxu0 %v5217_v42  ;;  %1693 = vmatpush.bf16.msrb.mxu1 %v5219_v43 }
 0x323   :  { %1706 = vmatpush.bf16.msrb.mxu2 %v5235_v54  ;;  %1719 = vmatpush.bf16.msrb.mxu3 %v5226_v49 }
 0x324   :  { %1533 = vmatmul.bf16.vlgmr.msra.gmra.mxu0 %v1472_v45  ;;  %1546 = vmatmul.bf16.vlgmr.msra.gmra.mxu1 %v1472_v45 }
 0x325   :  { %1559 = vmatmul.bf16.vlgmr.msra.gmra.mxu2 %v1472_v45  ;;  %1572 = vmatmul.bf16.vlgmr.msra.gmra.mxu3 %v1472_v45  ;;  %v6630_v45 = vld [vmem:[#allocation47_spill] sm:$0xff] }
 0x326   :  { %1681 = vmatpush.bf16.msrb.mxu0 %v5241_v59  ;;  %1694 = vmatpush.bf16.msrb.mxu1 %v5244_v63 }
 0x327   :  { %1707 = vmatpush.bf16.msrb.mxu2 %v5246_v1  ;;  %1720 = vmatpush.bf16.msrb.mxu3 %v5249_v4 }
 0x32a   :  { %1682 = vmatpush.bf16.msrb.mxu0 %v5254_v11  ;;  %1695 = vmatpush.bf16.msrb.mxu1 %v5256_v17 }
 0x32b   :  { %1708 = vmatpush.bf16.msrb.mxu2 %v5258_v18  ;;  %1721 = vmatpush.bf16.msrb.mxu3 %v5261_v25 }
 0x32e   :  { %1683 = vmatpush.bf16.msrb.mxu0 %v5264_v30  ;;  %1696 = vmatpush.bf16.msrb.mxu1 %v5268_v37 }
 0x32f   :  { %1709 = vmatpush.bf16.msrb.mxu2 %v5270_v39  ;;  %1722 = vmatpush.bf16.msrb.mxu3 %v5274_v44 }
 0x332   :  { %1684 = vmatpush.bf16.msrb.mxu0 %v5284_v51  ;;  %1697 = vmatpush.bf16.msrb.mxu1 %v5294_v57 }
 0x333   :  { %1710 = vmatpush.bf16.msrb.mxu2 %v5302_v62  ;;  %1723 = vmatpush.bf16.msrb.mxu3 %v5304_v2 }
 0x336   :  { %1729 = vmatpush.bf16.msra.mxu0 %v5308_v8  ;;  %1742 = vmatpush.bf16.msra.mxu1 %v5312_v22 }
 0x337   :  { %1755 = vmatpush.bf16.msra.mxu2 %v5314_v23  ;;  %1768 = vmatpush.bf16.msra.mxu3 %v6607_v29 }
 0x33a   :  { %1730 = vmatpush.bf16.msra.mxu0 %v6608_v34  ;;  %1743 = vmatpush.bf16.msra.mxu1 %v6609_v50 }
 0x33b   :  { %1756 = vmatpush.bf16.msra.mxu2 %v6610_v12  ;;  %1769 = vmatpush.bf16.msra.mxu3 %v6611_v15 }
 0x33e   :  { %1731 = vmatpush.bf16.msra.mxu0 %v6612_v41  ;;  %1744 = vmatpush.bf16.msra.mxu1 %v6613_v13  ;;  %v6638_v13 = vld [vmem:[#allocation62_spill] sm:$0xff]  ;;  %v6639_v41 = vld [vmem:[#allocation81_spill] sm:$0xff] }
 0x33f   :  { %1757 = vmatpush.bf16.msra.mxu2 %v6614_v31  ;;  %1770 = vmatpush.bf16.msra.mxu3 %v6615_v52  ;;  %v6637_v31 = vld [vmem:[#allocation61_spill] sm:$0xff] }
 0x342   :  { %1732 = vmatpush.bf16.msra.mxu0 %v6616_v48  ;;  %1745 = vmatpush.bf16.msra.mxu1 %v6617_v16  ;;  %v6636_v16 = vld [vmem:[#allocation23_spill] sm:$0xff] }
 0x343   :  { %1758 = vmatpush.bf16.msra.mxu2 %v6618_v20  ;;  %1771 = vmatpush.bf16.msra.mxu3 %v6619_v27 }
 0x346   :  { %1733 = vmatpush.bf16.msra.mxu0 %v6620_v36  ;;  %1746 = vmatpush.bf16.msra.mxu1 %v6621_v3  ;;  %v6631_v36 = vld [vmem:[#allocation48_spill] sm:$0xff]  ;;  %v6632_v3 = vld [vmem:[#allocation49_spill] sm:$0xff] }
 0x347   :  { %1759 = vmatpush.bf16.msra.mxu2 %v6622_v58  ;;  %1772 = vmatpush.bf16.msra.mxu3 %v6623_v7  ;;  %v6633_v58 = vld [vmem:[#allocation50_spill] sm:$0xff]  ;;  %v6634_v7 = vld [vmem:[#allocation51_spill] sm:$0xff] }
 0x34a   :  { %1734 = vmatpush.bf16.msra.mxu0 %v6624_v6  ;;  %1747 = vmatpush.bf16.msra.mxu1 %v6625_v60  ;;  %v6635_v6 = vld [vmem:[#allocation52_spill] sm:$0xff] }
 0x34b   :  { %1760 = vmatpush.bf16.msra.mxu2 %v6626_v35  ;;  %1773 = vmatpush.bf16.msra.mxu3 %v6627_v26 }
 0x34e   :  { %1735 = vmatpush.bf16.msra.mxu0 %v6628_v53  ;;  %1748 = vmatpush.bf16.msra.mxu1 %v6629_v55 }
 0x34f   :  { %1761 = vmatpush.bf16.msra.mxu2 %v6630_v45  ;;  %1774 = vmatpush.bf16.msra.mxu3 %v6631_v36 }
 0x352   :  { %1736 = vmatpush.bf16.msra.mxu0 %v6632_v3  ;;  %1749 = vmatpush.bf16.msra.mxu1 %v6633_v58 }
 0x353   :  { %1762 = vmatpush.bf16.msra.mxu2 %v6634_v7  ;;  %1775 = vmatpush.bf16.msra.mxu3 %v6635_v6 }
 0x391   :  { %v1482_v60 = vpop.f32.mrf.mxu0  ;;  %v1495_v35 = vpop.f32.mrf.mxu1 }
 0x392   :  { %v1577_v55 = vmul.f32 %v6636_v16, %v1482_v60  ;;  %v1578_v45 = vmul.f32 %v6636_v16, %v1495_v35 }
 0x394   :  { %v1581_v58 = vadd.f32 %v1577_v55, %v6637_v31  ;;  %v1582_v7 = vadd.f32 %v1578_v45, %v6638_v13 }
 0x398   :  { %v1508_v27 = vpop.f32.mrf.mxu2  ;;  %v1521_v26 = vpop.f32.mrf.mxu3 }
 0x399   :  { %v1484_v20 = vpop.f32.mrf.mxu0  ;;  %v1497_v53 = vpop.f32.mrf.mxu1 }
 0x39a   :  { %v1580_v20 = vmul.f32 %v6636_v16, %v1521_v26 }
 0x3a0   :  { %v1510_v48 = vpop.f32.mrf.mxu2  ;;  %v1523_v36 = vpop.f32.mrf.mxu3 }
 0x3a1   :  { %v1534_v52 = vpop.f32.mrf.mxu0  ;;  %v1547_v3 = vpop.f32.mrf.mxu1  ;;  %v6640_v36 = vld [vmem:[#allocation64_spill] sm:$0xff] }
 0x3a2   :  { %v1585_v6 = vmul.f32 %v1534_v52, %v6639_v41  ;;  %v1586_v15 = vmul.f32 %v1547_v3, %v6639_v41  ;;  %v1584_v34 = vadd.f32 %v1580_v20, %v6640_v36  ;;  %v6641_v20 = vld [vmem:[#allocation63_spill] sm:$0xff] }
 0x3a4   :  { %v1589_v12 = vadd.f32 %v1585_v6, %v1581_v58  ;;  %v1590_v50 = vadd.f32 %v1586_v15, %v1582_v7 }
 0x3a6   :  { %v3978_v53 = vmul.f32 -1.442695, %v1589_v12  ;;  %v3979_v60 = vmul.f32 -1.442695, %v1590_v50  ;;  %v1579_v50 = vmul.f32 %v6636_v16, %v1508_v27 }
 0x3a8   :  { %4646 = vpow2.f32 %v3978_v53  ;;  %v1560_v35 = vpop.f32.mrf.mxu2  ;;  %v1573_v48 = vpop.f32.mrf.mxu3  ;;  %v1583_v53 = vadd.f32 %v1579_v50, %v6641_v20 }
 0x3a9   :  { %4648 = vpow2.f32 %v3979_v60  ;;  %v1588_v31 = vmul.f32 %v1573_v48, %v6639_v41  ;;  %v1536_v55 = vpop.f32.mrf.mxu0  ;;  %v1549_v13 = vpop.f32.mrf.mxu1  ;;  %v1587_v6 = vmul.f32 %v1560_v35, %v6639_v41 }
 0x3aa   :  { %v1469_v13 = vmul.f32 %v5746_v0, %v5741_v61 }
 0x3ab   :  { %v1592_v45 = vadd.f32 %v1588_v31, %v1584_v34  ;;  %v1591_v34 = vadd.f32 %v1587_v6, %v1583_v53  ;;  %v1470_v6 = vmul.f32 %v5744_v46, %v5738_v40 }
 0x3ad   :  { %v3980_v52 = vmul.f32 -1.442695, %v1592_v45 }
 0x3ae   :  { %v4647_v29 = vpop.eup %4646 }
 0x3af   :  { %v4649_v3 = vpop.eup %4648  ;;  %v1596_v58 = vadd.f32 1.0, %v4647_v29  ;;  %4650 = vpow2.f32 %v3980_v52 }
 0x3b0   :  { %v1615_v15 = vadd.f32 1.0, %v4649_v3  ;;  %v1562_v7 = vpop.f32.mrf.mxu2  ;;  %v1575_v12 = vpop.f32.mrf.mxu3 }
 0x3b1   :  { %4652 = vrcp.f32 %v1596_v58  ;;  %v1608_v27 = vand.u32 2147483648, %v1596_v58  ;;  %v1606_v35 = vand.u32 2147483647, %v1596_v58  ;;  %vm1602_vm11 = vweird.f32 %v1596_v58 }
 0x3b2   :  { %4654 = vrcp.f32 %v1615_v15  ;;  %v1627_v52 = vand.u32 2147483648, %v1615_v15  ;;  %v1625_v12 = vand.u32 2147483647, %v1615_v15  ;;  %vm1621_vm12 = vweird.f32 %v1615_v15 }
 0x3b3   :  { %v1609_v20 = vor.u32 1.1754944e-38, %v1608_v27  ;;  %vm1607_vm15 = vcmp.eq.f32.partialorder %v1606_v35, 8.507059e+37 }
 0x3b4   :  { %v1628_v53 = vor.u32 1.1754944e-38, %v1627_v52  ;;  %vm1626_vm0 = vcmp.eq.f32.partialorder %v1625_v12, 8.507059e+37  ;;  %v5841_v12 = vpop.permute.xlu2 %1661 }
 0x3b5   :  { %v4651_v26 = vpop.eup %4650 }
 0x3b6   :  { %v1635_v60 = vadd.f32 1.0, %v4651_v26 }
 0x3b7   :  { %v4653_v48 = vpop.eup %4652 }
 0x3b8   :  { %v4655_v36 = vpop.eup %4654  ;;  %v1598_v31 = vmul.f32 %v4653_v48, %v1596_v58  ;;  %4656 = vrcp.f32 %v1635_v60  ;;  %vm1603_vm9 = vweird.f32 %v4653_v48  ;;  %vm1641_vm2 = vweird.f32 %v1635_v60 }
 0x3b9   :  { %v1617_v29 = vmul.f32 %v4655_v36, %v1615_v15  ;;  %4658 = vtanh.f32 %v1591_v34  ;;  %vm1622_vm10 = vweird.f32 %v4655_v36  ;;  %vm1604_vm13 = vmor %vm1602_vm11, %vm1603_vm9  ;;  %v5835_v34 = vadd.f32 %v1470_v6, %v1469_v13 }
 0x3ba   :  { %v1599_v55 = vsub.f32 1.0, %v1598_v31  ;;  %vm1623_vm14 = vmor %vm1621_vm12, %vm1622_vm10  ;;  %v1647_v13 = vand.u32 2147483648, %v1635_v60 }
 0x3bb   :  { %v1618_v45 = vsub.f32 1.0, %v1617_v29 }
 0x3bc   :  { %v1600_v3 = vmul.f32 %v4653_v48, %v1599_v55 }
 0x3bd   :  { %v1619_v7 = vmul.f32 %v4655_v36, %v1618_v45 }
 0x3be   :  { %v4657_v50 = vpop.eup %4656  ;;  %v1601_v26 = vadd.f32 %v4653_v48, %v1600_v3  ;;  %v1648_v3 = vor.u32 1.1754944e-38, %v1647_v13  ;;  %v6656_v13 = vld [vmem:[#allocation38_spill] sm:$0xff] }
 0x3bf   :  { %v1620_v61 = vadd.f32 %v4655_v36, %v1619_v7  ;;  %v1637_v0 = vmul.f32 %v4657_v50, %v1635_v60  ;;  %v4659_v29 = vpop.eup %4658  ;;  %vm1642_vm1 = vweird.f32 %v4657_v50 }
 0x3c0   :  { %v1605_v31 = vsel %vm1604_vm13, %v4653_v48, %v1601_v26  ;;  %v1645_v48 = vand.u32 2147483647, %v1635_v60  ;;  %vm1643_vm3 = vmor %vm1641_vm2, %vm1642_vm1 }
 0x3c1   :  { %v1610_v55 = vsel %vm1607_vm15, %v1609_v20, %v1605_v31  ;;  %v1624_v45 = vsel %vm1623_vm14, %v4655_v36, %v1620_v61  ;;  %v1638_v41 = vsub.f32 1.0, %v1637_v0  ;;  %v6644_v20 = vld [vmem:[#allocation26_spill] sm:$0xff]  ;;  %v6645_v61 = vld [vmem:[#allocation27_spill] sm:$0xff]  ;;  %v6646_v0 = vld [vmem:[#allocation28_spill] sm:$0xff] }
 0x3c2   :  { %v1629_v16 = vsel %vm1626_vm0, %v1628_v53, %v1624_v45  ;;  %v1652_v40 = vmul.f32 %v4659_v29, %v1610_v55  ;;  %vm1646_vm4 = vcmp.eq.f32.partialorder %v1645_v48, 8.507059e+37  ;;  %v6647_v53 = vld [vmem:[#allocation29_spill] sm:$0xff]  ;;  %v6648_v31 = vld [vmem:[#allocation30_spill] sm:$0xff]  ;;  %v6649_v29 = vld [vmem:[#allocation31_spill] sm:$0xff] }
 0x3c3   :  { %v1651_v46 = vmul.f32 %v1629_v16, %v5835_v34  ;;  %v1639_v58 = vmul.f32 %v4657_v50, %v1638_v41  ;;  %v5843_v16 = vpop.permute.xlu0 %1668  ;;  %v6650_v55 = vld [vmem:[#allocation32_spill] sm:$0xff]  ;;  %v6651_v45 = vld [vmem:[#allocation33_spill] sm:$0xff]  ;;  %v6657_v48 = vld [vmem:[#allocation39_spill] sm:$0xff] }
 0x3c4   :  { %v1671_v6 = vmul.f32 %v5843_v16, %v5751_v56  ;;  %v6642_v56 = vld [vmem:[#allocation24_spill] sm:$0xff] }
 0x3c5   :  { %v5838_v15 = vadd.f32 %v1652_v40, %v1651_v46  ;;  %v1640_v27 = vadd.f32 %v4657_v50, %v1639_v58  ;;  %v6652_v40 = vld [vmem:[#allocation34_spill] sm:$0xff]  ;;  %v6653_v46 = vld [vmem:[#allocation35_spill] sm:$0xff]  ;;  %v6654_v58 = vld [vmem:[#allocation36_spill] sm:$0xff] }
 0x3c7   :  { %4660 = vtanh.f32 %v5838_v15  ;;  %v1644_v52 = vsel %vm1643_vm3, %v4657_v50, %v1640_v27  ;;  %v6643_v50 = vld [vmem:[#allocation25_spill] sm:$0xff] }
 0x3c8   :  { %v1649_v35 = vsel %vm1646_vm4, %v1648_v3, %v1644_v52  ;;  %v6655_v27 = vld [vmem:[#allocation37_spill] sm:$0xff]  ;;  %v6658_v52 = vld [vmem:[#allocation40_spill] sm:$0xff] }
 0x3c9   :  { %v6659_v3 = vld [vmem:[#allocation41_spill] sm:$0xff] }
 0x3cd   :  { %v4661_v36 = vpop.eup %4660 }
 0x3ce   :  { %v1655_v7 = vmul.f32 %v4661_v36, %v1649_v35  ;;  %v6660_v36 = vld [vmem:[#allocation42_spill] sm:$0xff]  ;;  %v6661_v35 = vld [vmem:[#allocation43_spill] sm:$0xff] }
 0x3d0   :  { %v1664_v41 = vmul.f32 %v5841_v12, %v1655_v7  ;;  %v6662_v7 = vld [vmem:[#allocation44_spill] sm:$0xff] }
 0x3d2   :  { %v5848_v26 = vadd.f32 %v1671_v6, %v1664_v41  ;;  %v6663_v41 = vld [vmem:[#allocation45_spill] sm:$0xff]  ;;  %v6664_v6 = vld [vmem:[#allocation46_spill] sm:$0xff] }
 0x3d4   :  { %v1676_v60 = vpack.c.bf16 %v5848_v26, %v5848_v26 }
 0x3d6   :  { %1685 = vmatmul.bf16.vlgmr.msrb.gmra.mxu0 %v1676_v60  ;;  %1698 = vmatmul.bf16.vlgmr.msrb.gmra.mxu1 %v1676_v60 }
 0x3d7   :  { %1711 = vmatmul.bf16.vlgmr.msrb.gmra.mxu2 %v1676_v60  ;;  %1724 = vmatmul.bf16.vlgmr.msrb.gmra.mxu3 %v1676_v60 }
 0x3d8   :  { %1881 = vmatpush.bf16.msrb.mxu0 %v5185_v5  ;;  %1894 = vmatpush.bf16.msrb.mxu1 %v5187_v9 }
 0x3d9   :  { %1907 = vmatpush.bf16.msrb.mxu2 %v5203_v24  ;;  %1920 = vmatpush.bf16.msrb.mxu3 %v5189_v10 }
 0x3dc   :  { %1882 = vmatpush.bf16.msrb.mxu0 %v5194_v14  ;;  %1895 = vmatpush.bf16.msrb.mxu1 %v5196_v19 }
 0x3dd   :  { %1908 = vmatpush.bf16.msrb.mxu2 %v5215_v38  ;;  %1921 = vmatpush.bf16.msrb.mxu3 %v5198_v21 }
 0x3e0   :  { %1883 = vmatpush.bf16.msrb.mxu0 %v5206_v28  ;;  %1896 = vmatpush.bf16.msrb.mxu1 %v5208_v32 }
 0x3e1   :  { %1909 = vmatpush.bf16.msrb.mxu2 %v5222_v47  ;;  %1922 = vmatpush.bf16.msrb.mxu3 %v5210_v33 }
 0x3e4   :  { %1884 = vmatpush.bf16.msrb.mxu0 %v5217_v42  ;;  %1897 = vmatpush.bf16.msrb.mxu1 %v5219_v43 }
 0x3e5   :  { %1910 = vmatpush.bf16.msrb.mxu2 %v5235_v54  ;;  %1923 = vmatpush.bf16.msrb.mxu3 %v5226_v49 }
 0x3e6   :  { %1737 = vmatmul.bf16.vlgmr.msra.gmra.mxu0 %v1676_v60  ;;  %1750 = vmatmul.bf16.vlgmr.msra.gmra.mxu1 %v1676_v60 }
 0x3e7   :  { %1763 = vmatmul.bf16.vlgmr.msra.gmra.mxu2 %v1676_v60  ;;  %1776 = vmatmul.bf16.vlgmr.msra.gmra.mxu3 %v1676_v60  ;;  %v6665_v60 = vld [vmem:[#allocation47_spill] sm:$0xff] }
 0x3e8   :  { %1885 = vmatpush.bf16.msrb.mxu0 %v5241_v59  ;;  %1898 = vmatpush.bf16.msrb.mxu1 %v5244_v63 }
 0x3e9   :  { %1911 = vmatpush.bf16.msrb.mxu2 %v5246_v1  ;;  %1924 = vmatpush.bf16.msrb.mxu3 %v5249_v4 }
 0x3ec   :  { %1886 = vmatpush.bf16.msrb.mxu0 %v5254_v11  ;;  %1899 = vmatpush.bf16.msrb.mxu1 %v5256_v17 }
 0x3ed   :  { %1912 = vmatpush.bf16.msrb.mxu2 %v5258_v18  ;;  %1925 = vmatpush.bf16.msrb.mxu3 %v5261_v25 }
 0x3f0   :  { %1887 = vmatpush.bf16.msrb.mxu0 %v5264_v30  ;;  %1900 = vmatpush.bf16.msrb.mxu1 %v5268_v37 }
 0x3f1   :  { %1913 = vmatpush.bf16.msrb.mxu2 %v5270_v39  ;;  %1926 = vmatpush.bf16.msrb.mxu3 %v5274_v44 }
 0x3f4   :  { %1888 = vmatpush.bf16.msrb.mxu0 %v5284_v51  ;;  %1901 = vmatpush.bf16.msrb.mxu1 %v5294_v57 }
 0x3f5   :  { %1914 = vmatpush.bf16.msrb.mxu2 %v5302_v62  ;;  %1927 = vmatpush.bf16.msrb.mxu3 %v5304_v2 }
 0x3f8   :  { %1933 = vmatpush.bf16.msra.mxu0 %v5308_v8  ;;  %1946 = vmatpush.bf16.msra.mxu1 %v5312_v22 }
 0x3f9   :  { %1959 = vmatpush.bf16.msra.mxu2 %v5314_v23  ;;  %1972 = vmatpush.bf16.msra.mxu3 %v6642_v56 }
 0x3fc   :  { %1934 = vmatpush.bf16.msra.mxu0 %v6643_v50  ;;  %1947 = vmatpush.bf16.msra.mxu1 %v6644_v20 }
 0x3fd   :  { %1960 = vmatpush.bf16.msra.mxu2 %v6645_v61  ;;  %1973 = vmatpush.bf16.msra.mxu3 %v6646_v0 }
 0x400   :  { %1935 = vmatpush.bf16.msra.mxu0 %v6647_v53  ;;  %1948 = vmatpush.bf16.msra.mxu1 %v6648_v31  ;;  %v6673_v31 = vld [vmem:[#allocation66_spill] sm:$0xff]  ;;  %v6674_v53 = vld [vmem:[#allocation81_spill] sm:$0xff] }
 0x401   :  { %1961 = vmatpush.bf16.msra.mxu2 %v6649_v29  ;;  %1974 = vmatpush.bf16.msra.mxu3 %v6650_v55  ;;  %v6672_v29 = vld [vmem:[#allocation65_spill] sm:$0xff] }
 0x404   :  { %1936 = vmatpush.bf16.msra.mxu0 %v6651_v45  ;;  %1949 = vmatpush.bf16.msra.mxu1 %v6652_v40  ;;  %v6671_v40 = vld [vmem:[#allocation23_spill] sm:$0xff] }
 0x405   :  { %1962 = vmatpush.bf16.msra.mxu2 %v6653_v46  ;;  %1975 = vmatpush.bf16.msra.mxu3 %v6654_v58 }
 0x408   :  { %1937 = vmatpush.bf16.msra.mxu0 %v6655_v27  ;;  %1950 = vmatpush.bf16.msra.mxu1 %v6656_v13  ;;  %v6666_v27 = vld [vmem:[#allocation48_spill] sm:$0xff]  ;;  %v6667_v13 = vld [vmem:[#allocation49_spill] sm:$0xff] }
 0x409   :  { %1963 = vmatpush.bf16.msra.mxu2 %v6657_v48  ;;  %1976 = vmatpush.bf16.msra.mxu3 %v6658_v52  ;;  %v6668_v48 = vld [vmem:[#allocation50_spill] sm:$0xff]  ;;  %v6669_v52 = vld [vmem:[#allocation51_spill] sm:$0xff] }
 0x40c   :  { %1938 = vmatpush.bf16.msra.mxu0 %v6659_v3  ;;  %1951 = vmatpush.bf16.msra.mxu1 %v6660_v36  ;;  %v6670_v3 = vld [vmem:[#allocation52_spill] sm:$0xff] }
 0x40d   :  { %1964 = vmatpush.bf16.msra.mxu2 %v6661_v35  ;;  %1977 = vmatpush.bf16.msra.mxu3 %v6662_v7 }
 0x410   :  { %1939 = vmatpush.bf16.msra.mxu0 %v6663_v41  ;;  %1952 = vmatpush.bf16.msra.mxu1 %v6664_v6 }
 0x411   :  { %1965 = vmatpush.bf16.msra.mxu2 %v6665_v60  ;;  %1978 = vmatpush.bf16.msra.mxu3 %v6666_v27 }
 0x414   :  { %1940 = vmatpush.bf16.msra.mxu0 %v6667_v13  ;;  %1953 = vmatpush.bf16.msra.mxu1 %v6668_v48 }
 0x415   :  { %1966 = vmatpush.bf16.msra.mxu2 %v6669_v52  ;;  %1979 = vmatpush.bf16.msra.mxu3 %v6670_v3 }
 0x453   :  { %v1686_v36 = vpop.f32.mrf.mxu0  ;;  %v1699_v35 = vpop.f32.mrf.mxu1 }
 0x454   :  { %v1781_v6 = vmul.f32 %v6671_v40, %v1686_v36  ;;  %v1782_v60 = vmul.f32 %v6671_v40, %v1699_v35 }
 0x456   :  { %v1785_v48 = vadd.f32 %v1781_v6, %v6672_v29  ;;  %v1786_v52 = vadd.f32 %v1782_v60, %v6673_v31 }
 0x45a   :  { %v1712_v58 = vpop.f32.mrf.mxu2  ;;  %v1725_v7 = vpop.f32.mrf.mxu3 }
 0x45b   :  { %v1688_v46 = vpop.f32.mrf.mxu0  ;;  %v1701_v41 = vpop.f32.mrf.mxu1 }
 0x45c   :  { %v1784_v46 = vmul.f32 %v6671_v40, %v1725_v7 }
 0x462   :  { %v1714_v45 = vpop.f32.mrf.mxu2  ;;  %v1727_v27 = vpop.f32.mrf.mxu3 }
 0x463   :  { %v1738_v55 = vpop.f32.mrf.mxu0  ;;  %v1751_v13 = vpop.f32.mrf.mxu1  ;;  %v6675_v27 = vld [vmem:[#allocation68_spill] sm:$0xff] }
 0x464   :  { %v1789_v3 = vmul.f32 %v1738_v55, %v6674_v53  ;;  %v1790_v0 = vmul.f32 %v1751_v13, %v6674_v53  ;;  %v1788_v50 = vadd.f32 %v1784_v46, %v6675_v27  ;;  %v6676_v46 = vld [vmem:[#allocation67_spill] sm:$0xff] }
 0x466   :  { %v1793_v61 = vadd.f32 %v1789_v3, %v1785_v48  ;;  %v1794_v20 = vadd.f32 %v1790_v0, %v1786_v52 }
 0x468   :  { %v3982_v41 = vmul.f32 -1.442695, %v1793_v61  ;;  %v3983_v36 = vmul.f32 -1.442695, %v1794_v20  ;;  %v1783_v20 = vmul.f32 %v6671_v40, %v1712_v58 }
 0x46a   :  { %4662 = vpow2.f32 %v3982_v41  ;;  %v1764_v35 = vpop.f32.mrf.mxu2  ;;  %v1777_v45 = vpop.f32.mrf.mxu3  ;;  %v1787_v41 = vadd.f32 %v1783_v20, %v6676_v46 }
 0x46b   :  { %4664 = vpow2.f32 %v3983_v36  ;;  %v1792_v29 = vmul.f32 %v1777_v45, %v6674_v53  ;;  %v1740_v6 = vpop.f32.mrf.mxu0  ;;  %v1753_v31 = vpop.f32.mrf.mxu1  ;;  %v1791_v3 = vmul.f32 %v1764_v35, %v6674_v53 }
 0x46c   :  { %v1673_v31 = vmul.f32 %v5841_v12, %v5838_v15 }
 0x46d   :  { %v1796_v60 = vadd.f32 %v1792_v29, %v1788_v50  ;;  %v1795_v50 = vadd.f32 %v1791_v3, %v1787_v41  ;;  %v1674_v3 = vmul.f32 %v5843_v16, %v5835_v34 }
 0x46f   :  { %v3984_v55 = vmul.f32 -1.442695, %v1796_v60 }
 0x470   :  { %v4663_v56 = vpop.eup %4662 }
 0x471   :  { %v4665_v13 = vpop.eup %4664  ;;  %v1800_v48 = vadd.f32 1.0, %v4663_v56  ;;  %4666 = vpow2.f32 %v3984_v55 }
 0x472   :  { %v1819_v0 = vadd.f32 1.0, %v4665_v13  ;;  %v1766_v52 = vpop.f32.mrf.mxu2  ;;  %v1779_v61 = vpop.f32.mrf.mxu3 }
 0x473   :  { %4668 = vrcp.f32 %v1800_v48  ;;  %v1812_v58 = vand.u32 2147483648, %v1800_v48  ;;  %v1810_v35 = vand.u32 2147483647, %v1800_v48  ;;  %vm1806_vm7 = vweird.f32 %v1800_v48 }
 0x474   :  { %4670 = vrcp.f32 %v1819_v0  ;;  %v1831_v55 = vand.u32 2147483648, %v1819_v0  ;;  %v1829_v61 = vand.u32 2147483647, %v1819_v0  ;;  %vm1825_vm8 = vweird.f32 %v1819_v0 }
 0x475   :  { %v1813_v46 = vor.u32 1.1754944e-38, %v1812_v58  ;;  %vm1811_vm11 = vcmp.eq.f32.partialorder %v1810_v35, 8.507059e+37 }
 0x476   :  { %v1832_v41 = vor.u32 1.1754944e-38, %v1831_v55  ;;  %vm1830_vm12 = vcmp.eq.f32.partialorder %v1829_v61, 8.507059e+37  ;;  %v5938_v61 = vpop.permute.xlu2 %1872 }
 0x477   :  { %v4667_v7 = vpop.eup %4666 }
 0x478   :  { %v1839_v36 = vadd.f32 1.0, %v4667_v7 }
 0x479   :  { %v4669_v45 = vpop.eup %4668 }
 0x47a   :  { %v4671_v27 = vpop.eup %4670  ;;  %v1802_v29 = vmul.f32 %v4669_v45, %v1800_v48  ;;  %4672 = vrcp.f32 %v1839_v36  ;;  %vm1807_vm5 = vweird.f32 %v4669_v45  ;;  %vm1845_vm14 = vweird.f32 %v1839_v36 }
 0x47b   :  { %v1821_v56 = vmul.f32 %v4671_v27, %v1819_v0  ;;  %4674 = vtanh.f32 %v1795_v50  ;;  %vm1826_vm6 = vweird.f32 %v4671_v27  ;;  %vm1808_vm9 = vmor %vm1806_vm7, %vm1807_vm5  ;;  %v5932_v50 = vadd.f32 %v1674_v3, %v1673_v31 }
 0x47c   :  { %v1803_v6 = vsub.f32 1.0, %v1802_v29  ;;  %vm1827_vm10 = vmor %vm1825_vm8, %vm1826_vm6  ;;  %v1851_v31 = vand.u32 2147483648, %v1839_v36  ;;  %v1875_v3 = vmul.f32 %v5938_v61, %v5848_v26  ;;  %v6677_v26 = vld [vmem:[#allocation24_spill] sm:$0xff] }
 0x47d   :  { %v1822_v60 = vsub.f32 1.0, %v1821_v56 }
 0x47e   :  { %v1804_v13 = vmul.f32 %v4669_v45, %v1803_v6 }
 0x47f   :  { %v1823_v52 = vmul.f32 %v4671_v27, %v1822_v60 }
 0x480   :  { %v4673_v20 = vpop.eup %4672  ;;  %v1805_v7 = vadd.f32 %v4669_v45, %v1804_v13  ;;  %v1852_v13 = vor.u32 1.1754944e-38, %v1851_v31  ;;  %v6691_v31 = vld [vmem:[#allocation38_spill] sm:$0xff] }
 0x481   :  { %v1824_v15 = vadd.f32 %v4671_v27, %v1823_v52  ;;  %v1841_v12 = vmul.f32 %v4673_v20, %v1839_v36  ;;  %v4675_v56 = vpop.eup %4674  ;;  %vm1846_vm13 = vweird.f32 %v4673_v20 }
 0x482   :  { %v1809_v29 = vsel %vm1808_vm9, %v4669_v45, %v1805_v7  ;;  %v1849_v45 = vand.u32 2147483647, %v1839_v36  ;;  %vm1847_vm15 = vmor %vm1845_vm14, %vm1846_vm13 }
 0x483   :  { %v1814_v6 = vsel %vm1811_vm11, %v1813_v46, %v1809_v29  ;;  %v1828_v60 = vsel %vm1827_vm10, %v4671_v27, %v1824_v15  ;;  %v1842_v53 = vsub.f32 1.0, %v1841_v12  ;;  %v6679_v46 = vld [vmem:[#allocation26_spill] sm:$0xff]  ;;  %v6680_v15 = vld [vmem:[#allocation27_spill] sm:$0xff]  ;;  %v6681_v12 = vld [vmem:[#allocation28_spill] sm:$0xff] }
 0x484   :  { %v1833_v40 = vsel %vm1830_vm12, %v1832_v41, %v1828_v60  ;;  %v1856_v34 = vmul.f32 %v4675_v56, %v1814_v6  ;;  %vm1850_vm0 = vcmp.eq.f32.partialorder %v1849_v45, 8.507059e+37  ;;  %v6682_v41 = vld [vmem:[#allocation29_spill] sm:$0xff]  ;;  %v6683_v29 = vld [vmem:[#allocation30_spill] sm:$0xff]  ;;  %v6684_v56 = vld [vmem:[#allocation31_spill] sm:$0xff] }
 0x485   :  { %v1855_v16 = vmul.f32 %v1833_v40, %v5932_v50  ;;  %v1843_v48 = vmul.f32 %v4673_v20, %v1842_v53  ;;  %v5940_v40 = vpop.permute.xlu1 %1865  ;;  %v6685_v6 = vld [vmem:[#allocation32_spill] sm:$0xff]  ;;  %v6686_v60 = vld [vmem:[#allocation33_spill] sm:$0xff]  ;;  %v6692_v45 = vld [vmem:[#allocation39_spill] sm:$0xff] }
 0x487   :  { %v5935_v0 = vadd.f32 %v1856_v34, %v1855_v16  ;;  %v1844_v58 = vadd.f32 %v4673_v20, %v1843_v48  ;;  %v6687_v34 = vld [vmem:[#allocation34_spill] sm:$0xff]  ;;  %v6688_v16 = vld [vmem:[#allocation35_spill] sm:$0xff]  ;;  %v6689_v48 = vld [vmem:[#allocation36_spill] sm:$0xff] }
 0x489   :  { %4676 = vtanh.f32 %v5935_v0  ;;  %v1848_v55 = vsel %vm1847_vm15, %v4673_v20, %v1844_v58  ;;  %v6678_v20 = vld [vmem:[#allocation25_spill] sm:$0xff] }
 0x48a   :  { %v1853_v35 = vsel %vm1850_vm0, %v1852_v13, %v1848_v55  ;;  %v6690_v58 = vld [vmem:[#allocation37_spill] sm:$0xff]  ;;  %v6693_v55 = vld [vmem:[#allocation40_spill] sm:$0xff] }
 0x48b   :  { %v6694_v13 = vld [vmem:[#allocation41_spill] sm:$0xff] }
 0x48f   :  { %v4677_v27 = vpop.eup %4676 }
 0x490   :  { %v1859_v52 = vmul.f32 %v4677_v27, %v1853_v35  ;;  %v6695_v27 = vld [vmem:[#allocation42_spill] sm:$0xff]  ;;  %v6696_v35 = vld [vmem:[#allocation43_spill] sm:$0xff] }
 0x492   :  { %v1868_v53 = vmul.f32 %v5940_v40, %v1859_v52  ;;  %v6697_v52 = vld [vmem:[#allocation44_spill] sm:$0xff] }
 0x494   :  { %v5945_v7 = vadd.f32 %v1875_v3, %v1868_v53  ;;  %v6698_v53 = vld [vmem:[#allocation45_spill] sm:$0xff]  ;;  %v6699_v3 = vld [vmem:[#allocation46_spill] sm:$0xff] }
 0x496   :  { %v1880_v36 = vpack.c.bf16 %v5945_v7, %v5945_v7 }
 0x498   :  { %1889 = vmatmul.bf16.vlgmr.msrb.gmra.mxu0 %v1880_v36  ;;  %1902 = vmatmul.bf16.vlgmr.msrb.gmra.mxu1 %v1880_v36 }
 0x499   :  { %1915 = vmatmul.bf16.vlgmr.msrb.gmra.mxu2 %v1880_v36  ;;  %1928 = vmatmul.bf16.vlgmr.msrb.gmra.mxu3 %v1880_v36 }
 0x49a   :  { %2085 = vmatpush.bf16.msrb.mxu0 %v5185_v5  ;;  %2098 = vmatpush.bf16.msrb.mxu1 %v5187_v9 }
 0x49b   :  { %2111 = vmatpush.bf16.msrb.mxu2 %v5203_v24  ;;  %2124 = vmatpush.bf16.msrb.mxu3 %v5189_v10 }
 0x49e   :  { %2086 = vmatpush.bf16.msrb.mxu0 %v5194_v14  ;;  %2099 = vmatpush.bf16.msrb.mxu1 %v5196_v19 }
 0x49f   :  { %2112 = vmatpush.bf16.msrb.mxu2 %v5215_v38  ;;  %2125 = vmatpush.bf16.msrb.mxu3 %v5198_v21 }
 0x4a2   :  { %2087 = vmatpush.bf16.msrb.mxu0 %v5206_v28  ;;  %2100 = vmatpush.bf16.msrb.mxu1 %v5208_v32 }
 0x4a3   :  { %2113 = vmatpush.bf16.msrb.mxu2 %v5222_v47  ;;  %2126 = vmatpush.bf16.msrb.mxu3 %v5210_v33 }
 0x4a6   :  { %2088 = vmatpush.bf16.msrb.mxu0 %v5217_v42  ;;  %2101 = vmatpush.bf16.msrb.mxu1 %v5219_v43 }
 0x4a7   :  { %2114 = vmatpush.bf16.msrb.mxu2 %v5235_v54  ;;  %2127 = vmatpush.bf16.msrb.mxu3 %v5226_v49 }
 0x4a8   :  { %1941 = vmatmul.bf16.vlgmr.msra.gmra.mxu0 %v1880_v36  ;;  %1954 = vmatmul.bf16.vlgmr.msra.gmra.mxu1 %v1880_v36 }
 0x4a9   :  { %1967 = vmatmul.bf16.vlgmr.msra.gmra.mxu2 %v1880_v36  ;;  %1980 = vmatmul.bf16.vlgmr.msra.gmra.mxu3 %v1880_v36  ;;  %v6700_v36 = vld [vmem:[#allocation47_spill] sm:$0xff] }
 0x4aa   :  { %2089 = vmatpush.bf16.msrb.mxu0 %v5241_v59  ;;  %2102 = vmatpush.bf16.msrb.mxu1 %v5244_v63 }
 0x4ab   :  { %2115 = vmatpush.bf16.msrb.mxu2 %v5246_v1  ;;  %2128 = vmatpush.bf16.msrb.mxu3 %v5249_v4 }
 0x4ae   :  { %2090 = vmatpush.bf16.msrb.mxu0 %v5254_v11  ;;  %2103 = vmatpush.bf16.msrb.mxu1 %v5256_v17 }
 0x4af   :  { %2116 = vmatpush.bf16.msrb.mxu2 %v5258_v18  ;;  %2129 = vmatpush.bf16.msrb.mxu3 %v5261_v25 }
 0x4b2   :  { %2091 = vmatpush.bf16.msrb.mxu0 %v5264_v30  ;;  %2104 = vmatpush.bf16.msrb.mxu1 %v5268_v37 }
 0x4b3   :  { %2117 = vmatpush.bf16.msrb.mxu2 %v5270_v39  ;;  %2130 = vmatpush.bf16.msrb.mxu3 %v5274_v44 }
 0x4b6   :  { %2092 = vmatpush.bf16.msrb.mxu0 %v5284_v51  ;;  %2105 = vmatpush.bf16.msrb.mxu1 %v5294_v57 }
 0x4b7   :  { %2118 = vmatpush.bf16.msrb.mxu2 %v5302_v62  ;;  %2131 = vmatpush.bf16.msrb.mxu3 %v5304_v2 }
 0x4ba   :  { %2137 = vmatpush.bf16.msra.mxu0 %v5308_v8  ;;  %2150 = vmatpush.bf16.msra.mxu1 %v5312_v22 }
 0x4bb   :  { %2163 = vmatpush.bf16.msra.mxu2 %v5314_v23  ;;  %2176 = vmatpush.bf16.msra.mxu3 %v6677_v26 }
 0x4be   :  { %2138 = vmatpush.bf16.msra.mxu0 %v6678_v20  ;;  %2151 = vmatpush.bf16.msra.mxu1 %v6679_v46 }
 0x4bf   :  { %2164 = vmatpush.bf16.msra.mxu2 %v6680_v15  ;;  %2177 = vmatpush.bf16.msra.mxu3 %v6681_v12 }
 0x4c2   :  { %2139 = vmatpush.bf16.msra.mxu0 %v6682_v41  ;;  %2152 = vmatpush.bf16.msra.mxu1 %v6683_v29  ;;  %v6708_v29 = vld [vmem:[#allocation70_spill] sm:$0xff]  ;;  %v6709_v41 = vld [vmem:[#allocation81_spill] sm:$0xff] }
 0x4c3   :  { %2165 = vmatpush.bf16.msra.mxu2 %v6684_v56  ;;  %2178 = vmatpush.bf16.msra.mxu3 %v6685_v6  ;;  %v6707_v56 = vld [vmem:[#allocation69_spill] sm:$0xff] }
 0x4c6   :  { %2140 = vmatpush.bf16.msra.mxu0 %v6686_v60  ;;  %2153 = vmatpush.bf16.msra.mxu1 %v6687_v34  ;;  %v6706_v34 = vld [vmem:[#allocation23_spill] sm:$0xff] }
 0x4c7   :  { %2166 = vmatpush.bf16.msra.mxu2 %v6688_v16  ;;  %2179 = vmatpush.bf16.msra.mxu3 %v6689_v48 }
 0x4ca   :  { %2141 = vmatpush.bf16.msra.mxu0 %v6690_v58  ;;  %2154 = vmatpush.bf16.msra.mxu1 %v6691_v31  ;;  %v6701_v58 = vld [vmem:[#allocation48_spill] sm:$0xff]  ;;  %v6702_v31 = vld [vmem:[#allocation49_spill] sm:$0xff] }
 0x4cb   :  { %2167 = vmatpush.bf16.msra.mxu2 %v6692_v45  ;;  %2180 = vmatpush.bf16.msra.mxu3 %v6693_v55  ;;  %v6703_v45 = vld [vmem:[#allocation50_spill] sm:$0xff]  ;;  %v6704_v55 = vld [vmem:[#allocation51_spill] sm:$0xff] }
 0x4ce   :  { %2142 = vmatpush.bf16.msra.mxu0 %v6694_v13  ;;  %2155 = vmatpush.bf16.msra.mxu1 %v6695_v27  ;;  %v6705_v13 = vld [vmem:[#allocation52_spill] sm:$0xff] }
 0x4cf   :  { %2168 = vmatpush.bf16.msra.mxu2 %v6696_v35  ;;  %2181 = vmatpush.bf16.msra.mxu3 %v6697_v52 }
 0x4d2   :  { %2143 = vmatpush.bf16.msra.mxu0 %v6698_v53  ;;  %2156 = vmatpush.bf16.msra.mxu1 %v6699_v3 }
 0x4d3   :  { %2169 = vmatpush.bf16.msra.mxu2 %v6700_v36  ;;  %2182 = vmatpush.bf16.msra.mxu3 %v6701_v58 }
 0x4d6   :  { %2144 = vmatpush.bf16.msra.mxu0 %v6702_v31  ;;  %2157 = vmatpush.bf16.msra.mxu1 %v6703_v45 }
 0x4d7   :  { %2170 = vmatpush.bf16.msra.mxu2 %v6704_v55  ;;  %2183 = vmatpush.bf16.msra.mxu3 %v6705_v13 }
 0x515   :  { %v1890_v27 = vpop.f32.mrf.mxu0  ;;  %v1903_v35 = vpop.f32.mrf.mxu1 }
 0x516   :  { %v1985_v3 = vmul.f32 %v6706_v34, %v1890_v27  ;;  %v1986_v36 = vmul.f32 %v6706_v34, %v1903_v35 }
 0x518   :  { %v1989_v45 = vadd.f32 %v1985_v3, %v6707_v56  ;;  %v1990_v55 = vadd.f32 %v1986_v36, %v6708_v29 }
 0x51c   :  { %v1916_v48 = vpop.f32.mrf.mxu2  ;;  %v1929_v52 = vpop.f32.mrf.mxu3 }
 0x51d   :  { %v1892_v16 = vpop.f32.mrf.mxu0  ;;  %v1905_v53 = vpop.f32.mrf.mxu1 }
 0x51e   :  { %v1988_v16 = vmul.f32 %v6706_v34, %v1929_v52 }
 0x524   :  { %v1918_v60 = vpop.f32.mrf.mxu2  ;;  %v1931_v58 = vpop.f32.mrf.mxu3 }
 0x525   :  { %v1942_v6 = vpop.f32.mrf.mxu0  ;;  %v1955_v31 = vpop.f32.mrf.mxu1  ;;  %v6710_v58 = vld [vmem:[#allocation72_spill] sm:$0xff] }
 0x526   :  { %v1993_v13 = vmul.f32 %v1942_v6, %v6709_v41  ;;  %v1994_v12 = vmul.f32 %v1955_v31, %v6709_v41  ;;  %v1992_v20 = vadd.f32 %v1988_v16, %v6710_v58  ;;  %v6711_v16 = vld [vmem:[#allocation71_spill] sm:$0xff] }
 0x528   :  { %v1997_v15 = vadd.f32 %v1993_v13, %v1989_v45  ;;  %v1998_v46 = vadd.f32 %v1994_v12, %v1990_v55 }
 0x52a   :  { %v3986_v53 = vmul.f32 -1.442695, %v1997_v15  ;;  %v3987_v27 = vmul.f32 -1.442695, %v1998_v46  ;;  %v1987_v46 = vmul.f32 %v6706_v34, %v1916_v48 }
 0x52c   :  { %4678 = vpow2.f32 %v3986_v53  ;;  %v1968_v35 = vpop.f32.mrf.mxu2  ;;  %v1981_v60 = vpop.f32.mrf.mxu3  ;;  %v1991_v53 = vadd.f32 %v1987_v46, %v6711_v16 }
 0x52d   :  { %4680 = vpow2.f32 %v3987_v27  ;;  %v1996_v56 = vmul.f32 %v1981_v60, %v6709_v41  ;;  %v1944_v3 = vpop.f32.mrf.mxu0  ;;  %v1957_v29 = vpop.f32.mrf.mxu1  ;;  %v1995_v13 = vmul.f32 %v1968_v35, %v6709_v41 }
 0x52e   :  { %v1877_v29 = vmul.f32 %v5940_v40, %v5935_v0 }
 0x52f   :  { %v2000_v36 = vadd.f32 %v1996_v56, %v1992_v20  ;;  %v1999_v20 = vadd.f32 %v1995_v13, %v1991_v53  ;;  %v1878_v13 = vmul.f32 %v5938_v61, %v5932_v50 }
 0x531   :  { %v3988_v6 = vmul.f32 -1.442695, %v2000_v36 }
 0x532   :  { %v4679_v26 = vpop.eup %4678 }
 0x533   :  { %v4681_v31 = vpop.eup %4680  ;;  %v2004_v45 = vadd.f32 1.0, %v4679_v26  ;;  %4682 = vpow2.f32 %v3988_v6 }
 0x534   :  { %v2023_v12 = vadd.f32 1.0, %v4681_v31  ;;  %v1970_v55 = vpop.f32.mrf.mxu2  ;;  %v1983_v15 = vpop.f32.mrf.mxu3 }
 0x535   :  { %4684 = vrcp.f32 %v2004_v45  ;;  %v2016_v48 = vand.u32 2147483648, %v2004_v45  ;;  %v2014_v35 = vand.u32 2147483647, %v2004_v45  ;;  %vm2010_vm3 = vweird.f32 %v2004_v45 }
 0x536   :  { %4686 = vrcp.f32 %v2023_v12  ;;  %v2035_v6 = vand.u32 2147483648, %v2023_v12  ;;  %v2033_v15 = vand.u32 2147483647, %v2023_v12  ;;  %vm2029_vm4 = vweird.f32 %v2023_v12 }
 0x537   :  { %v2017_v16 = vor.u32 1.1754944e-38, %v2016_v48  ;;  %vm2015_vm7 = vcmp.eq.f32.partialorder %v2014_v35, 8.507059e+37 }
 0x538   :  { %v2036_v53 = vor.u32 1.1754944e-38, %v2035_v6  ;;  %vm2034_vm8 = vcmp.eq.f32.partialorder %v2033_v15, 8.507059e+37  ;;  %v6035_v15 = vpop.permute.xlu1 %2076 }
 0x539   :  { %v4683_v52 = vpop.eup %4682 }
 0x53a   :  { %v2043_v27 = vadd.f32 1.0, %v4683_v52 }
 0x53b   :  { %v4685_v60 = vpop.eup %4684 }
 0x53c   :  { %v4687_v58 = vpop.eup %4686  ;;  %v2006_v56 = vmul.f32 %v4685_v60, %v2004_v45  ;;  %4688 = vrcp.f32 %v2043_v27  ;;  %vm2011_vm1 = vweird.f32 %v4685_v60  ;;  %vm2049_vm10 = vweird.f32 %v2043_v27 }
 0x53d   :  { %v2025_v26 = vmul.f32 %v4687_v58, %v2023_v12  ;;  %4690 = vtanh.f32 %v1999_v20  ;;  %vm2030_vm2 = vweird.f32 %v4687_v58  ;;  %vm2012_vm5 = vmor %vm2010_vm3, %vm2011_vm1  ;;  %v6029_v20 = vadd.f32 %v1878_v13, %v1877_v29 }
 0x53e   :  { %v2007_v3 = vsub.f32 1.0, %v2006_v56  ;;  %vm2031_vm6 = vmor %vm2029_vm4, %vm2030_vm2  ;;  %v2055_v29 = vand.u32 2147483648, %v2043_v27  ;;  %v2079_v13 = vmul.f32 %v6035_v15, %v5945_v7  ;;  %v6741_v7 = vld [vmem:[#allocation23_spill] sm:$0xff] }
 0x53f   :  { %v2026_v36 = vsub.f32 1.0, %v2025_v26 }
 0x540   :  { %v2008_v31 = vmul.f32 %v4685_v60, %v2007_v3 }
 0x541   :  { %v2027_v55 = vmul.f32 %v4687_v58, %v2026_v36 }
 0x542   :  { %v4689_v46 = vpop.eup %4688  ;;  %v2009_v52 = vadd.f32 %v4685_v60, %v2008_v31  ;;  %v2056_v31 = vor.u32 1.1754944e-38, %v2055_v29 }
 0x543   :  { %v2028_v0 = vadd.f32 %v4687_v58, %v2027_v55  ;;  %v2045_v40 = vmul.f32 %v4689_v46, %v2043_v27  ;;  %v4691_v26 = vpop.eup %4690  ;;  %vm2050_vm9 = vweird.f32 %v4689_v46 }
 0x544   :  { %v2013_v56 = vsel %vm2012_vm5, %v4685_v60, %v2009_v52  ;;  %v2053_v60 = vand.u32 2147483647, %v2043_v27  ;;  %vm2051_vm11 = vmor %vm2049_vm10, %vm2050_vm9  ;;  %vm2496_vm9 = vcmask 130048  }
 0x545   :  { %v2018_v3 = vsel %vm2015_vm7, %v2017_v16, %v2013_v56  ;;  %v2032_v36 = vsel %vm2031_vm6, %v4687_v58, %v2028_v0  ;;  %v2046_v41 = vsub.f32 1.0, %v2045_v40 }
 0x546   :  { %v2037_v34 = vsel %vm2034_vm8, %v2036_v53, %v2032_v36  ;;  %v2060_v50 = vmul.f32 %v4691_v26, %v2018_v3  ;;  %vm2054_vm12 = vcmp.eq.f32.partialorder %v2053_v60, 8.507059e+37  ;;  %v6742_v26 = vld [vmem:[#allocation73_spill] sm:$0xff]  ;;  %v6743_v36 = vld [vmem:[#allocation74_spill] sm:$0xff] }
 0x547   :  { %v2059_v61 = vmul.f32 %v2037_v34, %v6029_v20  ;;  %v2047_v45 = vmul.f32 %v4689_v46, %v2046_v41  ;;  %v6037_v34 = vpop.permute.xlu0 %2069 }
 0x549   :  { %v6032_v12 = vadd.f32 %v2060_v50, %v2059_v61  ;;  %v2048_v48 = vadd.f32 %v4689_v46, %v2047_v45  ;;  %v6744_v61 = vld [vmem:[#allocation81_spill] sm:$0xff] }
 0x54b   :  { %4692 = vtanh.f32 %v6032_v12  ;;  %v2052_v6 = vsel %vm2051_vm11, %v4689_v46, %v2048_v48 }
 0x54c   :  { %v2057_v35 = vsel %vm2054_vm12, %v2056_v31, %v2052_v6 }
 0x551   :  { %v4693_v58 = vpop.eup %4692 }
 0x552   :  { %v2063_v55 = vmul.f32 %v4693_v58, %v2057_v35 }
 0x554   :  { %v2072_v41 = vmul.f32 %v6037_v34, %v2063_v55 }
 0x556   :  { %v6042_v52 = vadd.f32 %v2079_v13, %v2072_v41  ;;  %v6745_v41 = vld [vmem:[#allocation76_spill] sm:$0xff] }
 0x558   :  { %v2084_v27 = vpack.c.bf16 %v6042_v52, %v6042_v52 }
 0x55a   :  { %2093 = vmatmul.bf16.vlgmr.msrb.gmra.mxu0 %v2084_v27  ;;  %2106 = vmatmul.bf16.vlgmr.msrb.gmra.mxu1 %v2084_v27 }
 0x55b   :  { %2119 = vmatmul.bf16.vlgmr.msrb.gmra.mxu2 %v2084_v27  ;;  %2132 = vmatmul.bf16.vlgmr.msrb.gmra.mxu3 %v2084_v27 }
 0x55c   :  { %2289 = vmatpush.bf16.msrb.mxu0 %v5185_v5  ;;  %2302 = vmatpush.bf16.msrb.mxu1 %v5187_v9  ;;  %v6712_v5 = vld [vmem:[#allocation24_spill] sm:$0xff]  ;;  %v6713_v9 = vld [vmem:[#allocation25_spill] sm:$0xff] }
 0x55d   :  { %2315 = vmatpush.bf16.msrb.mxu2 %v5203_v24  ;;  %2328 = vmatpush.bf16.msrb.mxu3 %v5189_v10  ;;  %v6714_v10 = vld [vmem:[#allocation26_spill] sm:$0xff] }
 0x55e   :  { %v6718_v24 = vld [vmem:[#allocation30_spill] sm:$0xff] }
 0x560   :  { %2290 = vmatpush.bf16.msrb.mxu0 %v5194_v14  ;;  %2303 = vmatpush.bf16.msrb.mxu1 %v5196_v19  ;;  %v6715_v14 = vld [vmem:[#allocation27_spill] sm:$0xff]  ;;  %v6716_v19 = vld [vmem:[#allocation28_spill] sm:$0xff] }
 0x561   :  { %2316 = vmatpush.bf16.msrb.mxu2 %v5215_v38  ;;  %2329 = vmatpush.bf16.msrb.mxu3 %v5198_v21  ;;  %v6717_v21 = vld [vmem:[#allocation29_spill] sm:$0xff]  ;;  %v6722_v38 = vld [vmem:[#allocation34_spill] sm:$0xff] }
 0x564   :  { %2291 = vmatpush.bf16.msrb.mxu0 %v5206_v28  ;;  %2304 = vmatpush.bf16.msrb.mxu1 %v5208_v32  ;;  %v6719_v28 = vld [vmem:[#allocation31_spill] sm:$0xff]  ;;  %v6720_v32 = vld [vmem:[#allocation32_spill] sm:$0xff] }
 0x565   :  { %2317 = vmatpush.bf16.msrb.mxu2 %v5222_v47  ;;  %2330 = vmatpush.bf16.msrb.mxu3 %v5210_v33  ;;  %v6721_v33 = vld [vmem:[#allocation33_spill] sm:$0xff] }
 0x566   :  { %v6725_v47 = vld [vmem:[#allocation37_spill] sm:$0xff] }
 0x568   :  { %2292 = vmatpush.bf16.msrb.mxu0 %v5217_v42  ;;  %2305 = vmatpush.bf16.msrb.mxu1 %v5219_v43  ;;  %v6723_v42 = vld [vmem:[#allocation35_spill] sm:$0xff]  ;;  %v6724_v43 = vld [vmem:[#allocation36_spill] sm:$0xff] }
 0x569   :  { %2318 = vmatpush.bf16.msrb.mxu2 %v5235_v54  ;;  %2331 = vmatpush.bf16.msrb.mxu3 %v5226_v49  ;;  %v6726_v49 = vld [vmem:[#allocation38_spill] sm:$0xff]  ;;  %v6727_v54 = vld [vmem:[#allocation39_spill] sm:$0xff] }
 0x56a   :  { %2145 = vmatmul.bf16.vlgmr.msra.gmra.mxu0 %v2084_v27  ;;  %2158 = vmatmul.bf16.vlgmr.msra.gmra.mxu1 %v2084_v27 }
 0x56b   :  { %2171 = vmatmul.bf16.vlgmr.msra.gmra.mxu2 %v2084_v27  ;;  %2184 = vmatmul.bf16.vlgmr.msra.gmra.mxu3 %v2084_v27 }
 0x56c   :  { %2293 = vmatpush.bf16.msrb.mxu0 %v5241_v59  ;;  %2306 = vmatpush.bf16.msrb.mxu1 %v5244_v63  ;;  %v6728_v59 = vld [vmem:[#allocation40_spill] sm:$0xff]  ;;  %v6729_v63 = vld [vmem:[#allocation41_spill] sm:$0xff] }
 0x56d   :  { %2319 = vmatpush.bf16.msrb.mxu2 %v5246_v1  ;;  %2332 = vmatpush.bf16.msrb.mxu3 %v5249_v4  ;;  %v6730_v1 = vld [vmem:[#allocation42_spill] sm:$0xff]  ;;  %v6731_v4 = vld [vmem:[#allocation43_spill] sm:$0xff] }
 0x570   :  { %2294 = vmatpush.bf16.msrb.mxu0 %v5254_v11  ;;  %2307 = vmatpush.bf16.msrb.mxu1 %v5256_v17  ;;  %v6732_v11 = vld [vmem:[#allocation44_spill] sm:$0xff]  ;;  %v6733_v17 = vld [vmem:[#allocation45_spill] sm:$0xff] }
 0x571   :  { %2320 = vmatpush.bf16.msrb.mxu2 %v5258_v18  ;;  %2333 = vmatpush.bf16.msrb.mxu3 %v5261_v25  ;;  %v6734_v18 = vld [vmem:[#allocation46_spill] sm:$0xff]  ;;  %v6735_v25 = vld [vmem:[#allocation47_spill] sm:$0xff] }
 0x574   :  { %2295 = vmatpush.bf16.msrb.mxu0 %v5264_v30  ;;  %2308 = vmatpush.bf16.msrb.mxu1 %v5268_v37  ;;  %v6736_v30 = vld [vmem:[#allocation48_spill] sm:$0xff]  ;;  %v6737_v37 = vld [vmem:[#allocation49_spill] sm:$0xff] }
 0x575   :  { %2321 = vmatpush.bf16.msrb.mxu2 %v5270_v39  ;;  %2334 = vmatpush.bf16.msrb.mxu3 %v5274_v44  ;;  %v6738_v39 = vld [vmem:[#allocation50_spill] sm:$0xff]  ;;  %v6739_v44 = vld [vmem:[#allocation51_spill] sm:$0xff] }
 0x578   :  { %2296 = vmatpush.bf16.msrb.mxu0 %v5284_v51  ;;  %2309 = vmatpush.bf16.msrb.mxu1 %v5294_v57  ;;  %v6740_v51 = vld [vmem:[#allocation52_spill] sm:$0xff] }
 0x579   :  { %2322 = vmatpush.bf16.msrb.mxu2 %v5302_v62  ;;  %2335 = vmatpush.bf16.msrb.mxu3 %v5304_v2 }
 0x57c   :  { %2341 = vmatpush.bf16.msra.mxu0 %v5308_v8  ;;  %2354 = vmatpush.bf16.msra.mxu1 %v5312_v22 }
 0x57d   :  { %2367 = vmatpush.bf16.msra.mxu2 %v5314_v23  ;;  %2380 = vmatpush.bf16.msra.mxu3 %v6712_v5 }
 0x580   :  { %2342 = vmatpush.bf16.msra.mxu0 %v6713_v9  ;;  %2355 = vmatpush.bf16.msra.mxu1 %v6714_v10 }
 0x581   :  { %2368 = vmatpush.bf16.msra.mxu2 %v6715_v14  ;;  %2381 = vmatpush.bf16.msra.mxu3 %v6716_v19 }
 0x584   :  { %2343 = vmatpush.bf16.msra.mxu0 %v6717_v21  ;;  %2356 = vmatpush.bf16.msra.mxu1 %v6718_v24 }
 0x585   :  { %2369 = vmatpush.bf16.msra.mxu2 %v6719_v28  ;;  %2382 = vmatpush.bf16.msra.mxu3 %v6720_v32 }
 0x588   :  { %2344 = vmatpush.bf16.msra.mxu0 %v6721_v33  ;;  %2357 = vmatpush.bf16.msra.mxu1 %v6722_v38 }
 0x589   :  { %2370 = vmatpush.bf16.msra.mxu2 %v6723_v42  ;;  %2383 = vmatpush.bf16.msra.mxu3 %v6724_v43 }
 0x58c   :  { %2345 = vmatpush.bf16.msra.mxu0 %v6725_v47  ;;  %2358 = vmatpush.bf16.msra.mxu1 %v6726_v49  ;;  %v6746_v47 = vld [vmem:[#allocation75_spill] sm:$0xff] }
 0x58d   :  { %2371 = vmatpush.bf16.msra.mxu2 %v6727_v54  ;;  %2384 = vmatpush.bf16.msra.mxu3 %v6728_v59 }
 0x590   :  { %2346 = vmatpush.bf16.msra.mxu0 %v6729_v63  ;;  %2359 = vmatpush.bf16.msra.mxu1 %v6730_v1 }
 0x591   :  { %2372 = vmatpush.bf16.msra.mxu2 %v6731_v4  ;;  %2385 = vmatpush.bf16.msra.mxu3 %v6732_v11 }
 0x594   :  { %2347 = vmatpush.bf16.msra.mxu0 %v6733_v17  ;;  %2360 = vmatpush.bf16.msra.mxu1 %v6734_v18  ;;  %v2081_v18 = vmul.f32 %v6037_v34, %v6032_v12 }
 0x595   :  { %2373 = vmatpush.bf16.msra.mxu2 %v6735_v25  ;;  %2386 = vmatpush.bf16.msra.mxu3 %v6736_v30 }
 0x598   :  { %2348 = vmatpush.bf16.msra.mxu0 %v6737_v37  ;;  %2361 = vmatpush.bf16.msra.mxu1 %v6738_v39 }
 0x599   :  { %2374 = vmatpush.bf16.msra.mxu2 %v6739_v44  ;;  %2387 = vmatpush.bf16.msra.mxu3 %v6740_v51 }
 0x5d7   :  { %v2094_v57 = vpop.f32.mrf.mxu0  ;;  %v2107_v62 = vpop.f32.mrf.mxu1 }
 0x5d8   :  { %v2189_v46 = vmul.f32 %v6741_v7, %v2094_v57  ;;  %v2190_v16 = vmul.f32 %v6741_v7, %v2107_v62 }
 0x5da   :  { %v2193_v3 = vadd.f32 %v2189_v46, %v6742_v26  ;;  %v2194_v50 = vadd.f32 %v2190_v16, %v6743_v36 }
 0x5de   :  { %v2120_v2 = vpop.f32.mrf.mxu2  ;;  %v2133_v8 = vpop.f32.mrf.mxu3 }
 0x5df   :  { %v2096_v22 = vpop.f32.mrf.mxu0  ;;  %v2109_v23 = vpop.f32.mrf.mxu1  ;;  %v2192_v6 = vmul.f32 %v6741_v7, %v2133_v8  ;;  %v2191_v38 = vmul.f32 %v6741_v7, %v2120_v2  ;;  %v2082_v2 = vmul.f32 %v6035_v15, %v6029_v20 }
 0x5e1   :  { %v2196_v13 = vadd.f32 %v2192_v6, %v6745_v41  ;;  %v2195_v49 = vadd.f32 %v2191_v38, %v6746_v47  ;;  %v6126_v46 = vadd.f32 %v2082_v2, %v2081_v18 }
 0x5e6   :  { %v2122_v0 = vpop.f32.mrf.mxu2  ;;  %v2135_v40 = vpop.f32.mrf.mxu3 }
 0x5e7   :  { %v2146_v53 = vpop.f32.mrf.mxu0  ;;  %v2159_v56 = vpop.f32.mrf.mxu1 }
 0x5e8   :  { %v2197_v45 = vmul.f32 %v2146_v53, %v6744_v61  ;;  %v2198_v48 = vmul.f32 %v2159_v56, %v6744_v61 }
 0x5ea   :  { %v2201_v29 = vadd.f32 %v2197_v45, %v2193_v3  ;;  %v2202_v60 = vadd.f32 %v2198_v48, %v2194_v50 }
 0x5ec   :  { %v3990_v31 = vmul.f32 -1.442695, %v2201_v29  ;;  %v3991_v58 = vmul.f32 -1.442695, %v2202_v60 }
 0x5ee   :  { %4694 = vpow2.f32 %v3990_v31  ;;  %v2172_v35 = vpop.f32.mrf.mxu2  ;;  %v2185_v55 = vpop.f32.mrf.mxu3 }
 0x5ef   :  { %4696 = vpow2.f32 %v3991_v58  ;;  %v2200_v27 = vmul.f32 %v2185_v55, %v6744_v61  ;;  %v2148_v5 = vpop.f32.mrf.mxu0  ;;  %v2161_v9 = vpop.f32.mrf.mxu1  ;;  %v2199_v42 = vmul.f32 %v2172_v35, %v6744_v61 }
 0x5f0   :  { %v6132_v35 = vpop.permute.xlu2 %2273  ;;  %v6134_v55 = vpop.permute.xlu0 %2280  ;;  %v2495_v9 = vld [vmem:[%s6371_s5 + $0x8] sm:$0xff] }
 0x5f1   :  { %v2204_v10 = vadd.f32 %v2200_v27, %v2196_v13  ;;  %v2203_v63 = vadd.f32 %v2199_v42, %v2195_v49  ;;  %v2283_v13 = vmul.f32 %v6134_v55, %v6042_v52  ;;  %v2492_v52 = vld [vmem:[%s6370_s4] sm:$0xff] }
 0x5f3   :  { %v3992_v14 = vmul.f32 -1.442695, %v2204_v10  ;;  %v2494_v10 = vld [vmem:[%s6371_s5] sm:$0xff] }
 0x5f4   :  { %v4695_v19 = vpop.eup %4694 }
 0x5f5   :  { %v4697_v21 = vpop.eup %4696  ;;  %v2208_v24 = vadd.f32 1.0, %v4695_v19  ;;  %4698 = vpow2.f32 %v3992_v14  ;;  %v2493_v14 = vld [vmem:[%s6370_s4 + $0x8] sm:$0xff] }
 0x5f6   :  { %v2227_v28 = vadd.f32 1.0, %v4697_v21  ;;  %v2174_v32 = vpop.f32.mrf.mxu2  ;;  %v2187_v33 = vpop.f32.mrf.mxu3 }
 0x5f7   :  { %4700 = vrcp.f32 %v2208_v24  ;;  %v2220_v30 = vand.u32 2147483648, %v2208_v24  ;;  %v2218_v44 = vand.u32 2147483647, %v2208_v24  ;;  %vm2214_vm15 = vweird.f32 %v2208_v24 }
 0x5f8   :  { %4702 = vrcp.f32 %v2227_v28  ;;  %v2239_v37 = vand.u32 2147483648, %v2227_v28  ;;  %v2237_v57 = vand.u32 2147483647, %v2227_v28  ;;  %vm2233_vm0 = vweird.f32 %v2227_v28 }
 0x5f9   :  { %v2221_v22 = vor.u32 1.1754944e-38, %v2220_v30  ;;  %vm2219_vm3 = vcmp.eq.f32.partialorder %v2218_v44, 8.507059e+37 }
 0x5fa   :  { %v2240_v23 = vor.u32 1.1754944e-38, %v2239_v37  ;;  %vm2238_vm4 = vcmp.eq.f32.partialorder %v2237_v57, 8.507059e+37 }
 0x5fb   :  { %v4699_v43 = vpop.eup %4698 }
 0x5fc   :  { %v2247_v54 = vadd.f32 1.0, %v4699_v43 }
 0x5fd   :  { %v4701_v59 = vpop.eup %4700 }
 0x5fe   :  { %v4703_v1 = vpop.eup %4702  ;;  %v2210_v4 = vmul.f32 %v4701_v59, %v2208_v24  ;;  %4704 = vrcp.f32 %v2247_v54  ;;  %vm2215_vm13 = vweird.f32 %v4701_v59  ;;  %v2259_v45 = vand.u32 2147483648, %v2247_v54 }
 0x5ff   :  { %v2229_v11 = vmul.f32 %v4703_v1, %v2227_v28  ;;  %4706 = vtanh.f32 %v2203_v63  ;;  %vm2234_vm14 = vweird.f32 %v4703_v1  ;;  %vm2216_vm1 = vmor %vm2214_vm15, %vm2215_vm13  ;;  %vm2253_vm6 = vweird.f32 %v2247_v54 }
 0x600   :  { %v2211_v17 = vsub.f32 1.0, %v2210_v4  ;;  %vm2235_vm2 = vmor %vm2233_vm0, %vm2234_vm14  ;;  %v2257_v48 = vand.u32 2147483647, %v2247_v54  ;;  %v2260_v60 = vor.u32 1.1754944e-38, %v2259_v45 }
 0x601   :  { %v2230_v25 = vsub.f32 1.0, %v2229_v11 }
 0x602   :  { %v2212_v39 = vmul.f32 %v4701_v59, %v2211_v17  ;;  %vm2258_vm8 = vcmp.eq.f32.partialorder %v2257_v48, 8.507059e+37 }
 0x603   :  { %v2231_v51 = vmul.f32 %v4703_v1, %v2230_v25 }
 0x604   :  { %v4705_v62 = vpop.eup %4704  ;;  %v2213_v8 = vadd.f32 %v4701_v59, %v2212_v39 }
 0x605   :  { %v2232_v12 = vadd.f32 %v4703_v1, %v2231_v51  ;;  %v2249_v34 = vmul.f32 %v4705_v62, %v2247_v54  ;;  %v4707_v0 = vpop.eup %4706  ;;  %vm2254_vm5 = vweird.f32 %v4705_v62  ;;  %v6749_v51 = vld [vmem:[#allocation79_spill] sm:$0xff] }
 0x606   :  { %v2217_v16 = vsel %vm2216_vm1, %v4701_v59, %v2213_v8  ;;  %vm2255_vm7 = vmor %vm2253_vm6, %vm2254_vm5  ;;  %v6747_v59 = vld [vmem:[#allocation77_spill] sm:$0xff]  ;;  %v6750_v8 = vld [vmem:[#allocation80_spill] sm:$0xff] }
 0x607   :  { %v2222_v40 = vsel %vm2219_vm3, %v2221_v22, %v2217_v16  ;;  %v2236_v53 = vsel %vm2235_vm2, %v4703_v1, %v2232_v12  ;;  %v2250_v56 = vsub.f32 1.0, %v2249_v34  ;;  %v6748_v1 = vld [vmem:[#allocation78_spill] sm:$0xff] }
 0x608   :  { %v2241_v26 = vsel %vm2238_vm4, %v2240_v23, %v2236_v53  ;;  %v2264_v20 = vmul.f32 %v4707_v0, %v2222_v40 }
 0x609   :  { %v2263_v15 = vmul.f32 %v2241_v26, %v6126_v46  ;;  %v2251_v3 = vmul.f32 %v4705_v62, %v2250_v56 }
 0x60b   :  { %v6129_v36 = vadd.f32 %v2264_v20, %v2263_v15  ;;  %v2252_v50 = vadd.f32 %v4705_v62, %v2251_v3 }
 0x60d   :  { %4708 = vtanh.f32 %v6129_v36  ;;  %v2256_v29 = vsel %vm2255_vm7, %v4705_v62, %v2252_v50 }
 0x60e   :  { %v2261_v31 = vsel %vm2258_vm8, %v2260_v60, %v2256_v29 }
 0x613   :  { %v4709_v6 = vpop.eup %4708 }
 0x614   :  { %v2267_v58 = vmul.f32 %v4709_v6, %v2261_v31 }
 0x616   :  { %v2276_v41 = vmul.f32 %v6132_v35, %v2267_v58  ;;  %v2285_v58 = vmul.f32 %v6132_v35, %v6129_v36 }
 0x618   :  { %v6139_v27 = vadd.f32 %v2283_v13, %v2276_v41 }
 0x61a   :  { %v2288_v5 = vpack.c.bf16 %v6139_v27, %v6139_v27 }
 0x61c   :  { %2297 = vmatmul.bf16.vlgmr.msrb.gmra.mxu0 %v2288_v5  ;;  %2310 = vmatmul.bf16.vlgmr.msrb.gmra.mxu1 %v2288_v5 }
 0x61d   :  { %2323 = vmatmul.bf16.vlgmr.msrb.gmra.mxu2 %v2288_v5  ;;  %2336 = vmatmul.bf16.vlgmr.msrb.gmra.mxu3 %v2288_v5 }
 0x61e   :  { %2517 = vmatpush.msrb.mxu2 %v2495_v9 }
 0x620   :  { %2518 = vmatpush.msrb.mxu2 %v2494_v10 }
 0x62c   :  { %2349 = vmatmul.bf16.vlgmr.msra.gmra.mxu0 %v2288_v5  ;;  %2362 = vmatmul.bf16.vlgmr.msra.gmra.mxu1 %v2288_v5 }
 0x62d   :  { %2375 = vmatmul.bf16.vlgmr.msra.gmra.mxu2 %v2288_v5  ;;  %2388 = vmatmul.bf16.vlgmr.msra.gmra.mxu3 %v2288_v5 }
 0x63d   :  { %3998 = vmatmul.msk.f32.vlgmr.msrb.gmra.mxu2 %vm2496_vm9, %v2492_v52 }
 0x645   :  { %3999 = vmatmul.msk.f32.gmra.mxu2 %vm2496_vm9, %v2493_v14 }
 0x699   :  { %v2298_v19 = vpop.f32.mrf.mxu0  ;;  %v2311_v21 = vpop.f32.mrf.mxu1 }
 0x69a   :  { %v2393_v38 = vmul.f32 %v6741_v7, %v2298_v19  ;;  %v2394_v42 = vmul.f32 %v6741_v7, %v2311_v21  ;;  %v2286_v21 = vmul.f32 %v6134_v55, %v6126_v46 }
 0x69c   :  { %v2397_v63 = vadd.f32 %v2393_v38, %v6747_v59  ;;  %v2398_v4 = vadd.f32 %v2394_v42, %v6748_v1 }
 0x6a0   :  { %v2324_v24 = vpop.f32.mrf.mxu2  ;;  %v2337_v28 = vpop.f32.mrf.mxu3 }
 0x6a1   :  { %v2300_v32 = vpop.f32.mrf.mxu0  ;;  %v2313_v33 = vpop.f32.mrf.mxu1  ;;  %v2395_v18 = vmul.f32 %v6741_v7, %v2324_v24  ;;  %v2396_v37 = vmul.f32 %v6741_v7, %v2337_v28 }
 0x6a2   :  { %v2287_v33 = vadd.f32 %v2286_v21, %v2285_v58 }
 0x6a3   :  { %v2399_v57 = vadd.f32 %v2395_v18, %v6749_v51  ;;  %v2400_v22 = vadd.f32 %v2396_v37, %v6750_v8  ;;  %v2478_v51 = vpop.permute.xlu1 %2477 }
 0x6a8   :  { %v2326_v43 = vpop.f32.mrf.mxu2  ;;  %v2339_v47 = vpop.f32.mrf.mxu3 }
 0x6a9   :  { %v2350_v49 = vpop.f32.mrf.mxu0  ;;  %v2363_v54 = vpop.f32.mrf.mxu1 }
 0x6aa   :  { %v2401_v11 = vmul.f32 %v2350_v49, %v6744_v61  ;;  %v2402_v17 = vmul.f32 %v2363_v54, %v6744_v61 }
 0x6ac   :  { %v2405_v25 = vadd.f32 %v2401_v11, %v2397_v63  ;;  %v2406_v30 = vadd.f32 %v2402_v17, %v2398_v4 }
 0x6ae   :  { %v3994_v39 = vmul.f32 -1.442695, %v2405_v25  ;;  %v3995_v44 = vmul.f32 -1.442695, %v2406_v30 }
 0x6b0   :  { %4710 = vpow2.f32 %v3994_v39  ;;  %v2376_v62 = vpop.f32.mrf.mxu2  ;;  %v2389_v2 = vpop.f32.mrf.mxu3 }
 0x6b1   :  { %4712 = vpow2.f32 %v3995_v44  ;;  %v2403_v12 = vmul.f32 %v2376_v62, %v6744_v61  ;;  %v2404_v34 = vmul.f32 %v2389_v2, %v6744_v61  ;;  %v2352_v23 = vpop.f32.mrf.mxu0  ;;  %v2365_v16 = vpop.f32.mrf.mxu1 }
 0x6b2   :  { %v2485_v44 = vpop.permute.xlu2 %2484 }
 0x6b3   :  { %v2407_v0 = vadd.f32 %v2403_v12, %v2399_v57  ;;  %v2408_v40 = vadd.f32 %v2404_v34, %v2400_v22  ;;  %v2487_v62 = vmul.f32 %v2485_v44, %v6139_v27  ;;  %v2526_v22 = vld [vmem:[%s6372_s6] sm:$0x3] }
 0x6b4   :  { %v2546_v12 = vld [vmem:[%s6373_s7] sm:$0x3]  ;;  %v2538_v34 = vperm.slane %v2526_v22, 0  ;;  %v2539_v23 = vperm.slane %v2526_v22, 1 }
 0x6b5   :  { %v3996_v53 = vmul.f32 -1.442695, %v2408_v40  ;;  %v2548_v16 = vperm.slane %v2546_v12, 0 }
 0x6b6   :  { %v4711_v7 = vpop.eup %4710 }
 0x6b7   :  { %v4713_v56 = vpop.eup %4712  ;;  %v2412_v26 = vadd.f32 1.0, %v4711_v7  ;;  %4714 = vpow2.f32 %v3996_v53 }
 0x6b8   :  { %v6169_v20 = vadd.f32 1.0, %v4713_v56  ;;  %v2378_v15 = vpop.f32.mrf.mxu2  ;;  %v2391_v3 = vpop.f32.mrf.mxu3 }
 0x6b9   :  { %4716 = vrcp.f32 %v2412_v26  ;;  %v2424_v13 = vand.u32 2147483648, %v2412_v26  ;;  %v2422_v10 = vand.u32 2147483647, %v2412_v26  ;;  %vm2418_vm12 = vweird.f32 %v2412_v26 }
 0x6ba   :  { %4718 = vrcp.f32 %v6169_v20  ;;  %v2443_v5 = vand.u32 2147483648, %v6169_v20  ;;  %v2441_v14 = vand.u32 2147483647, %v6169_v20  ;;  %vm2437_vm13 = vweird.f32 %v6169_v20 }
 0x6bb   :  { %v2425_v35 = vor.u32 1.1754944e-38, %v2424_v13  ;;  %vm2423_vm0 = vcmp.eq.f32.partialorder %v2422_v10, 8.507059e+37 }
 0x6bc   :  { %v2444_v32 = vor.u32 1.1754944e-38, %v2443_v5  ;;  %vm2442_vm1 = vcmp.eq.f32.partialorder %v2441_v14, 8.507059e+37 }
 0x6bd   :  { %v4715_v50 = vpop.eup %4714 }
 0x6be   :  { %v6175_v61 = vadd.f32 1.0, %v4715_v50 }
 0x6bf   :  { %v4717_v45 = vpop.eup %4716 }
 0x6c0   :  { %v4719_v48 = vpop.eup %4718  ;;  %v2414_v29 = vmul.f32 %v4717_v45, %v2412_v26  ;;  %4720 = vrcp.f32 %v6175_v61  ;;  %v2520_v60 = vpop.f32.mrf.mxu2  ;;  %vm2419_vm10 = vweird.f32 %v4717_v45  ;;  %v2463_v11 = vand.u32 2147483648, %v6175_v61 }
 0x6c1   :  { %v2433_v6 = vmul.f32 %v4719_v48, %v6169_v20  ;;  %2529 = vperm.xlu0 %4595, %v2520_v60   ;;  %4722 = vtanh.f32 %v2407_v0  ;;  %vm2438_vm11 = vweird.f32 %v4719_v48  ;;  %vm2420_vm14 = vmor %vm2418_vm12, %vm2419_vm10  ;;  %vm2457_vm3 = vweird.f32 %v6175_v61 }
 0x6c2   :  { %v2415_v31 = vsub.f32 1.0, %v2414_v29  ;;  %vm2439_vm15 = vmor %vm2437_vm13, %vm2438_vm11  ;;  %v2461_v17 = vand.u32 2147483647, %v6175_v61  ;;  %v2464_v25 = vor.u32 1.1754944e-38, %v2463_v11  ;;  %v2549_v0 = vperm.slane %v2546_v12, 1 }
 0x6c3   :  { %v2434_v41 = vsub.f32 1.0, %v2433_v6 }
 0x6c4   :  { %v2416_v9 = vmul.f32 %v4717_v45, %v2415_v31  ;;  %vm2462_vm5 = vcmp.eq.f32.partialorder %v2461_v17, 8.507059e+37 }
 0x6c5   :  { %v2435_v52 = vmul.f32 %v4719_v48, %v2434_v41 }
 0x6c6   :  { %v4721_v19 = vpop.eup %4720  ;;  %v2417_v36 = vadd.f32 %v4717_v45, %v2416_v9 }
 0x6c7   :  { %v2436_v24 = vadd.f32 %v4719_v48, %v2435_v52  ;;  %v2453_v28 = vmul.f32 %v4721_v19, %v6175_v61  ;;  %v4723_v46 = vpop.eup %4722  ;;  %vm2458_vm2 = vweird.f32 %v4721_v19 }
 0x6c8   :  { %v2421_v38 = vsel %vm2420_vm14, %v4717_v45, %v2417_v36  ;;  %v2523_v42 = vpop.f32.mrf.mxu2  ;;  %vm2459_vm4 = vmor %vm2457_vm3, %vm2458_vm2 }
 0x6c9   :  { %v2426_v55 = vsel %vm2423_vm0, %v2425_v35, %v2421_v38  ;;  %v2440_v43 = vsel %vm2439_vm15, %v4719_v48, %v2436_v24  ;;  %v2454_v47 = vsub.f32 1.0, %v2453_v28  ;;  %2534 = vperm.xlu1 %4596, %v2523_v42  }
 0x6ca   :  { %v2445_v49 = vsel %vm2442_vm1, %v2444_v32, %v2440_v43  ;;  %v2468_v54 = vmul.f32 %v4723_v46, %v2426_v55 }
 0x6cb   :  { %v2467_v59 = vmul.f32 %v2445_v49, %v2287_v33  ;;  %v2455_v63 = vmul.f32 %v4721_v19, %v2454_v47 }
 0x6cd   :  { %v2469_v1 = vadd.f32 %v2468_v54, %v2467_v59  ;;  %v2456_v4 = vadd.f32 %v4721_v19, %v2455_v63 }
 0x6cf   :  { %4724 = vtanh.f32 %v2469_v1  ;;  %v2460_v18 = vsel %vm2459_vm4, %v4721_v19, %v2456_v4 }
 0x6d0   :  { %v2465_v37 = vsel %vm2462_vm5, %v2464_v25, %v2460_v18 }
 0x6d5   :  { %v4725_v30 = vpop.eup %4724 }
 0x6d6   :  { %v2471_v39 = vmul.f32 %v4725_v30, %v2465_v37 }
 0x6d8   :  { %v2480_v57 = vmul.f32 %v2478_v51, %v2471_v39 }
 0x6da   :  { %v6198_v2 = vadd.f32 %v2487_v62, %v2480_v57 }
 0x6dc   :  { %v2490_v8 = vrot.slane %v6198_v2, 4 }
 0x733   :  { %v2530_v40 = vpop.permute.xlu0 %2529 }
 0x734   :  { %v2542_v53 = vmul.f32 %v2538_v34, %v2530_v40  ;;  %v2543_v7 = vmul.f32 %v2539_v23, %v2530_v40 }
 0x736   :  { %v6207_v27 = vadd.f32 %v2548_v16, %v2542_v53  ;;  %v6209_v56 = vadd.f32 %v2549_v0, %v2543_v7 }
 0x738   :  { %v2556_v26 = vmax.f32 %v6207_v27, 0.0  ;;  %v2557_v20 = vmax.f32 %v6209_v56, 0.0 }
 0x73b   :  { %v2535_v15 = vpop.permute.xlu1 %2534 }
 0x73c   :  { %v2544_v3 = vmul.f32 %v2538_v34, %v2535_v15  ;;  %v2545_v50 = vmul.f32 %v2539_v23, %v2535_v15 }
 0x73e   :  { %v6213_v61 = vadd.f32 %v2548_v16, %v2544_v3  ;;  %v6215_v45 = vadd.f32 %v2549_v0, %v2545_v50 }
 0x740   :  { %v2558_v48 = vmax.f32 %v6213_v61, 0.0  ;;  %v2559_v29 = vmax.f32 %v6215_v45, 0.0 }
 0x741   :  { %4849 = dma.done.wait [#allocation5], 4096 }
 0x742   :  { %4850 = vsyncadd [#allocation5], 4294963200  ;;  %v4058_v60 = vld [vmem:[#allocation2 + $0x70] sm:$0xf]  ;;  %v4504_v6 = vld [vmem:[#allocation2 + $0x74] sm:$0xf0] }
 0x743   :  { %v4122_v31 = vld [vmem:[#allocation2 + $0xf0] sm:$0xf]  ;;  %v4059_v58 = vor.u32 %v4504_v6, %v4058_v60  ;;  %v4520_v41 = vld [vmem:[#allocation2 + $0xf4] sm:$0xf0]  ;;  %v4503_v13 = vld [vmem:[#allocation2 + $0x74] sm:$0xf] }
 0x744   :  { %v4060_v5 = vld [vmem:[#allocation2 + $0x78] sm:$0xf0]  ;;  %v4123_v9 = vor.u32 %v4520_v41, %v4122_v31  ;;  %v4519_v52 = vld [vmem:[#allocation2 + $0xf4] sm:$0xf]  ;;  %v4050_v19 = vld [vmem:[#allocation2 + $0x60] sm:$0xf] }
 0x745   :  { %v4063_v10 = vor.u32 %v4503_v13, %v4060_v5  ;;  %v4124_v14 = vld [vmem:[#allocation2 + $0xf8] sm:$0xf0]  ;;  %2758 = vmatpush.bf16.msrb.mxu1 %v4059_v58  ;;  %v4502_v36 = vld [vmem:[#allocation2 + $0x64] sm:$0xf0]  ;;  %v4114_v35 = vld [vmem:[#allocation2 + $0xe0] sm:$0xf] }
 0x746   :  { %v4127_v21 = vor.u32 %v4519_v52, %v4124_v14  ;;  %v4518_v24 = vld [vmem:[#allocation2 + $0xe4] sm:$0xf0]  ;;  %2772 = vmatpush.bf16.msra.mxu2 %v4123_v9  ;;  %v4051_v28 = vor.u32 %v4502_v36, %v4050_v19  ;;  %v4501_v33 = vld [vmem:[#allocation2 + $0x64] sm:$0xf]  ;;  %v4052_v38 = vld [vmem:[#allocation2 + $0x68] sm:$0xf0] }
 0x747   :  { %2786 = vmatpush.bf16.msrb.mxu3 %v4063_v10  ;;  %v4115_v32 = vor.u32 %v4518_v24, %v4114_v35  ;;  %v4517_v42 = vld [vmem:[#allocation2 + $0xe4] sm:$0xf]  ;;  %v4055_v46 = vor.u32 %v4501_v33, %v4052_v38  ;;  %v4116_v55 = vld [vmem:[#allocation2 + $0xe8] sm:$0xf0]  ;;  %v4042_v43 = vld [vmem:[#allocation2 + $0x50] sm:$0xf] }
 0x748   :  { %2800 = vmatpush.bf16.msrb.mxu0 %v4127_v21  ;;  %v4500_v47 = vld [vmem:[#allocation2 + $0x54] sm:$0xf0]  ;;  %v4119_v49 = vor.u32 %v4517_v42, %v4116_v55  ;;  %v4106_v54 = vld [vmem:[#allocation2 + $0xd0] sm:$0xf]  ;;  %v4499_v63 = vld [vmem:[#allocation2 + $0x54] sm:$0xf] }
 0x749   :  { %v4516_v59 = vld [vmem:[#allocation2 + $0xd4] sm:$0xf0]  ;;  %2759 = vmatpush.bf16.msrb.mxu1 %v4051_v28  ;;  %v4043_v1 = vor.u32 %v4500_v47, %v4042_v43  ;;  %v4044_v4 = vld [vmem:[#allocation2 + $0x58] sm:$0xf0]  ;;  %v4515_v11 = vld [vmem:[#allocation2 + $0xd4] sm:$0xf] }
 0x74a   :  { %v4108_v17 = vld [vmem:[#allocation2 + $0xd8] sm:$0xf0]  ;;  %2773 = vmatpush.bf16.msra.mxu2 %v4115_v32  ;;  %v4107_v18 = vor.u32 %v4516_v59, %v4106_v54  ;;  %v4047_v25 = vor.u32 %v4499_v63, %v4044_v4  ;;  %v4034_v30 = vld [vmem:[#allocation2 + $0x40] sm:$0xf]  ;;  %v4498_v37 = vld [vmem:[#allocation2 + $0x44] sm:$0xf0] }
 0x74b   :  { %2787 = vmatpush.bf16.msrb.mxu3 %v4055_v46  ;;  %v4098_v39 = vld [vmem:[#allocation2 + $0xc0] sm:$0xf]  ;;  %v4111_v44 = vor.u32 %v4515_v11, %v4108_v17  ;;  %v4514_v51 = vld [vmem:[#allocation2 + $0xc4] sm:$0xf0]  ;;  %v4497_v57 = vld [vmem:[#allocation2 + $0x44] sm:$0xf]  ;;  %v4035_v34 = vor.u32 %v4498_v37, %v4034_v30 }
 0x74c   :  { %2801 = vmatpush.bf16.msrb.mxu0 %v4119_v49  ;;  %v4036_v62 = vld [vmem:[#allocation2 + $0x48] sm:$0xf0]  ;;  %v4513_v22 = vld [vmem:[#allocation2 + $0xc4] sm:$0xf]  ;;  %v4099_v23 = vor.u32 %v4514_v51, %v4098_v39  ;;  %v4026_v0 = vld [vmem:[#allocation2 + $0x30] sm:$0xf] }
 0x74d   :  { %v4100_v12 = vld [vmem:[#allocation2 + $0xc8] sm:$0xf0]  ;;  %2760 = vmatpush.bf16.msrb.mxu1 %v4043_v1  ;;  %v4039_v16 = vor.u32 %v4497_v57, %v4036_v62  ;;  %v4496_v40 = vld [vmem:[#allocation2 + $0x34] sm:$0xf0]  ;;  %v4090_v53 = vld [vmem:[#allocation2 + $0xb0] sm:$0xf] }
 0x74e   :  { %2774 = vmatpush.bf16.msra.mxu2 %v4107_v18  ;;  %v4103_v7 = vor.u32 %v4513_v22, %v4100_v12  ;;  %v4512_v15 = vld [vmem:[#allocation2 + $0xb4] sm:$0xf0]  ;;  %v4495_v3 = vld [vmem:[#allocation2 + $0x34] sm:$0xf]  ;;  %v4028_v50 = vld [vmem:[#allocation2 + $0x38] sm:$0xf0]  ;;  %v4027_v31 = vor.u32 %v4496_v40, %v4026_v0  ;;  %v2564_v22 = vpack.c.bf16 %v2558_v48, %v2556_v26  ;;  %v2565_v12 = vpack.c.bf16 %v2559_v29, %v2557_v20 }
 0x74f   :  { %2788 = vmatpush.bf16.msrb.mxu3 %v4047_v25  ;;  %v4511_v60 = vld [vmem:[#allocation2 + $0xb4] sm:$0xf]  ;;  %v4092_v6 = vld [vmem:[#allocation2 + $0xb8] sm:$0xf0]  ;;  %v4091_v58 = vor.u32 %v4512_v15, %v4090_v53  ;;  %v4031_v41 = vor.u32 %v4495_v3, %v4028_v50  ;;  %v4018_v13 = vld [vmem:[#allocation2 + $0x20] sm:$0xf] }
 0x750   :  { %2802 = vmatpush.bf16.msrb.mxu0 %v4111_v44  ;;  %v4494_v5 = vld [vmem:[#allocation2 + $0x24] sm:$0xf0]  ;;  %v4082_v9 = vld [vmem:[#allocation2 + $0xa0] sm:$0xf]  ;;  %v4095_v10 = vor.u32 %v4511_v60, %v4092_v6  ;;  %v4493_v14 = vld [vmem:[#allocation2 + $0x24] sm:$0xf] }
 0x751   :  { %2761 = vmatpush.bf16.msrb.mxu1 %v4035_v34  ;;  %v4510_v52 = vld [vmem:[#allocation2 + $0xa4] sm:$0xf0]  ;;  %v4020_v19 = vld [vmem:[#allocation2 + $0x28] sm:$0xf0]  ;;  %v4509_v21 = vld [vmem:[#allocation2 + $0xa4] sm:$0xf]  ;;  %v4019_v35 = vor.u32 %v4494_v5, %v4018_v13 }
 0x752   :  { %2775 = vmatpush.bf16.msra.mxu2 %v4099_v23  ;;  %v4084_v36 = vld [vmem:[#allocation2 + $0xa8] sm:$0xf0]  ;;  %v4083_v24 = vor.u32 %v4510_v52, %v4082_v9  ;;  %v4023_v28 = vor.u32 %v4493_v14, %v4020_v19  ;;  %v4010_v32 = vld [vmem:[#allocation2 + $0x10] sm:$0xf]  ;;  %v4492_v33 = vld [vmem:[#allocation2 + $0x14] sm:$0xf0] }
 0x753   :  { %2789 = vmatpush.bf16.msrb.mxu3 %v4039_v16  ;;  %v4074_v38 = vld [vmem:[#allocation2 + $0x90] sm:$0xf]  ;;  %v4087_v42 = vor.u32 %v4509_v21, %v4084_v36  ;;  %v4508_v46 = vld [vmem:[#allocation2 + $0x94] sm:$0xf0]  ;;  %v4491_v55 = vld [vmem:[#allocation2 + $0x14] sm:$0xf]  ;;  %v4011_v54 = vor.u32 %v4492_v33, %v4010_v32 }
 0x754   :  { %2803 = vmatpush.bf16.msrb.mxu0 %v4103_v7  ;;  %v4012_v43 = vld [vmem:[#allocation2 + $0x18] sm:$0xf0]  ;;  %v4507_v47 = vld [vmem:[#allocation2 + $0x94] sm:$0xf]  ;;  %v4075_v59 = vor.u32 %v4508_v46, %v4074_v38  ;;  %v4002_v1 = vld [vmem:[#allocation2] sm:$0xf] }
 0x755   :  { %2762 = vmatpush.bf16.msrb.mxu1 %v4027_v31  ;;  %v4076_v49 = vld [vmem:[#allocation2 + $0x98] sm:$0xf0]  ;;  %v4015_v63 = vor.u32 %v4491_v55, %v4012_v43  ;;  %v4490_v4 = vld [vmem:[#allocation2 + $0x4] sm:$0xf0]  ;;  %v4066_v11 = vld [vmem:[#allocation2 + $0x80] sm:$0xf] }
 0x756   :  { %2776 = vmatpush.bf16.msra.mxu2 %v4091_v58  ;;  %v4079_v17 = vor.u32 %v4507_v47, %v4076_v49  ;;  %v4506_v18 = vld [vmem:[#allocation2 + $0x84] sm:$0xf0]  ;;  %v4489_v25 = vld [vmem:[#allocation2 + $0x4] sm:$0xf]  ;;  %v4004_v30 = vld [vmem:[#allocation2 + $0x8] sm:$0xf0]  ;;  %v4003_v44 = vor.u32 %v4490_v4, %v4002_v1 }
 0x757   :  { %2790 = vmatpush.bf16.msrb.mxu3 %v4031_v41  ;;  %v4505_v37 = vld [vmem:[#allocation2 + $0x84] sm:$0xf]  ;;  %v4068_v39 = vld [vmem:[#allocation2 + $0x88] sm:$0xf0]  ;;  %v4067_v51 = vor.u32 %v4506_v18, %v4066_v11  ;;  %v4007_v57 = vor.u32 %v4489_v25, %v4004_v30  ;;  %v2816_v15 = vld [vmem:[%s6375_s9] sm:$0x3] }
 0x758   :  { %2804 = vmatpush.bf16.msrb.mxu0 %v4095_v10  ;;  %v4071_v62 = vor.u32 %v4505_v37, %v4068_v39  ;;  %v2814_v20 = vld [vmem:[%s6370_s4] sm:$0xff]  ;;  %v2815_v29 = vld [vmem:[%s6370_s4 + $0x8] sm:$0xff]  ;;  %v2818_v3 = vperm.slane %v2816_v15, 0  ;;  %v2819_v58 = vperm.slane %v2816_v15, 1 }
 0x759   :  { %2763 = vmatpush.bf16.msrb.mxu1 %v4019_v35  ;;  %v2878_v5 = vld [vmem:[%s6376_s10] sm:$0xf] }
 0x75a   :  { %2777 = vmatpush.bf16.msra.mxu2 %v4083_v24 }
 0x75b   :  { %2791 = vmatpush.bf16.msrb.mxu3 %v4023_v28 }
 0x75c   :  { %2805 = vmatpush.bf16.msrb.mxu0 %v4087_v42 }
 0x75d   :  { %2764 = vmatpush.bf16.msrb.mxu1 %v4011_v54 }
 0x75e   :  { %2778 = vmatpush.bf16.msra.mxu2 %v4075_v59 }
 0x75f   :  { %2792 = vmatpush.bf16.msrb.mxu3 %v4015_v63 }
 0x760   :  { %2806 = vmatpush.bf16.msrb.mxu0 %v4079_v17 }
 0x761   :  { %2765 = vmatpush.bf16.msrb.mxu1 %v4003_v44 }
 0x762   :  { %2779 = vmatpush.bf16.msra.mxu2 %v4067_v51 }
 0x763   :  { %2793 = vmatpush.bf16.msrb.mxu3 %v4007_v57 }
 0x764   :  { %2807 = vmatpush.bf16.msrb.mxu0 %v4071_v62  ;;  %2766 = vmatmul.bf16.vlgmr.msrb.gmra.mxu1 %v2564_v22 }
 0x765   :  { %2780 = vmatmul.bf16.vlgmr.msra.gmra.mxu2 %v2565_v12 }
 0x766   :  { %2794 = vmatmul.bf16.vlgmr.msrb.gmra.mxu3 %v2564_v22 }
 0x767   :  { %2808 = vmatmul.bf16.vlgmr.msrb.gmra.mxu0 %v2565_v12 }
 0x7e1   :  { %v2767_v34 = vpop.f32.mrf.mxu1 }
 0x7e4   :  { %v2809_v23 = vpop.f32.mrf.mxu0 }
 0x7e8   :  { %v2781_v16 = vpop.f32.mrf.mxu2 }
 0x7e9   :  { %v2795_v27 = vpop.f32.mrf.mxu3  ;;  %v2769_v0 = vpop.f32.mrf.mxu1  ;;  %v2782_v53 = vadd.f32 %v2781_v16, %v2767_v34 }
 0x7ea   :  { %v2810_v45 = vadd.f32 %v2809_v23, %v2795_v27 }
 0x7ec   :  { %v2811_v61 = vpop.f32.mrf.mxu0 }
 0x7f0   :  { %v2783_v26 = vpop.f32.mrf.mxu2 }
 0x7f1   :  { %v2797_v48 = vpop.f32.mrf.mxu3  ;;  %v2784_v40 = vadd.f32 %v2783_v26, %v2769_v0 }
 0x7f2   :  { %v2812_v56 = vadd.f32 %v2811_v61, %v2797_v48 }
 0x7f3   :  { %2842 = vmatpush.msra.mxu1 %v2784_v40 }
 0x7f4   :  { %2865 = vmatpush.msrb.mxu2 %v2812_v56 }
 0x7f5   :  { %2843 = vmatpush.msra.mxu1 %v2782_v53 }
 0x7f6   :  { %2866 = vmatpush.msrb.mxu2 %v2810_v45  ;;  %4128 = vmatmul.msk.f32.vlgmr.msra.gmra.mxu1 %vm2496_vm9, %v2814_v20 }
 0x7f7   :  { %4130 = vmatmul.msk.f32.vlgmr.msrb.gmra.mxu2 %vm2496_vm9, %v2814_v20 }
 0x7fe   :  { %4129 = vmatmul.msk.f32.gmra.mxu1 %vm2496_vm9, %v2815_v29 }
 0x7ff   :  { %4131 = vmatmul.msk.f32.gmra.mxu2 %vm2496_vm9, %v2815_v29 }
 0x873   :  { %v2845_v7 = vpop.f32.mrf.mxu1 }
 0x874   :  { %v2846_v6 = vadd.f32 %v2845_v7, %v2818_v3 }
 0x876   :  { %v2874_v13 = vmax.f32 %v2846_v6, 0.0 }
 0x87a   :  { %v2868_v50 = vpop.f32.mrf.mxu2 }
 0x87b   :  { %v2848_v60 = vpop.f32.mrf.mxu1  ;;  %v2869_v10 = vadd.f32 %v2868_v50, %v2819_v58 }
 0x87c   :  { %v2849_v31 = vadd.f32 %v2848_v60, %v2818_v3 }
 0x87d   :  { %v2875_v19 = vmax.f32 %v2869_v10, 0.0 }
 0x87e   :  { %v2876_v41 = vmax.f32 %v2849_v31, 0.0 }
 0x880   :  { %2896 = vmatpush.msra.mxu3 %v2876_v41 }
 0x882   :  { %v2871_v9 = vpop.f32.mrf.mxu2  ;;  %2897 = vmatpush.msra.mxu3 %v2874_v13 }
 0x883   :  { %v2872_v52 = vadd.f32 %v2871_v9, %v2819_v58  ;;  %4132 = vmatmul.msk.f32.vlgmr.msra.gmra.mxu3 %vm2496_vm9, %v2878_v5 }
 0x885   :  { %v2877_v14 = vmax.f32 %v2872_v52, 0.0 }
 0x887   :  { %2916 = vmatpush.msrb.mxu3 %v2877_v14 }
 0x889   :  { %2917 = vmatpush.msrb.mxu3 %v2875_v19 }
 0x88b   :  { %4133 = vmatmul.msk.f32.vlgmr.msrb.gmra.mxu3 %vm2496_vm9, %v2878_v5 }
 0x906   :  { %v6245_v21 = vpop.f32.mrf.mxu3 }
 0x90e   :  { %v6247_v36 = vpop.f32.mrf.mxu3 }
 0x90f   :  { %4851 = dma.done.wait [#allocation5 + $0x1], 4096 }
 0x910   :  { %4852 = vsyncadd [#allocation5 + $0x1], 4294963200 }
 0x911   :  { %4853 = dma.done.wait [#allocation5 + $0x2], 4096 }
 0x912   :  { %4854 = vsyncadd [#allocation5 + $0x2], 4294963200  ;;  %v4192_v35 = vld [vmem:[#allocation3 + $0x70] sm:$0xf]  ;;  %v4536_v24 = vld [vmem:[#allocation3 + $0x74] sm:$0xf0] }
 0x913   :  { %v4256_v28 = vld [vmem:[#allocation3 + $0xf0] sm:$0xf]  ;;  %v4193_v32 = vor.u32 %v4536_v24, %v4192_v35  ;;  %v4552_v33 = vld [vmem:[#allocation3 + $0xf4] sm:$0xf0]  ;;  %v4535_v38 = vld [vmem:[#allocation3 + $0x74] sm:$0xf] }
 0x914   :  { %v4194_v42 = vld [vmem:[#allocation3 + $0x78] sm:$0xf0]  ;;  %v4257_v46 = vor.u32 %v4552_v33, %v4256_v28  ;;  %v4551_v43 = vld [vmem:[#allocation3 + $0xf4] sm:$0xf]  ;;  %v4184_v49 = vld [vmem:[#allocation3 + $0x60] sm:$0xf] }
 0x915   :  { %v4197_v55 = vor.u32 %v4535_v38, %v4194_v42  ;;  %v4258_v47 = vld [vmem:[#allocation3 + $0xf8] sm:$0xf0]  ;;  %3126 = vmatpush.bf16.msra.mxu0 %v4193_v32  ;;  %v4534_v59 = vld [vmem:[#allocation3 + $0x64] sm:$0xf0]  ;;  %v4248_v63 = vld [vmem:[#allocation3 + $0xe0] sm:$0xf] }
 0x916   :  { %v4261_v54 = vor.u32 %v4551_v43, %v4258_v47  ;;  %v4550_v1 = vld [vmem:[#allocation3 + $0xe4] sm:$0xf0]  ;;  %3139 = vmatpush.bf16.msrb.mxu1 %v4257_v46  ;;  %v4185_v4 = vor.u32 %v4534_v59, %v4184_v49  ;;  %v4533_v17 = vld [vmem:[#allocation3 + $0x64] sm:$0xf]  ;;  %v4186_v18 = vld [vmem:[#allocation3 + $0x68] sm:$0xf0] }
 0x917   :  { %3152 = vmatpush.bf16.msra.mxu2 %v4197_v55  ;;  %v4249_v11 = vor.u32 %v4550_v1, %v4248_v63  ;;  %v4549_v25 = vld [vmem:[#allocation3 + $0xe4] sm:$0xf]  ;;  %v4189_v30 = vor.u32 %v4533_v17, %v4186_v18  ;;  %v4250_v37 = vld [vmem:[#allocation3 + $0xe8] sm:$0xf0]  ;;  %v4176_v39 = vld [vmem:[#allocation3 + $0x50] sm:$0xf] }
 0x918   :  { %3165 = vmatpush.bf16.msra.mxu3 %v4261_v54  ;;  %v4532_v44 = vld [vmem:[#allocation3 + $0x54] sm:$0xf0]  ;;  %v4253_v51 = vor.u32 %v4549_v25, %v4250_v37  ;;  %v4240_v57 = vld [vmem:[#allocation3 + $0xd0] sm:$0xf]  ;;  %v4531_v22 = vld [vmem:[#allocation3 + $0x54] sm:$0xf] }
 0x919   :  { %v4548_v62 = vld [vmem:[#allocation3 + $0xd4] sm:$0xf0]  ;;  %3127 = vmatpush.bf16.msra.mxu0 %v4185_v4  ;;  %v4177_v12 = vor.u32 %v4532_v44, %v4176_v39  ;;  %v4178_v34 = vld [vmem:[#allocation3 + $0x58] sm:$0xf0]  ;;  %v4547_v23 = vld [vmem:[#allocation3 + $0xd4] sm:$0xf] }
 0x91a   :  { %v4242_v16 = vld [vmem:[#allocation3 + $0xd8] sm:$0xf0]  ;;  %3140 = vmatpush.bf16.msrb.mxu1 %v4249_v11  ;;  %v4241_v27 = vor.u32 %v4548_v62, %v4240_v57  ;;  %v4181_v0 = vor.u32 %v4531_v22, %v4178_v34  ;;  %v4168_v61 = vld [vmem:[#allocation3 + $0x40] sm:$0xf]  ;;  %v4530_v26 = vld [vmem:[#allocation3 + $0x44] sm:$0xf0] }
 0x91b   :  { %3153 = vmatpush.bf16.msra.mxu2 %v4189_v30  ;;  %v4232_v48 = vld [vmem:[#allocation3 + $0xc0] sm:$0xf]  ;;  %v4245_v40 = vor.u32 %v4547_v23, %v4242_v16  ;;  %v4546_v56 = vld [vmem:[#allocation3 + $0xc4] sm:$0xf0]  ;;  %v4529_v53 = vld [vmem:[#allocation3 + $0x44] sm:$0xf]  ;;  %v4169_v7 = vor.u32 %v4530_v26, %v4168_v61 }
 0x91c   :  { %3166 = vmatpush.bf16.msra.mxu3 %v4253_v51  ;;  %v4170_v45 = vld [vmem:[#allocation3 + $0x48] sm:$0xf0]  ;;  %v4545_v20 = vld [vmem:[#allocation3 + $0xc4] sm:$0xf]  ;;  %v4233_v15 = vor.u32 %v4546_v56, %v4232_v48  ;;  %v4160_v50 = vld [vmem:[#allocation3 + $0x30] sm:$0xf] }
 0x91d   :  { %v4234_v29 = vld [vmem:[#allocation3 + $0xc8] sm:$0xf0]  ;;  %3128 = vmatpush.bf16.msra.mxu0 %v4177_v12  ;;  %v4173_v3 = vor.u32 %v4529_v53, %v4170_v45  ;;  %v4528_v60 = vld [vmem:[#allocation3 + $0x34] sm:$0xf0]  ;;  %v4224_v6 = vld [vmem:[#allocation3 + $0xb0] sm:$0xf] }
 0x91e   :  { %3141 = vmatpush.bf16.msrb.mxu1 %v4241_v27  ;;  %v4237_v31 = vor.u32 %v4545_v20, %v4234_v29  ;;  %v4544_v58 = vld [vmem:[#allocation3 + $0xb4] sm:$0xf0]  ;;  %v4527_v41 = vld [vmem:[#allocation3 + $0x34] sm:$0xf]  ;;  %v4162_v13 = vld [vmem:[#allocation3 + $0x38] sm:$0xf0]  ;;  %v4161_v10 = vor.u32 %v4528_v60, %v4160_v50 }
 0x91f   :  { %3154 = vmatpush.bf16.msra.mxu2 %v4181_v0  ;;  %v4543_v5 = vld [vmem:[#allocation3 + $0xb4] sm:$0xf]  ;;  %v4226_v9 = vld [vmem:[#allocation3 + $0xb8] sm:$0xf0]  ;;  %v4225_v52 = vor.u32 %v4544_v58, %v4224_v6  ;;  %v4165_v14 = vor.u32 %v4527_v41, %v4162_v13  ;;  %v4152_v19 = vld [vmem:[#allocation3 + $0x20] sm:$0xf] }
 0x920   :  { %3167 = vmatpush.bf16.msra.mxu3 %v4245_v40  ;;  %v4526_v35 = vld [vmem:[#allocation3 + $0x24] sm:$0xf0]  ;;  %v4216_v24 = vld [vmem:[#allocation3 + $0xa0] sm:$0xf]  ;;  %v4229_v28 = vor.u32 %v4543_v5, %v4226_v9  ;;  %v4525_v33 = vld [vmem:[#allocation3 + $0x24] sm:$0xf]  ;;  %v2926_v5 = vpack.c.bf16 %v6198_v2, %v6198_v2 }
 0x921   :  { %3129 = vmatpush.bf16.msra.mxu0 %v4169_v7  ;;  %v4542_v32 = vld [vmem:[#allocation3 + $0xa4] sm:$0xf0]  ;;  %v4154_v38 = vld [vmem:[#allocation3 + $0x28] sm:$0xf0]  ;;  %v4541_v42 = vld [vmem:[#allocation3 + $0xa4] sm:$0xf]  ;;  %v4153_v55 = vor.u32 %v4526_v35, %v4152_v19 }
 0x922   :  { %3142 = vmatpush.bf16.msrb.mxu1 %v4233_v15  ;;  %v4218_v46 = vld [vmem:[#allocation3 + $0xa8] sm:$0xf0]  ;;  %v4217_v43 = vor.u32 %v4542_v32, %v4216_v24  ;;  %v4157_v47 = vor.u32 %v4525_v33, %v4154_v38  ;;  %v4144_v49 = vld [vmem:[#allocation3 + $0x10] sm:$0xf]  ;;  %v4524_v54 = vld [vmem:[#allocation3 + $0x14] sm:$0xf0] }
 0x923   :  { %3155 = vmatpush.bf16.msra.mxu2 %v4173_v3  ;;  %v4208_v59 = vld [vmem:[#allocation3 + $0x90] sm:$0xf]  ;;  %v4221_v63 = vor.u32 %v4541_v42, %v4218_v46  ;;  %v4540_v1 = vld [vmem:[#allocation3 + $0x94] sm:$0xf0]  ;;  %v4523_v4 = vld [vmem:[#allocation3 + $0x14] sm:$0xf]  ;;  %v4145_v25 = vor.u32 %v4524_v54, %v4144_v49 }
 0x924   :  { %3168 = vmatpush.bf16.msra.mxu3 %v4237_v31  ;;  %v4146_v11 = vld [vmem:[#allocation3 + $0x18] sm:$0xf0]  ;;  %v4539_v17 = vld [vmem:[#allocation3 + $0x94] sm:$0xf]  ;;  %v4136_v30 = vld [vmem:[#allocation3] sm:$0xf]  ;;  %v4209_v39 = vor.u32 %v4540_v1, %v4208_v59 }
 0x925   :  { %3130 = vmatpush.bf16.msra.mxu0 %v4161_v10  ;;  %v4210_v18 = vld [vmem:[#allocation3 + $0x98] sm:$0xf0]  ;;  %v4522_v37 = vld [vmem:[#allocation3 + $0x4] sm:$0xf0]  ;;  %v4149_v44 = vor.u32 %v4523_v4, %v4146_v11  ;;  %v4200_v51 = vld [vmem:[#allocation3 + $0x80] sm:$0xf] }
 0x926   :  { %3143 = vmatpush.bf16.msrb.mxu1 %v4225_v52  ;;  %v4538_v57 = vld [vmem:[#allocation3 + $0x84] sm:$0xf0]  ;;  %v4521_v62 = vld [vmem:[#allocation3 + $0x4] sm:$0xf]  ;;  %v4213_v22 = vor.u32 %v4539_v17, %v4210_v18  ;;  %v4138_v12 = vld [vmem:[#allocation3 + $0x8] sm:$0xf0]  ;;  %v4137_v61 = vor.u32 %v4522_v37, %v4136_v30  ;;  %v2927_v52 = vpack.c.bf16 %v2490_v8, %v2490_v8 }
 0x927   :  { %3156 = vmatpush.bf16.msra.mxu2 %v4165_v14  ;;  %v4537_v34 = vld [vmem:[#allocation3 + $0x84] sm:$0xf]  ;;  %v4202_v23 = vld [vmem:[#allocation3 + $0x88] sm:$0xf0]  ;;  %v4320_v16 = vld [vmem:[#allocation4 + $0x70] sm:$0xf]  ;;  %v4201_v56 = vor.u32 %v4538_v57, %v4200_v51  ;;  %v4141_v53 = vor.u32 %v4521_v62, %v4138_v12 }
 0x928   :  { %3169 = vmatpush.bf16.msra.mxu3 %v4229_v28  ;;  %v4568_v27 = vld [vmem:[#allocation4 + $0x74] sm:$0xf0]  ;;  %v4384_v0 = vld [vmem:[#allocation4 + $0xf0] sm:$0xf]  ;;  %v4567_v48 = vld [vmem:[#allocation4 + $0x74] sm:$0xf]  ;;  %v4205_v29 = vor.u32 %v4537_v34, %v4202_v23 }
 0x929   :  { %3131 = vmatpush.bf16.msra.mxu0 %v4153_v55  ;;  %v4584_v26 = vld [vmem:[#allocation4 + $0xf4] sm:$0xf0]  ;;  %v4322_v40 = vld [vmem:[#allocation4 + $0x78] sm:$0xf0]  ;;  %v4583_v45 = vld [vmem:[#allocation4 + $0xf4] sm:$0xf]  ;;  %v4321_v7 = vor.u32 %v4568_v27, %v4320_v16 }
 0x92a   :  { %3144 = vmatpush.bf16.msrb.mxu1 %v4217_v43  ;;  %v4386_v20 = vld [vmem:[#allocation4 + $0xf8] sm:$0xf0]  ;;  %v4385_v15 = vor.u32 %v4584_v26, %v4384_v0  ;;  %v4325_v3 = vor.u32 %v4567_v48, %v4322_v40  ;;  %v4312_v50 = vld [vmem:[#allocation4 + $0x60] sm:$0xf]  ;;  %v4566_v60 = vld [vmem:[#allocation4 + $0x64] sm:$0xf0] }
 0x92b   :  { %3157 = vmatpush.bf16.msra.mxu2 %v4157_v47  ;;  %v4376_v6 = vld [vmem:[#allocation4 + $0xe0] sm:$0xf]  ;;  %v4389_v31 = vor.u32 %v4583_v45, %v4386_v20  ;;  %v4582_v58 = vld [vmem:[#allocation4 + $0xe4] sm:$0xf0]  ;;  %v4565_v41 = vld [vmem:[#allocation4 + $0x64] sm:$0xf]  ;;  %v4313_v14 = vor.u32 %v4566_v60, %v4312_v50 }
 0x92c   :  { %3170 = vmatpush.bf16.msra.mxu3 %v4221_v63  ;;  %v4314_v13 = vld [vmem:[#allocation4 + $0x68] sm:$0xf0]  ;;  %v4581_v9 = vld [vmem:[#allocation4 + $0xe4] sm:$0xf]  ;;  %v4377_v19 = vor.u32 %v4582_v58, %v4376_v6  ;;  %v4304_v24 = vld [vmem:[#allocation4 + $0x50] sm:$0xf] }
 0x92d   :  { %3132 = vmatpush.bf16.msra.mxu0 %v4145_v25  ;;  %v4378_v10 = vld [vmem:[#allocation4 + $0xe8] sm:$0xf0]  ;;  %v4317_v35 = vor.u32 %v4565_v41, %v4314_v13  ;;  %v4564_v28 = vld [vmem:[#allocation4 + $0x54] sm:$0xf0]  ;;  %v4368_v32 = vld [vmem:[#allocation4 + $0xd0] sm:$0xf] }
 0x92e   :  { %3145 = vmatpush.bf16.msrb.mxu1 %v4209_v39  ;;  %v4381_v33 = vor.u32 %v4581_v9, %v4378_v10  ;;  %v4580_v38 = vld [vmem:[#allocation4 + $0xd4] sm:$0xf0]  ;;  %v4563_v42 = vld [vmem:[#allocation4 + $0x54] sm:$0xf]  ;;  %v4306_v46 = vld [vmem:[#allocation4 + $0x58] sm:$0xf0]  ;;  %v4305_v8 = vor.u32 %v4564_v28, %v4304_v24 }
 0x92f   :  { %3158 = vmatpush.bf16.msra.mxu2 %v4149_v44  ;;  %v4579_v55 = vld [vmem:[#allocation4 + $0xd4] sm:$0xf]  ;;  %v4370_v2 = vld [vmem:[#allocation4 + $0xd8] sm:$0xf0]  ;;  %v4369_v43 = vor.u32 %v4580_v38, %v4368_v32  ;;  %v4309_v47 = vor.u32 %v4563_v42, %v4306_v46  ;;  %v4296_v49 = vld [vmem:[#allocation4 + $0x40] sm:$0xf] }
 0x930   :  { %3171 = vmatpush.bf16.msra.mxu3 %v4213_v22  ;;  %v4562_v54 = vld [vmem:[#allocation4 + $0x44] sm:$0xf0]  ;;  %v4360_v59 = vld [vmem:[#allocation4 + $0xc0] sm:$0xf]  ;;  %v4373_v63 = vor.u32 %v4579_v55, %v4370_v2  ;;  %v4561_v4 = vld [vmem:[#allocation4 + $0x44] sm:$0xf] }
 0x931   :  { %3133 = vmatpush.bf16.msra.mxu0 %v4137_v61  ;;  %v4578_v1 = vld [vmem:[#allocation4 + $0xc4] sm:$0xf0]  ;;  %v4298_v11 = vld [vmem:[#allocation4 + $0x48] sm:$0xf0]  ;;  %v4577_v17 = vld [vmem:[#allocation4 + $0xc4] sm:$0xf]  ;;  %v4297_v25 = vor.u32 %v4562_v54, %v4296_v49  ;;  %v3179_v54 = vpack.c.bf16 %v6247_v36, %v6247_v36 }
 0x932   :  { %3146 = vmatpush.bf16.msrb.mxu1 %v4201_v56  ;;  %v4362_v18 = vld [vmem:[#allocation4 + $0xc8] sm:$0xf0]  ;;  %v4288_v30 = vld [vmem:[#allocation4 + $0x30] sm:$0xf]  ;;  %v4361_v37 = vor.u32 %v4578_v1, %v4360_v59  ;;  %v4301_v39 = vor.u32 %v4561_v4, %v4298_v11  ;;  %v4560_v44 = vld [vmem:[#allocation4 + $0x34] sm:$0xf0] }
 0x933   :  { %3159 = vmatpush.bf16.msra.mxu2 %v4141_v53  ;;  %v4352_v51 = vld [vmem:[#allocation4 + $0xb0] sm:$0xf]  ;;  %v4576_v57 = vld [vmem:[#allocation4 + $0xb4] sm:$0xf0]  ;;  %v4365_v62 = vor.u32 %v4577_v17, %v4362_v18  ;;  %v4559_v22 = vld [vmem:[#allocation4 + $0x34] sm:$0xf]  ;;  %v4289_v16 = vor.u32 %v4560_v44, %v4288_v30 }
 0x934   :  { %3172 = vmatpush.bf16.msra.mxu3 %v4205_v29  ;;  %3134 = vmatmul.bf16.vlgmr.msra.gmra.mxu0 %v2926_v5  ;;  %v4290_v12 = vld [vmem:[#allocation4 + $0x38] sm:$0xf0]  ;;  %v4575_v34 = vld [vmem:[#allocation4 + $0xb4] sm:$0xf]  ;;  %v4353_v27 = vor.u32 %v4576_v57, %v4352_v51  ;;  %v4280_v61 = vld [vmem:[#allocation4 + $0x20] sm:$0xf] }
 0x935   :  { %3378 = vmatpush.bf16.msrb.mxu0 %v4321_v7  ;;  %3147 = vmatmul.bf16.vlgmr.msrb.gmra.mxu1 %v2927_v52  ;;  %v4354_v23 = vld [vmem:[#allocation4 + $0xb8] sm:$0xf0]  ;;  %v4293_v0 = vor.u32 %v4559_v22, %v4290_v12  ;;  %v4558_v26 = vld [vmem:[#allocation4 + $0x24] sm:$0xf0]  ;;  %v4344_v48 = vld [vmem:[#allocation4 + $0xa0] sm:$0xf] }
 0x936   :  { %3391 = vmatpush.bf16.msra.mxu1 %v4385_v15  ;;  %3160 = vmatmul.bf16.vlgmr.msra.gmra.mxu2 %v2926_v5  ;;  %v4357_v40 = vor.u32 %v4575_v34, %v4354_v23  ;;  %v4574_v56 = vld [vmem:[#allocation4 + $0xa4] sm:$0xf0]  ;;  %v4557_v53 = vld [vmem:[#allocation4 + $0x24] sm:$0xf]  ;;  %v4282_v45 = vld [vmem:[#allocation4 + $0x28] sm:$0xf0]  ;;  %v4281_v7 = vor.u32 %v4558_v26, %v4280_v61 }
 0x937   :  { %3404 = vmatpush.bf16.msrb.mxu2 %v4325_v3  ;;  %3173 = vmatmul.bf16.vlgmr.msra.gmra.mxu3 %v2927_v52  ;;  %v4573_v20 = vld [vmem:[#allocation4 + $0xa4] sm:$0xf]  ;;  %v4346_v29 = vld [vmem:[#allocation4 + $0xa8] sm:$0xf0]  ;;  %v4345_v15 = vor.u32 %v4574_v56, %v4344_v48  ;;  %v4285_v3 = vor.u32 %v4557_v53, %v4282_v45  ;;  %v4272_v50 = vld [vmem:[#allocation4 + $0x10] sm:$0xf] }
 0x938   :  { %3417 = vmatpush.bf16.msrb.mxu3 %v4389_v31  ;;  %v4556_v60 = vld [vmem:[#allocation4 + $0x14] sm:$0xf0]  ;;  %v4336_v6 = vld [vmem:[#allocation4 + $0x90] sm:$0xf]  ;;  %v4349_v31 = vor.u32 %v4573_v20, %v4346_v29  ;;  %v4555_v41 = vld [vmem:[#allocation4 + $0x14] sm:$0xf] }
 0x939   :  { %3379 = vmatpush.bf16.msrb.mxu0 %v4313_v14  ;;  %v4572_v58 = vld [vmem:[#allocation4 + $0x94] sm:$0xf0]  ;;  %v4274_v13 = vld [vmem:[#allocation4 + $0x18] sm:$0xf0]  ;;  %v4571_v5 = vld [vmem:[#allocation4 + $0x94] sm:$0xf]  ;;  %v4273_v10 = vor.u32 %v4556_v60, %v4272_v50 }
 0x93a   :  { %3392 = vmatpush.bf16.msra.mxu1 %v4377_v19  ;;  %v4338_v9 = vld [vmem:[#allocation4 + $0x98] sm:$0xf0]  ;;  %v4337_v52 = vor.u32 %v4572_v58, %v4336_v6  ;;  %v4277_v14 = vor.u32 %v4555_v41, %v4274_v13  ;;  %v4264_v19 = vld [vmem:[#allocation4] sm:$0xf]  ;;  %v4570_v32 = vld [vmem:[#allocation4 + $0x84] sm:$0xf0] }
 0x93b   :  { %3405 = vmatpush.bf16.msrb.mxu2 %v4317_v35  ;;  %v4554_v35 = vld [vmem:[#allocation4 + $0x4] sm:$0xf0]  ;;  %v4328_v24 = vld [vmem:[#allocation4 + $0x80] sm:$0xf]  ;;  %v4341_v28 = vor.u32 %v4571_v5, %v4338_v9  ;;  %v4266_v38 = vld [vmem:[#allocation4 + $0x8] sm:$0xf0] }
 0x93c   :  { %3418 = vmatpush.bf16.msrb.mxu3 %v4381_v33  ;;  %v4553_v33 = vld [vmem:[#allocation4 + $0x4] sm:$0xf]  ;;  %v4330_v46 = vld [vmem:[#allocation4 + $0x88] sm:$0xf0]  ;;  %v4265_v55 = vor.u32 %v4554_v35, %v4264_v19  ;;  %v4329_v2 = vor.u32 %v4570_v32, %v4328_v24  ;;  %v3449_v49 = vld [vmem:[%s6381_s15 + $0x78] sm:$0xff]  ;;  %s3519_s7 = sshll.u32 %s6383_s17, 4  ;;  %s3520_s7 = int_to_ptr.hbm [resolvable:$true] %s3519_s7 }
 0x93d   :  { %3380 = vmatpush.bf16.msrb.mxu0 %v4305_v8  ;;  %v4569_v42 = vld [vmem:[#allocation4 + $0x84] sm:$0xf]  ;;  %v4269_v8 = vor.u32 %v4553_v33, %v4266_v38  ;;  %v3447_v59 = vld [vmem:[%s6381_s15 + $0x68] sm:$0xff]  ;;  %v3445_v1 = vld [vmem:[%s6381_s15 + $0x58] sm:$0xff]  ;;  %vm3510_vm6 = vcmask 60416  }
 0x93e   :  { %3393 = vmatpush.bf16.msra.mxu1 %v4369_v43  ;;  %v4333_v43 = vor.u32 %v4569_v42, %v4330_v46  ;;  %v3446_v36 = vld [vmem:[%s6381_s15 + $0x60] sm:$0xff]  ;;  %v3464_v4 = vld [vmem:[%s6381_s15 + $0xf0] sm:$0xff]  ;;  %v3463_v17 = vld [vmem:[%s6381_s15 + $0xe8] sm:$0xff] }
 0x93f   :  { %3406 = vmatpush.bf16.msrb.mxu2 %v4309_v47  ;;  %v3178_v47 = vpack.c.bf16 %v6245_v21, %v6245_v21  ;;  %v3448_v21 = vld [vmem:[%s6381_s15 + $0x70] sm:$0xff]  ;;  %v3443_v18 = vld [vmem:[%s6381_s15 + $0x48] sm:$0xff]  ;;  %v3442_v30 = vld [vmem:[%s6381_s15 + $0x40] sm:$0xff] }
 0x940   :  { %3419 = vmatpush.bf16.msrb.mxu3 %v4373_v63  ;;  %v3465_v63 = vld [vmem:[%s6381_s15 + $0xf8] sm:$0xff]  ;;  %v3444_v11 = vld [vmem:[%s6381_s15 + $0x50] sm:$0xff]  ;;  %v3459_v57 = vld [vmem:[%s6381_s15 + $0xc8] sm:$0xff] }
 0x941   :  { %3381 = vmatpush.bf16.msrb.mxu0 %v4297_v25  ;;  %v3462_v25 = vld [vmem:[%s6381_s15 + $0xe0] sm:$0xff]  ;;  %v3460_v44 = vld [vmem:[%s6381_s15 + $0xd0] sm:$0xff]  ;;  %v3457_v34 = vld [vmem:[%s6381_s15 + $0xb8] sm:$0xff] }
 0x942   :  { %3394 = vmatpush.bf16.msra.mxu1 %v4361_v37  ;;  %v3461_v37 = vld [vmem:[%s6381_s15 + $0xd8] sm:$0xff]  ;;  %v3440_v51 = vld [vmem:[%s6381_s15 + $0x30] sm:$0xff]  ;;  %v3458_v22 = vld [vmem:[%s6381_s15 + $0xc0] sm:$0xff] }
 0x943   :  { %3407 = vmatpush.bf16.msrb.mxu2 %v4301_v39  ;;  %v3441_v39 = vld [vmem:[%s6381_s15 + $0x38] sm:$0xff]  ;;  %v3438_v12 = vld [vmem:[%s6381_s15 + $0x20] sm:$0xff]  ;;  %v3436_v61 = vld [vmem:[%s6381_s15 + $0x10] sm:$0xff] }
 0x944   :  { %3420 = vmatpush.bf16.msrb.mxu3 %v4365_v62  ;;  %v3439_v62 = vld [vmem:[%s6381_s15 + $0x28] sm:$0xff]  ;;  %v3437_v23 = vld [vmem:[%s6381_s15 + $0x18] sm:$0xff]  ;;  %v3434_v53 = vld [vmem:[%s6381_s15] sm:$0xff] }
 0x945   :  { %3382 = vmatpush.bf16.msrb.mxu0 %v4289_v16  ;;  %v3456_v16 = vld [vmem:[%s6381_s15 + $0xb0] sm:$0xff]  ;;  %v3455_v26 = vld [vmem:[%s6381_s15 + $0xa8] sm:$0xff]  ;;  %v3453_v45 = vld [vmem:[%s6381_s15 + $0x98] sm:$0xff] }
 0x946   :  { %3395 = vmatpush.bf16.msra.mxu1 %v4353_v27  ;;  %v3435_v48 = vld [vmem:[%s6381_s15 + $0x8] sm:$0xff]  ;;  %v3452_v29 = vld [vmem:[%s6381_s15 + $0x90] sm:$0xff]  ;;  %v3450_v50 = vld [vmem:[%s6381_s15 + $0x80] sm:$0xff] }
 0x947   :  { %3408 = vmatpush.bf16.msrb.mxu2 %v4293_v0  ;;  %v3212_v58 = vld [vmem:[%s6380_s14] sm:$0x3] }
 0x948   :  { %3421 = vmatpush.bf16.msrb.mxu3 %v4357_v40  ;;  %v3454_v40 = vld [vmem:[%s6381_s15 + $0xa0] sm:$0xff]  ;;  %v3214_v13 = vperm.slane %v3212_v58, 0  ;;  %v3215_v24 = vperm.slane %v3212_v58, 1 }
 0x949   :  { %3383 = vmatpush.bf16.msrb.mxu0 %v4281_v7 }
 0x94a   :  { %3396 = vmatpush.bf16.msra.mxu1 %v4345_v15 }
 0x94b   :  { %3409 = vmatpush.bf16.msrb.mxu2 %v4285_v3  ;;  %v3451_v3 = vld [vmem:[%s6381_s15 + $0x88] sm:$0xff]  ;;  %s4866_s15 = smov [#allocation9]  }
 0x94c   :  { %3422 = vmatpush.bf16.msrb.mxu3 %v4349_v31  ;;  %v2960_v31 = vld [vmem:[%s6378_s12] sm:$0x3]  ;;  %s3517_s22 = sshll.u32 %s4866_s15, 4  ;;  %s3518_s22 = int_to_ptr.vmem [resolvable:$true] %s3517_s22 }
 0x94d   :  { %3384 = vmatpush.bf16.msrb.mxu0 %v4273_v10  ;;  %v2962_v41 = vperm.slane %v2960_v31, 0 }
 0x94e   :  { %3397 = vmatpush.bf16.msra.mxu1 %v4337_v52 }
 0x94f   :  { %3410 = vmatpush.bf16.msrb.mxu2 %v4277_v14  ;;  %v2963_v14 = vperm.slane %v2960_v31, 1 }
 0x950   :  { %3423 = vmatpush.bf16.msrb.mxu3 %v4341_v28 }
 0x951   :  { %3385 = vmatpush.bf16.msrb.mxu0 %v4265_v55 }
 0x952   :  { %3398 = vmatpush.bf16.msra.mxu1 %v4329_v2 }
 0x953   :  { %3411 = vmatpush.bf16.msrb.mxu2 %v4269_v8 }
 0x954   :  { %3424 = vmatpush.bf16.msrb.mxu3 %v4333_v43  ;;  %3386 = vmatmul.bf16.vlgmr.msrb.gmra.mxu0 %v3178_v47 }
 0x955   :  { %3470 = vmatpush.msra.mxu0 %v3449_v49  ;;  %3399 = vmatmul.bf16.vlgmr.msra.gmra.mxu1 %v3179_v54 }
 0x956   :  { %3412 = vmatmul.bf16.vlgmr.msrb.gmra.mxu2 %v3178_v47  ;;  %3490 = vmatpush.msrb.mxu1 %v3465_v63 }
 0x957   :  { %3425 = vmatmul.bf16.vlgmr.msrb.gmra.mxu3 %v3179_v54  ;;  %3471 = vmatpush.msra.mxu0 %v3448_v21 }
 0x958   :  { %3491 = vmatpush.msrb.mxu1 %v3464_v4 }
 0x959   :  { %3472 = vmatpush.msra.mxu0 %v3447_v59  ;;  %v4726_v59 = vld [vmem:[%s6382_s16] ss:$0 sm:$0xff] }
 0x95a   :  { %3492 = vmatpush.msrb.mxu1 %v3463_v17 }
 0x95b   :  { %3473 = vmatpush.msra.mxu0 %v3446_v36 }
 0x95c   :  { %3493 = vmatpush.msrb.mxu1 %v3462_v25 }
 0x95d   :  { %3474 = vmatpush.msra.mxu0 %v3445_v1 }
 0x95e   :  { %3494 = vmatpush.msrb.mxu1 %v3461_v37 }
 0x95f   :  { %3475 = vmatpush.msra.mxu0 %v3444_v11 }
 0x960   :  { %3495 = vmatpush.msrb.mxu1 %v3460_v44 }
 0x961   :  { %3476 = vmatpush.msra.mxu0 %v3443_v18 }
 0x962   :  { %3496 = vmatpush.msrb.mxu1 %v3459_v57 }
 0x963   :  { %3477 = vmatpush.msra.mxu0 %v3442_v30 }
 0x964   :  { %3497 = vmatpush.msrb.mxu1 %v3458_v22 }
 0x965   :  { %3478 = vmatpush.msra.mxu0 %v3441_v39 }
 0x966   :  { %3498 = vmatpush.msrb.mxu1 %v3457_v34 }
 0x967   :  { %3479 = vmatpush.msra.mxu0 %v3440_v51 }
 0x968   :  { %3499 = vmatpush.msrb.mxu1 %v3456_v16 }
 0x969   :  { %3480 = vmatpush.msra.mxu0 %v3439_v62 }
 0x96a   :  { %3500 = vmatpush.msrb.mxu1 %v3455_v26 }
 0x96b   :  { %3481 = vmatpush.msra.mxu0 %v3438_v12 }
 0x96c   :  { %3501 = vmatpush.msrb.mxu1 %v3454_v40 }
 0x96d   :  { %3482 = vmatpush.msra.mxu0 %v3437_v23 }
 0x96e   :  { %3502 = vmatpush.msrb.mxu1 %v3453_v45 }
 0x96f   :  { %3483 = vmatpush.msra.mxu0 %v3436_v61 }
 0x970   :  { %3503 = vmatpush.msrb.mxu1 %v3452_v29 }
 0x971   :  { %3484 = vmatpush.msra.mxu0 %v3435_v48 }
 0x972   :  { %3504 = vmatpush.msrb.mxu1 %v3451_v3 }
 0x973   :  { %3485 = vmatpush.msra.mxu0 %v3434_v53 }
 0x974   :  { %3505 = vmatpush.msrb.mxu1 %v3450_v50 }
 0x9b1   :  { %v3135_v27 = vpop.f32.mrf.mxu0 }
 0x9b2   :  { %v3148_v0 = vpop.f32.mrf.mxu1  ;;  %v3136_v5 = vadd.f32 %v3135_v27, %v2962_v41 }
 0x9b4   :  { %v3149_v19 = vadd.f32 %v3148_v0, %v3136_v5 }
 0x9b9   :  { %v3161_v56 = vpop.f32.mrf.mxu2  ;;  %v3137_v7 = vpop.f32.mrf.mxu0 }
 0x9ba   :  { %v3174_v20 = vpop.f32.mrf.mxu3  ;;  %v3150_v15 = vpop.f32.mrf.mxu1  ;;  %v3162_v32 = vadd.f32 %v3161_v56, %v2963_v14 }
 0x9bc   :  { %v3175_v8 = vadd.f32 %v3174_v20, %v3162_v32 }
 0x9c1   :  { %v3163_v60 = vpop.f32.mrf.mxu2 }
 0x9c2   :  { %v3176_v6 = vpop.f32.mrf.mxu3 }
 0x9d1   :  { %v3387_v9 = vpop.f32.mrf.mxu0 }
 0x9d2   :  { %v3388_v10 = vadd.f32 %v3387_v9, %v3214_v13  ;;  %v3400_v52 = vpop.f32.mrf.mxu1 }
 0x9d4   :  { %v3401_v35 = vadd.f32 %v3400_v52, %v3388_v10 }
 0x9d6   :  { %v3430_v28 = vadd.f32 %v3401_v35, %v3149_v19 }
 0x9d8   :  { %v3432_v33 = vmax.f32 %v3430_v28, 0.0 }
 0x9d9   :  { %v3413_v38 = vpop.f32.mrf.mxu2  ;;  %v3389_v55 = vpop.f32.mrf.mxu0 }
 0x9da   :  { %v3414_v42 = vadd.f32 %v3413_v38, %v3215_v24  ;;  %v3426_v46 = vpop.f32.mrf.mxu3  ;;  %v3402_v2 = vpop.f32.mrf.mxu1  ;;  %3486 = vmatmul.f32.vlgmr.msra.gmra.mxu0 %v3432_v33 }
 0x9dc   :  { %v3427_v43 = vadd.f32 %v3426_v46, %v3414_v42 }
 0x9de   :  { %v3431_v47 = vadd.f32 %v3427_v43, %v3175_v8 }
 0x9e0   :  { %v3433_v49 = vmax.f32 %v3431_v47, 0.0 }
 0x9e1   :  { %v3415_v54 = vpop.f32.mrf.mxu2 }
 0x9e2   :  { %v3428_v21 = vpop.f32.mrf.mxu3  ;;  %3506 = vmatmul.f32.vlgmr.msrb.gmra.mxu1 %v3433_v49 }
 0xa57   :  { %v3487_v36 = vpop.f32.mrf.mxu0 }
 0xa58   :  { %v3488_v63 = vadd.f32 %v4726_v59, %v3487_v36 }
 0xa5f   :  { %v3507_v1 = vpop.f32.mrf.mxu1 }
 0xa60   :  { %v3508_v4 = vadd.f32 %v3507_v1, %v3488_v63 }
 0xa62   :  { %3511 = vst.msk [vmem:[#allocation9] sm:$0xf] %vm3510_vm6, %v3508_v4 }
 0xa63   :  { %3522 = dma.vmem_to_hbm [thread:$0]  %s3518_s22, 64, %s3520_s7, [#allocation8]  }
 0xa64   :  { %4855 = dma.done.wait [#allocation8], 64  }
 0xa65   :  { %4856 = vsyncadd [#allocation8], 4294967232 }
 0xa66   :  { %3527 = vsyncpa [#allocation7], 1 }
 0xa67   :  { %3528 = vsyncpa [#allocation8], 1 }
 0xa68   :  { %3529 = vsyncmov [#allocation5] }
 0xa6b   :  { %s3530_s16 = vpop.sfrf %3529 }
 0xa6c   :  { %p4390_p0 = scmp.ne.s32.totalorder %s3530_s16, 0 }
 0xa6e   :  { %3534 = shalt.err (%p4390_p0)  }
 0xa6f   :  { %3536 = vsyncmov [#allocation5 + $0x1] }
 0xa72   :  { %s3537_s24 = vpop.sfrf %3536 }
 0xa73   :  { %p4391_p1 = scmp.ne.s32.totalorder %s3537_s24, 0 }
 0xa75   :  { %3541 = shalt.err (%p4391_p1)  }
 0xa76   :  { %3543 = vsyncmov [#allocation5 + $0x2] }
 0xa79   :  { %s3544_s17 = vpop.sfrf %3543 }
 0xa7a   :  { %p4392_p2 = scmp.ne.s32.totalorder %s3544_s17, 0 }
 0xa7c   :  { %3548 = shalt.err (%p4392_p2)  }

</bundles_post_ra>
